<compile_context>
chip_gen: v7x
topology: tpu7x:2x2x1
jax: 0.10.0
libtpu: 0.0.40
codegen_flags: <defaults>
</compile_context>

<pallas_src>
import math

import jax
import jax.numpy as jnp
from jax.experimental import pallas as pl
from jax.experimental.pallas import tpu as pltpu


def gcn_model_kernel(x_ref, ahat_ref, negmask_ref,
                     w1c, asrc1, adst1, bsum1, g0, be0,
                     w2c, bsum2, g1, be1,
                     w3c, asrc3, adst3, bsum3, g2, be2,
                     w4c, bsum4,
                     out_ref, gat1_slab):
    f32 = jnp.float32
    bf16 = jnp.bfloat16

    a_hat = ahat_ref[...]            # [N, N] bf16, GCN symmetric-normalized adjacency
    neg_mask = negmask_ref[...]      # [N, N] f32, -1e30 on non-edges (self loops included)

    trans_b = (((1,), (1,)), ((), ()))

    def fused_matmul(h, w_ref):
        # bf16 inputs, f32 accumulate; one MXU dispatch per conv+mlp pair.
        return jnp.dot(h.astype(bf16), w_ref[...], preferred_element_type=f32)

    def layernorm(h, g_ref, be_ref):
        mu = jnp.mean(h, axis=-1, keepdims=True)
        var = jnp.mean((h - mu) * (h - mu), axis=-1, keepdims=True)
        return (h - mu) * jax.lax.rsqrt(var + 1e-5) * g_ref[...] + be_ref[...]

    def relu(h):
        return jnp.maximum(h, 0.0)

    def gat_attention(hw_bf, asrc_ref, adst_ref, heads, fout, slab_ref=None):
        # PyG GATConv: e_ij = LeakyReLU(a_dst . x'_i + a_src . x'_j), softmax over
        # incoming neighbours j (self loops included); out_i = sum_j alpha_ij x'_j.
        # Both score tensors come from one bf16 trans-B matmul each against a
        # block-diagonal attention matrix: d[n, h] (column form), s_t[h, n] (row form,
        # so no transpose is needed for the broadcast along axis j).
        d = jax.lax.dot_general(hw_bf, adst_ref[...], dimension_numbers=trans_b,
                                preferred_element_type=f32)            # [N, heads]
        s_t = jax.lax.dot_general(asrc_ref[...], hw_bf, dimension_numbers=trans_b,
                                  preferred_element_type=f32)          # [heads, N]
        acc = None
        for hd in range(heads):
            e = d[:, hd:hd + 1] + s_t[hd:hd + 1, :]                    # [N, N]
            e = jnp.where(e > 0, e, 0.2 * e)                           # LeakyReLU(0.2)
            e = e + neg_mask                                           # mask non-edges
            e = e - jnp.max(e, axis=-1, keepdims=True)
            p = jnp.exp(e)                                             # non-edges -> 0
            alpha = p * pl.reciprocal(jnp.sum(p, axis=-1, keepdims=True), approx=True)
            hh = hw_bf[:, hd * fout:(hd + 1) * fout]                   # [N, fout] bf16
            ho = jnp.dot(alpha.astype(bf16), hh,
                         preferred_element_type=f32)                   # [N, fout]
            if slab_ref is not None:
                slab_ref[:, hd * fout:(hd + 1) * fout] = ho            # concat via slab
            else:
                acc = ho if acc is None else acc + ho
        if slab_ref is not None:
            return slab_ref[...]
        return acc * (1.0 / heads)                                     # mean over heads

    # dropout -> identity (eval mode)

    # ---- layer 1: GATConv(1024, 32, heads=8, concat=True) + Linear(1024, 256) ----
    hw_all = fused_matmul(x_ref[...], w1c)                             # [N, 512]
    hw1_bf, mlp1 = hw_all[:, :256].astype(bf16), hw_all[:, 256:]
    gat1 = gat_attention(hw1_bf, asrc1, adst1, heads=8, fout=32, slab_ref=gat1_slab)
    h = gat1 + mlp1 + bsum1[...]
    h = relu(layernorm(h, g0, be0))

    # ---- layer 2: GCNConv(256, 128) + Linear(256, 128) ----
    hw_all = fused_matmul(h, w2c)                                      # [N, 256]
    gcn2 = jnp.dot(a_hat, hw_all[:, :128].astype(bf16), preferred_element_type=f32)
    h = gcn2 + hw_all[:, 128:] + bsum2[...]
    h = relu(layernorm(h, g1, be1))

    # ---- layer 3: GATConv(128, 64, heads=8, concat=False) + Linear(128, 64) ----
    hw_all = fused_matmul(h, w3c)                                      # [N, 576]
    gat3 = gat_attention(hw_all[:, :512].astype(bf16), asrc3, adst3, heads=8, fout=64)
    h = gat3 + hw_all[:, 512:] + bsum3[...]
    h = relu(layernorm(h, g2, be2))

    # ---- layer 4: GCNConv(64, 2) + Linear(64, 2), zero-padded to 128 lanes ----
    hw_all = fused_matmul(h, w4c)                                      # [N, 256]
    gcn4 = jnp.dot(a_hat, hw_all[:, :128].astype(bf16), preferred_element_type=f32)
    out = gcn4 + hw_all[:, 128:] + bsum4[...]                          # [N, 128]
    out_ref[...] = out.astype(out_ref.dtype)                           # lane-dense store


def _block_diag(att):
    # [H, F] -> [H, H*F] with att[h] placed in diagonal block h, zero elsewhere.
    h, f = att.shape
    eye = jnp.eye(h, dtype=att.dtype)
    return (eye[:, :, None] * att[:, None, :]).reshape(h, h * f)


def gcn_model_forward(x, edge_index, params):
    n = x.shape[0]
    src, dst = edge_index[0], edge_index[1]

    # Glue: densify edge_index (messages flow src -> dst), add self loops, precompute the
    # GCN symmetric normalization and the attention edge mask.
    adj = jnp.zeros((n, n), jnp.float32).at[dst, src].set(1.0)
    adj = jnp.maximum(adj, jnp.eye(n, dtype=jnp.float32))
    dinv = jax.lax.rsqrt(jnp.sum(adj, axis=1))
    a_hat = (adj * dinv[:, None] * dinv[None, :]).astype(jnp.bfloat16)
    neg_mask = (1.0 - adj) * (-1e30)

    p = params
    pad128 = lambda a: jnp.pad(a, ((0, 0), (0, 128 - a.shape[1])))
    bdiag_bf16 = lambda a: _block_diag(a).astype(jnp.bfloat16)

    # Fused conv+mlp weights (bf16, lane-dense outputs) and folded biases.
    w1c = jnp.concatenate([p["w1"], p["wm1"]], axis=1).astype(jnp.bfloat16)   # [1024, 512]
    w2c = jnp.concatenate([p["w2"], p["wm2"]], axis=1).astype(jnp.bfloat16)   # [256, 256]
    w3c = jnp.concatenate([p["w3"], p["wm3"]], axis=1).astype(jnp.bfloat16)   # [128, 576]
    w4c = jnp.concatenate([pad128(p["w4"]), pad128(p["wm4"])],
                          axis=1).astype(jnp.bfloat16)                        # [64, 256]
    bsum1 = p["b1"] + p["bm1"]                                                # [1, 256]
    bsum2 = p["b2"] + p["bm2"]                                                # [1, 128]
    bsum3 = p["b3"] + p["bm3"]                                                # [1, 64]
    bsum4 = pad128(p["b4"] + p["bm4"])                                        # [1, 128]

    inputs = [
        x, a_hat, neg_mask,
        w1c, bdiag_bf16(p["a_src1"]), bdiag_bf16(p["a_dst1"]), bsum1, p["g0"], p["be0"],
        w2c, bsum2, p["g1"], p["be1"],
        w3c, bdiag_bf16(p["a_src3"]), bdiag_bf16(p["a_dst3"]), bsum3, p["g2"], p["be2"],
        w4c, bsum4,
    ]

    out = pl.pallas_call(
        gcn_model_kernel,
        out_shape=jax.ShapeDtypeStruct((n, 128), jnp.float32),
        in_specs=[pl.BlockSpec(memory_space=pltpu.MemorySpace.VMEM)] * len(inputs),
        out_specs=pl.BlockSpec(memory_space=pltpu.MemorySpace.VMEM),
        scratch_shapes=[pltpu.VMEM((n, 256), jnp.float32)],   # GAT1 concat slab
        compiler_params=pltpu.CompilerParams(vmem_limit_bytes=32 * 1024 * 1024),
    )(*inputs)
    return out[:, :2]


def init_params(key):
    keys = iter(jax.random.split(key, 32))

    def w(shape):
        return jax.random.normal(next(keys), shape, jnp.float32) / math.sqrt(shape[0])

    def v(shape, scale=0.1):
        return scale * jax.random.normal(next(keys), shape, jnp.float32)

    return {
        # conv1 = GATConv(1024, 32, heads=8)  (concat=True -> 256 out)
        "w1": w((1024, 8 * 32)), "a_src1": v((8, 32)), "a_dst1": v((8, 32)),
        "b1": jnp.zeros((1, 256), jnp.float32),
        # mlp1 = Linear(1024, 256)
        "wm1": w((1024, 256)), "bm1": v((1, 256)),
        # norm0 = LayerNorm(256)
        "g0": jnp.ones((1, 256), jnp.float32), "be0": jnp.zeros((1, 256), jnp.float32),
        # conv2 = GCNConv(256, 128)
        "w2": w((256, 128)), "b2": jnp.zeros((1, 128), jnp.float32),
        # mlp2 = Linear(256, 128)
        "wm2": w((256, 128)), "bm2": v((1, 128)),
        # norm1 = LayerNorm(128)
        "g1": jnp.ones((1, 128), jnp.float32), "be1": jnp.zeros((1, 128), jnp.float32),
        # conv3 = GATConv(128, 64, heads=8, concat=False)
        "w3": w((128, 8 * 64)), "a_src3": v((8, 64)), "a_dst3": v((8, 64)),
        "b3": jnp.zeros((1, 64), jnp.float32),
        # mlp3 = Linear(128, 64)
        "wm3": w((128, 64)), "bm3": v((1, 64)),
        # norm2 = LayerNorm(64)
        "g2": jnp.ones((1, 64), jnp.float32), "be2": jnp.zeros((1, 64), jnp.float32),
        # conv4 = GCNConv(64, 2)
        "w4": w((64, 2)), "b4": jnp.zeros((1, 2), jnp.float32),
        # mlp4 = Linear(64, 2)
        "wm4": w((64, 2)), "bm4": v((1, 2)),
    }


if __name__ == "__main__":
    N, E = 16, 48
    key = jax.random.PRNGKey(0)
    kx, ks, kd, kp = jax.random.split(key, 4)

    x = jax.random.normal(kx, (N, 1024), jnp.float32)
    src = jax.random.randint(ks, (E,), 0, N)
    dst = jax.random.randint(kd, (E,), 0, N)
    edge_index = jnp.stack([src, dst])   # [2, E], PyG convention (row 0 = src, row 1 = dst)

    params = init_params(kp)

    out = gcn_model_forward(x, edge_index, params)
    jax.block_until_ready(out)
    assert out.shape == (N, 2) and out.dtype == jnp.float32
    print("KERNEL_OK")
</pallas_src>

<mosaic_0001>
module attributes {stable_mosaic.version = 11 : i64} {
  func.func @gcn_model_kernel(%arg0: memref<16x1024xf32, #tpu.memory_space<vmem>>, %arg1: memref<16x16xbf16, #tpu.memory_space<vmem>>, %arg2: memref<16x16xf32, #tpu.memory_space<vmem>>, %arg3: memref<1024x512xbf16, #tpu.memory_space<vmem>>, %arg4: memref<8x256xbf16, #tpu.memory_space<vmem>>, %arg5: memref<8x256xbf16, #tpu.memory_space<vmem>>, %arg6: memref<1x256xf32, #tpu.memory_space<vmem>>, %arg7: memref<1x256xf32, #tpu.memory_space<vmem>>, %arg8: memref<1x256xf32, #tpu.memory_space<vmem>>, %arg9: memref<256x256xbf16, #tpu.memory_space<vmem>>, %arg10: memref<1x128xf32, #tpu.memory_space<vmem>>, %arg11: memref<1x128xf32, #tpu.memory_space<vmem>>, %arg12: memref<1x128xf32, #tpu.memory_space<vmem>>, %arg13: memref<128x576xbf16, #tpu.memory_space<vmem>>, %arg14: memref<8x512xbf16, #tpu.memory_space<vmem>>, %arg15: memref<8x512xbf16, #tpu.memory_space<vmem>>, %arg16: memref<1x64xf32, #tpu.memory_space<vmem>>, %arg17: memref<1x64xf32, #tpu.memory_space<vmem>>, %arg18: memref<1x64xf32, #tpu.memory_space<vmem>>, %arg19: memref<64x256xbf16, #tpu.memory_space<vmem>>, %arg20: memref<1x128xf32, #tpu.memory_space<vmem>>, %arg21: memref<16x128xf32, #tpu.memory_space<vmem>>, %arg22: memref<16x256xf32, #tpu.memory_space<vmem>>) attributes {dimension_semantics = [], scalar_prefetch = 0 : i64, scratch_operands = 1 : i64, tpu.core_type = #tpu.core_type<tc>} {
    %c0 = arith.constant 0 : index
    %c0_0 = arith.constant 0 : index
    %0 = vector.load %arg1[%c0, %c0_0] : memref<16x16xbf16, #tpu.memory_space<vmem>>, vector<16x16xbf16>
    %c0_1 = arith.constant 0 : index
    %c0_2 = arith.constant 0 : index
    %1 = vector.load %arg2[%c0_1, %c0_2] : memref<16x16xf32, #tpu.memory_space<vmem>>, vector<16x16xf32>
    %c0_3 = arith.constant 0 : index
    %c0_4 = arith.constant 0 : index
    %2 = vector.load %arg0[%c0_3, %c0_4] : memref<16x1024xf32, #tpu.memory_space<vmem>>, vector<16x1024xf32>
    %3 = arith.truncf %2 : vector<16x1024xf32> to vector<16x1024xbf16>
    %c0_5 = arith.constant 0 : index
    %c0_6 = arith.constant 0 : index
    %4 = vector.load %arg3[%c0_5, %c0_6] : memref<1024x512xbf16, #tpu.memory_space<vmem>>, vector<1024x512xbf16>
    %cst = arith.constant dense<0.000000e+00> : vector<16x512xf32>
    %5 = tpu.matmul %3, %4, %cst {dimension_numbers = #tpu.dot_dimension_numbers<[1], [0], [0], [1], [0, 0, 1, 1], [], []>} : vector<16x1024xbf16>, vector<1024x512xbf16>, vector<16x512xf32> -> vector<16x512xf32>
    %6 = vector.extract_strided_slice %5 {offsets = [0, 0], sizes = [16, 256], strides = [1, 1]} : vector<16x512xf32> to vector<16x256xf32>
    %7 = arith.truncf %6 : vector<16x256xf32> to vector<16x256xbf16>
    %8 = vector.extract_strided_slice %5 {offsets = [0, 256], sizes = [16, 256], strides = [1, 1]} : vector<16x512xf32> to vector<16x256xf32>
    %c0_7 = arith.constant 0 : index
    %c0_8 = arith.constant 0 : index
    %9 = vector.load %arg5[%c0_7, %c0_8] : memref<8x256xbf16, #tpu.memory_space<vmem>>, vector<8x256xbf16>
    %cst_9 = arith.constant dense<0.000000e+00> : vector<16x8xf32>
    %10 = tpu.matmul %7, %9, %cst_9 {dimension_numbers = #tpu.dot_dimension_numbers<[1], [1], [0], [0], [0, 0, 1, 0], [], []>} : vector<16x256xbf16>, vector<8x256xbf16>, vector<16x8xf32> -> vector<16x8xf32>
    %c0_10 = arith.constant 0 : index
    %c0_11 = arith.constant 0 : index
    %11 = vector.load %arg4[%c0_10, %c0_11] : memref<8x256xbf16, #tpu.memory_space<vmem>>, vector<8x256xbf16>
    %cst_12 = arith.constant dense<0.000000e+00> : vector<8x16xf32>
    %12 = tpu.matmul %11, %7, %cst_12 {dimension_numbers = #tpu.dot_dimension_numbers<[1], [1], [0], [0], [0, 0, 1, 0], [], []>} : vector<8x256xbf16>, vector<16x256xbf16>, vector<8x16xf32> -> vector<8x16xf32>
    %13 = vector.extract_strided_slice %10 {offsets = [0, 0], sizes = [16, 1], strides = [1, 1]} : vector<16x8xf32> to vector<16x1xf32>
    %14 = vector.extract_strided_slice %12 {offsets = [0, 0], sizes = [1, 16], strides = [1, 1]} : vector<8x16xf32> to vector<1x16xf32>
    %15 = vector.broadcast %13 : vector<16x1xf32> to vector<16x16xf32>
    %16 = vector.broadcast %14 : vector<1x16xf32> to vector<16x16xf32>
    %17 = arith.addf %15, %16 : vector<16x16xf32>
    %cst_13 = arith.constant 0.000000e+00 : f32
    %18 = vector.broadcast %cst_13 : f32 to vector<16x16xf32>
    %19 = arith.cmpf ogt, %17, %18 : vector<16x16xf32>
    %cst_14 = arith.constant 2.000000e-01 : f32
    %20 = vector.broadcast %cst_14 : f32 to vector<16x16xf32>
    %21 = arith.mulf %20, %17 : vector<16x16xf32>
    %22 = arith.select %19, %17, %21 : vector<16x16xi1>, vector<16x16xf32>
    %23 = arith.addf %22, %1 : vector<16x16xf32>
    %cst_15 = arith.constant dense<0xFF800000> : vector<16xf32>
    %24 = vector.multi_reduction <maximumf>, %23, %cst_15 [1] : vector<16x16xf32> to vector<16xf32>
    %25 = vector.shape_cast %24 : vector<16xf32> to vector<16x1xf32>
    %26 = vector.broadcast %25 : vector<16x1xf32> to vector<16x16xf32>
    %27 = arith.subf %23, %26 : vector<16x16xf32>
    %28 = math.exp %27 : vector<16x16xf32>
    %cst_16 = arith.constant dense<0.000000e+00> : vector<16xf32>
    %29 = vector.multi_reduction <add>, %28, %cst_16 [1] : vector<16x16xf32> to vector<16xf32>
    %30 = vector.shape_cast %29 : vector<16xf32> to vector<16x1xf32>
    %31 = tpu.reciprocal %30 {approx = true} : vector<16x1xf32> -> vector<16x1xf32>
    %32 = vector.broadcast %31 : vector<16x1xf32> to vector<16x16xf32>
    %33 = arith.mulf %28, %32 : vector<16x16xf32>
    %34 = vector.extract_strided_slice %7 {offsets = [0, 0], sizes = [16, 32], strides = [1, 1]} : vector<16x256xbf16> to vector<16x32xbf16>
    %35 = arith.truncf %33 : vector<16x16xf32> to vector<16x16xbf16>
    %cst_17 = arith.constant dense<0.000000e+00> : vector<16x32xf32>
    %36 = tpu.matmul %35, %34, %cst_17 {dimension_numbers = #tpu.dot_dimension_numbers<[1], [0], [0], [1], [0, 0, 1, 1], [], []>} : vector<16x16xbf16>, vector<16x32xbf16>, vector<16x32xf32> -> vector<16x32xf32>
    %c0_18 = arith.constant 0 : index
    %c0_19 = arith.constant 0 : index
    %37 = vector.load %arg22[%c0_18, %c0_19] : memref<16x256xf32, #tpu.memory_space<vmem>>, vector<16x32xf32>
    tpu.vector_store %arg22[%c0_18, %c0_19], %36 {strides = array<i32>} : memref<16x256xf32, #tpu.memory_space<vmem>>, vector<16x32xf32>,
    %38 = vector.extract_strided_slice %10 {offsets = [0, 1], sizes = [16, 1], strides = [1, 1]} : vector<16x8xf32> to vector<16x1xf32>
    %39 = vector.extract_strided_slice %12 {offsets = [1, 0], sizes = [1, 16], strides = [1, 1]} : vector<8x16xf32> to vector<1x16xf32>
    %40 = vector.broadcast %38 : vector<16x1xf32> to vector<16x16xf32>
    %41 = vector.broadcast %39 : vector<1x16xf32> to vector<16x16xf32>
    %42 = arith.addf %40, %41 : vector<16x16xf32>
    %cst_20 = arith.constant 0.000000e+00 : f32
    %43 = vector.broadcast %cst_20 : f32 to vector<16x16xf32>
    %44 = arith.cmpf ogt, %42, %43 : vector<16x16xf32>
    %cst_21 = arith.constant 2.000000e-01 : f32
    %45 = vector.broadcast %cst_21 : f32 to vector<16x16xf32>
    %46 = arith.mulf %45, %42 : vector<16x16xf32>
    %47 = arith.select %44, %42, %46 : vector<16x16xi1>, vector<16x16xf32>
    %48 = arith.addf %47, %1 : vector<16x16xf32>
    %cst_22 = arith.constant dense<0xFF800000> : vector<16xf32>
    %49 = vector.multi_reduction <maximumf>, %48, %cst_22 [1] : vector<16x16xf32> to vector<16xf32>
    %50 = vector.shape_cast %49 : vector<16xf32> to vector<16x1xf32>
    %51 = vector.broadcast %50 : vector<16x1xf32> to vector<16x16xf32>
    %52 = arith.subf %48, %51 : vector<16x16xf32>
    %53 = math.exp %52 : vector<16x16xf32>
    %cst_23 = arith.constant dense<0.000000e+00> : vector<16xf32>
    %54 = vector.multi_reduction <add>, %53, %cst_23 [1] : vector<16x16xf32> to vector<16xf32>
    %55 = vector.shape_cast %54 : vector<16xf32> to vector<16x1xf32>
    %56 = tpu.reciprocal %55 {approx = true} : vector<16x1xf32> -> vector<16x1xf32>
    %57 = vector.broadcast %56 : vector<16x1xf32> to vector<16x16xf32>
    %58 = arith.mulf %53, %57 : vector<16x16xf32>
    %59 = vector.extract_strided_slice %7 {offsets = [0, 32], sizes = [16, 32], strides = [1, 1]} : vector<16x256xbf16> to vector<16x32xbf16>
    %60 = arith.truncf %58 : vector<16x16xf32> to vector<16x16xbf16>
    %cst_24 = arith.constant dense<0.000000e+00> : vector<16x32xf32>
    %61 = tpu.matmul %60, %59, %cst_24 {dimension_numbers = #tpu.dot_dimension_numbers<[1], [0], [0], [1], [0, 0, 1, 1], [], []>} : vector<16x16xbf16>, vector<16x32xbf16>, vector<16x32xf32> -> vector<16x32xf32>
    %c0_25 = arith.constant 0 : index
    %c32 = arith.constant 32 : index
    %62 = vector.load %arg22[%c0_25, %c32] : memref<16x256xf32, #tpu.memory_space<vmem>>, vector<16x32xf32>
    tpu.vector_store %arg22[%c0_25, %c32], %61 {strides = array<i32>} : memref<16x256xf32, #tpu.memory_space<vmem>>, vector<16x32xf32>,
    %63 = vector.extract_strided_slice %10 {offsets = [0, 2], sizes = [16, 1], strides = [1, 1]} : vector<16x8xf32> to vector<16x1xf32>
    %64 = vector.extract_strided_slice %12 {offsets = [2, 0], sizes = [1, 16], strides = [1, 1]} : vector<8x16xf32> to vector<1x16xf32>
    %65 = vector.broadcast %63 : vector<16x1xf32> to vector<16x16xf32>
    %66 = vector.broadcast %64 : vector<1x16xf32> to vector<16x16xf32>
    %67 = arith.addf %65, %66 : vector<16x16xf32>
    %cst_26 = arith.constant 0.000000e+00 : f32
    %68 = vector.broadcast %cst_26 : f32 to vector<16x16xf32>
    %69 = arith.cmpf ogt, %67, %68 : vector<16x16xf32>
    %cst_27 = arith.constant 2.000000e-01 : f32
    %70 = vector.broadcast %cst_27 : f32 to vector<16x16xf32>
    %71 = arith.mulf %70, %67 : vector<16x16xf32>
    %72 = arith.select %69, %67, %71 : vector<16x16xi1>, vector<16x16xf32>
    %73 = arith.addf %72, %1 : vector<16x16xf32>
    %cst_28 = arith.constant dense<0xFF800000> : vector<16xf32>
    %74 = vector.multi_reduction <maximumf>, %73, %cst_28 [1] : vector<16x16xf32> to vector<16xf32>
    %75 = vector.shape_cast %74 : vector<16xf32> to vector<16x1xf32>
    %76 = vector.broadcast %75 : vector<16x1xf32> to vector<16x16xf32>
    %77 = arith.subf %73, %76 : vector<16x16xf32>
    %78 = math.exp %77 : vector<16x16xf32>
    %cst_29 = arith.constant dense<0.000000e+00> : vector<16xf32>
    %79 = vector.multi_reduction <add>, %78, %cst_29 [1] : vector<16x16xf32> to vector<16xf32>
    %80 = vector.shape_cast %79 : vector<16xf32> to vector<16x1xf32>
    %81 = tpu.reciprocal %80 {approx = true} : vector<16x1xf32> -> vector<16x1xf32>
    %82 = vector.broadcast %81 : vector<16x1xf32> to vector<16x16xf32>
    %83 = arith.mulf %78, %82 : vector<16x16xf32>
    %84 = vector.extract_strided_slice %7 {offsets = [0, 64], sizes = [16, 32], strides = [1, 1]} : vector<16x256xbf16> to vector<16x32xbf16>
    %85 = arith.truncf %83 : vector<16x16xf32> to vector<16x16xbf16>
    %cst_30 = arith.constant dense<0.000000e+00> : vector<16x32xf32>
    %86 = tpu.matmul %85, %84, %cst_30 {dimension_numbers = #tpu.dot_dimension_numbers<[1], [0], [0], [1], [0, 0, 1, 1], [], []>} : vector<16x16xbf16>, vector<16x32xbf16>, vector<16x32xf32> -> vector<16x32xf32>
    %c0_31 = arith.constant 0 : index
    %c64 = arith.constant 64 : index
    %87 = vector.load %arg22[%c0_31, %c64] : memref<16x256xf32, #tpu.memory_space<vmem>>, vector<16x32xf32>
    tpu.vector_store %arg22[%c0_31, %c64], %86 {strides = array<i32>} : memref<16x256xf32, #tpu.memory_space<vmem>>, vector<16x32xf32>,
    %88 = vector.extract_strided_slice %10 {offsets = [0, 3], sizes = [16, 1], strides = [1, 1]} : vector<16x8xf32> to vector<16x1xf32>
    %89 = vector.extract_strided_slice %12 {offsets = [3, 0], sizes = [1, 16], strides = [1, 1]} : vector<8x16xf32> to vector<1x16xf32>
    %90 = vector.broadcast %88 : vector<16x1xf32> to vector<16x16xf32>
    %91 = vector.broadcast %89 : vector<1x16xf32> to vector<16x16xf32>
    %92 = arith.addf %90, %91 : vector<16x16xf32>
    %cst_32 = arith.constant 0.000000e+00 : f32
    %93 = vector.broadcast %cst_32 : f32 to vector<16x16xf32>
    %94 = arith.cmpf ogt, %92, %93 : vector<16x16xf32>
    %cst_33 = arith.constant 2.000000e-01 : f32
    %95 = vector.broadcast %cst_33 : f32 to vector<16x16xf32>
    %96 = arith.mulf %95, %92 : vector<16x16xf32>
    %97 = arith.select %94, %92, %96 : vector<16x16xi1>, vector<16x16xf32>
    %98 = arith.addf %97, %1 : vector<16x16xf32>
    %cst_34 = arith.constant dense<0xFF800000> : vector<16xf32>
    %99 = vector.multi_reduction <maximumf>, %98, %cst_34 [1] : vector<16x16xf32> to vector<16xf32>
    %100 = vector.shape_cast %99 : vector<16xf32> to vector<16x1xf32>
    %101 = vector.broadcast %100 : vector<16x1xf32> to vector<16x16xf32>
    %102 = arith.subf %98, %101 : vector<16x16xf32>
    %103 = math.exp %102 : vector<16x16xf32>
    %cst_35 = arith.constant dense<0.000000e+00> : vector<16xf32>
    %104 = vector.multi_reduction <add>, %103, %cst_35 [1] : vector<16x16xf32> to vector<16xf32>
    %105 = vector.shape_cast %104 : vector<16xf32> to vector<16x1xf32>
    %106 = tpu.reciprocal %105 {approx = true} : vector<16x1xf32> -> vector<16x1xf32>
    %107 = vector.broadcast %106 : vector<16x1xf32> to vector<16x16xf32>
    %108 = arith.mulf %103, %107 : vector<16x16xf32>
    %109 = vector.extract_strided_slice %7 {offsets = [0, 96], sizes = [16, 32], strides = [1, 1]} : vector<16x256xbf16> to vector<16x32xbf16>
    %110 = arith.truncf %108 : vector<16x16xf32> to vector<16x16xbf16>
    %cst_36 = arith.constant dense<0.000000e+00> : vector<16x32xf32>
    %111 = tpu.matmul %110, %109, %cst_36 {dimension_numbers = #tpu.dot_dimension_numbers<[1], [0], [0], [1], [0, 0, 1, 1], [], []>} : vector<16x16xbf16>, vector<16x32xbf16>, vector<16x32xf32> -> vector<16x32xf32>
    %c0_37 = arith.constant 0 : index
    %c96 = arith.constant 96 : index
    %112 = vector.load %arg22[%c0_37, %c96] : memref<16x256xf32, #tpu.memory_space<vmem>>, vector<16x32xf32>
    tpu.vector_store %arg22[%c0_37, %c96], %111 {strides = array<i32>} : memref<16x256xf32, #tpu.memory_space<vmem>>, vector<16x32xf32>,
    %113 = vector.extract_strided_slice %10 {offsets = [0, 4], sizes = [16, 1], strides = [1, 1]} : vector<16x8xf32> to vector<16x1xf32>
    %114 = vector.extract_strided_slice %12 {offsets = [4, 0], sizes = [1, 16], strides = [1, 1]} : vector<8x16xf32> to vector<1x16xf32>
    %115 = vector.broadcast %113 : vector<16x1xf32> to vector<16x16xf32>
    %116 = vector.broadcast %114 : vector<1x16xf32> to vector<16x16xf32>
    %117 = arith.addf %115, %116 : vector<16x16xf32>
    %cst_38 = arith.constant 0.000000e+00 : f32
    %118 = vector.broadcast %cst_38 : f32 to vector<16x16xf32>
    %119 = arith.cmpf ogt, %117, %118 : vector<16x16xf32>
    %cst_39 = arith.constant 2.000000e-01 : f32
    %120 = vector.broadcast %cst_39 : f32 to vector<16x16xf32>
    %121 = arith.mulf %120, %117 : vector<16x16xf32>
    %122 = arith.select %119, %117, %121 : vector<16x16xi1>, vector<16x16xf32>
    %123 = arith.addf %122, %1 : vector<16x16xf32>
    %cst_40 = arith.constant dense<0xFF800000> : vector<16xf32>
    %124 = vector.multi_reduction <maximumf>, %123, %cst_40 [1] : vector<16x16xf32> to vector<16xf32>
    %125 = vector.shape_cast %124 : vector<16xf32> to vector<16x1xf32>
    %126 = vector.broadcast %125 : vector<16x1xf32> to vector<16x16xf32>
    %127 = arith.subf %123, %126 : vector<16x16xf32>
    %128 = math.exp %127 : vector<16x16xf32>
    %cst_41 = arith.constant dense<0.000000e+00> : vector<16xf32>
    %129 = vector.multi_reduction <add>, %128, %cst_41 [1] : vector<16x16xf32> to vector<16xf32>
    %130 = vector.shape_cast %129 : vector<16xf32> to vector<16x1xf32>
    %131 = tpu.reciprocal %130 {approx = true} : vector<16x1xf32> -> vector<16x1xf32>
    %132 = vector.broadcast %131 : vector<16x1xf32> to vector<16x16xf32>
    %133 = arith.mulf %128, %132 : vector<16x16xf32>
    %134 = vector.extract_strided_slice %7 {offsets = [0, 128], sizes = [16, 32], strides = [1, 1]} : vector<16x256xbf16> to vector<16x32xbf16>
    %135 = arith.truncf %133 : vector<16x16xf32> to vector<16x16xbf16>
    %cst_42 = arith.constant dense<0.000000e+00> : vector<16x32xf32>
    %136 = tpu.matmul %135, %134, %cst_42 {dimension_numbers = #tpu.dot_dimension_numbers<[1], [0], [0], [1], [0, 0, 1, 1], [], []>} : vector<16x16xbf16>, vector<16x32xbf16>, vector<16x32xf32> -> vector<16x32xf32>
    %c0_43 = arith.constant 0 : index
    %c128 = arith.constant 128 : index
    %137 = vector.load %arg22[%c0_43, %c128] : memref<16x256xf32, #tpu.memory_space<vmem>>, vector<16x32xf32>
    tpu.vector_store %arg22[%c0_43, %c128], %136 {strides = array<i32>} : memref<16x256xf32, #tpu.memory_space<vmem>>, vector<16x32xf32>,
    %138 = vector.extract_strided_slice %10 {offsets = [0, 5], sizes = [16, 1], strides = [1, 1]} : vector<16x8xf32> to vector<16x1xf32>
    %139 = vector.extract_strided_slice %12 {offsets = [5, 0], sizes = [1, 16], strides = [1, 1]} : vector<8x16xf32> to vector<1x16xf32>
    %140 = vector.broadcast %138 : vector<16x1xf32> to vector<16x16xf32>
    %141 = vector.broadcast %139 : vector<1x16xf32> to vector<16x16xf32>
    %142 = arith.addf %140, %141 : vector<16x16xf32>
    %cst_44 = arith.constant 0.000000e+00 : f32
    %143 = vector.broadcast %cst_44 : f32 to vector<16x16xf32>
    %144 = arith.cmpf ogt, %142, %143 : vector<16x16xf32>
    %cst_45 = arith.constant 2.000000e-01 : f32
    %145 = vector.broadcast %cst_45 : f32 to vector<16x16xf32>
    %146 = arith.mulf %145, %142 : vector<16x16xf32>
    %147 = arith.select %144, %142, %146 : vector<16x16xi1>, vector<16x16xf32>
    %148 = arith.addf %147, %1 : vector<16x16xf32>
    %cst_46 = arith.constant dense<0xFF800000> : vector<16xf32>
    %149 = vector.multi_reduction <maximumf>, %148, %cst_46 [1] : vector<16x16xf32> to vector<16xf32>
    %150 = vector.shape_cast %149 : vector<16xf32> to vector<16x1xf32>
    %151 = vector.broadcast %150 : vector<16x1xf32> to vector<16x16xf32>
    %152 = arith.subf %148, %151 : vector<16x16xf32>
    %153 = math.exp %152 : vector<16x16xf32>
    %cst_47 = arith.constant dense<0.000000e+00> : vector<16xf32>
    %154 = vector.multi_reduction <add>, %153, %cst_47 [1] : vector<16x16xf32> to vector<16xf32>
    %155 = vector.shape_cast %154 : vector<16xf32> to vector<16x1xf32>
    %156 = tpu.reciprocal %155 {approx = true} : vector<16x1xf32> -> vector<16x1xf32>
    %157 = vector.broadcast %156 : vector<16x1xf32> to vector<16x16xf32>
    %158 = arith.mulf %153, %157 : vector<16x16xf32>
    %159 = vector.extract_strided_slice %7 {offsets = [0, 160], sizes = [16, 32], strides = [1, 1]} : vector<16x256xbf16> to vector<16x32xbf16>
    %160 = arith.truncf %158 : vector<16x16xf32> to vector<16x16xbf16>
    %cst_48 = arith.constant dense<0.000000e+00> : vector<16x32xf32>
    %161 = tpu.matmul %160, %159, %cst_48 {dimension_numbers = #tpu.dot_dimension_numbers<[1], [0], [0], [1], [0, 0, 1, 1], [], []>} : vector<16x16xbf16>, vector<16x32xbf16>, vector<16x32xf32> -> vector<16x32xf32>
    %c0_49 = arith.constant 0 : index
    %c160 = arith.constant 160 : index
    %162 = vector.load %arg22[%c0_49, %c160] : memref<16x256xf32, #tpu.memory_space<vmem>>, vector<16x32xf32>
    tpu.vector_store %arg22[%c0_49, %c160], %161 {strides = array<i32>} : memref<16x256xf32, #tpu.memory_space<vmem>>, vector<16x32xf32>,
    %163 = vector.extract_strided_slice %10 {offsets = [0, 6], sizes = [16, 1], strides = [1, 1]} : vector<16x8xf32> to vector<16x1xf32>
    %164 = vector.extract_strided_slice %12 {offsets = [6, 0], sizes = [1, 16], strides = [1, 1]} : vector<8x16xf32> to vector<1x16xf32>
    %165 = vector.broadcast %163 : vector<16x1xf32> to vector<16x16xf32>
    %166 = vector.broadcast %164 : vector<1x16xf32> to vector<16x16xf32>
    %167 = arith.addf %165, %166 : vector<16x16xf32>
    %cst_50 = arith.constant 0.000000e+00 : f32
    %168 = vector.broadcast %cst_50 : f32 to vector<16x16xf32>
    %169 = arith.cmpf ogt, %167, %168 : vector<16x16xf32>
    %cst_51 = arith.constant 2.000000e-01 : f32
    %170 = vector.broadcast %cst_51 : f32 to vector<16x16xf32>
    %171 = arith.mulf %170, %167 : vector<16x16xf32>
    %172 = arith.select %169, %167, %171 : vector<16x16xi1>, vector<16x16xf32>
    %173 = arith.addf %172, %1 : vector<16x16xf32>
    %cst_52 = arith.constant dense<0xFF800000> : vector<16xf32>
    %174 = vector.multi_reduction <maximumf>, %173, %cst_52 [1] : vector<16x16xf32> to vector<16xf32>
    %175 = vector.shape_cast %174 : vector<16xf32> to vector<16x1xf32>
    %176 = vector.broadcast %175 : vector<16x1xf32> to vector<16x16xf32>
    %177 = arith.subf %173, %176 : vector<16x16xf32>
    %178 = math.exp %177 : vector<16x16xf32>
    %cst_53 = arith.constant dense<0.000000e+00> : vector<16xf32>
    %179 = vector.multi_reduction <add>, %178, %cst_53 [1] : vector<16x16xf32> to vector<16xf32>
    %180 = vector.shape_cast %179 : vector<16xf32> to vector<16x1xf32>
    %181 = tpu.reciprocal %180 {approx = true} : vector<16x1xf32> -> vector<16x1xf32>
    %182 = vector.broadcast %181 : vector<16x1xf32> to vector<16x16xf32>
    %183 = arith.mulf %178, %182 : vector<16x16xf32>
    %184 = vector.extract_strided_slice %7 {offsets = [0, 192], sizes = [16, 32], strides = [1, 1]} : vector<16x256xbf16> to vector<16x32xbf16>
    %185 = arith.truncf %183 : vector<16x16xf32> to vector<16x16xbf16>
    %cst_54 = arith.constant dense<0.000000e+00> : vector<16x32xf32>
    %186 = tpu.matmul %185, %184, %cst_54 {dimension_numbers = #tpu.dot_dimension_numbers<[1], [0], [0], [1], [0, 0, 1, 1], [], []>} : vector<16x16xbf16>, vector<16x32xbf16>, vector<16x32xf32> -> vector<16x32xf32>
    %c0_55 = arith.constant 0 : index
    %c192 = arith.constant 192 : index
    %187 = vector.load %arg22[%c0_55, %c192] : memref<16x256xf32, #tpu.memory_space<vmem>>, vector<16x32xf32>
    tpu.vector_store %arg22[%c0_55, %c192], %186 {strides = array<i32>} : memref<16x256xf32, #tpu.memory_space<vmem>>, vector<16x32xf32>,
    %188 = vector.extract_strided_slice %10 {offsets = [0, 7], sizes = [16, 1], strides = [1, 1]} : vector<16x8xf32> to vector<16x1xf32>
    %189 = vector.extract_strided_slice %12 {offsets = [7, 0], sizes = [1, 16], strides = [1, 1]} : vector<8x16xf32> to vector<1x16xf32>
    %190 = vector.broadcast %188 : vector<16x1xf32> to vector<16x16xf32>
    %191 = vector.broadcast %189 : vector<1x16xf32> to vector<16x16xf32>
    %192 = arith.addf %190, %191 : vector<16x16xf32>
    %cst_56 = arith.constant 0.000000e+00 : f32
    %193 = vector.broadcast %cst_56 : f32 to vector<16x16xf32>
    %194 = arith.cmpf ogt, %192, %193 : vector<16x16xf32>
    %cst_57 = arith.constant 2.000000e-01 : f32
    %195 = vector.broadcast %cst_57 : f32 to vector<16x16xf32>
    %196 = arith.mulf %195, %192 : vector<16x16xf32>
    %197 = arith.select %194, %192, %196 : vector<16x16xi1>, vector<16x16xf32>
    %198 = arith.addf %197, %1 : vector<16x16xf32>
    %cst_58 = arith.constant dense<0xFF800000> : vector<16xf32>
    %199 = vector.multi_reduction <maximumf>, %198, %cst_58 [1] : vector<16x16xf32> to vector<16xf32>
    %200 = vector.shape_cast %199 : vector<16xf32> to vector<16x1xf32>
    %201 = vector.broadcast %200 : vector<16x1xf32> to vector<16x16xf32>
    %202 = arith.subf %198, %201 : vector<16x16xf32>
    %203 = math.exp %202 : vector<16x16xf32>
    %cst_59 = arith.constant dense<0.000000e+00> : vector<16xf32>
    %204 = vector.multi_reduction <add>, %203, %cst_59 [1] : vector<16x16xf32> to vector<16xf32>
    %205 = vector.shape_cast %204 : vector<16xf32> to vector<16x1xf32>
    %206 = tpu.reciprocal %205 {approx = true} : vector<16x1xf32> -> vector<16x1xf32>
    %207 = vector.broadcast %206 : vector<16x1xf32> to vector<16x16xf32>
    %208 = arith.mulf %203, %207 : vector<16x16xf32>
    %209 = vector.extract_strided_slice %7 {offsets = [0, 224], sizes = [16, 32], strides = [1, 1]} : vector<16x256xbf16> to vector<16x32xbf16>
    %210 = arith.truncf %208 : vector<16x16xf32> to vector<16x16xbf16>
    %cst_60 = arith.constant dense<0.000000e+00> : vector<16x32xf32>
    %211 = tpu.matmul %210, %209, %cst_60 {dimension_numbers = #tpu.dot_dimension_numbers<[1], [0], [0], [1], [0, 0, 1, 1], [], []>} : vector<16x16xbf16>, vector<16x32xbf16>, vector<16x32xf32> -> vector<16x32xf32>
    %c0_61 = arith.constant 0 : index
    %c224 = arith.constant 224 : index
    %212 = vector.load %arg22[%c0_61, %c224] : memref<16x256xf32, #tpu.memory_space<vmem>>, vector<16x32xf32>
    tpu.vector_store %arg22[%c0_61, %c224], %211 {strides = array<i32>} : memref<16x256xf32, #tpu.memory_space<vmem>>, vector<16x32xf32>,
    %c0_62 = arith.constant 0 : index
    %c0_63 = arith.constant 0 : index
    %213 = vector.load %arg22[%c0_62, %c0_63] : memref<16x256xf32, #tpu.memory_space<vmem>>, vector<16x256xf32>
    %214 = arith.addf %213, %8 : vector<16x256xf32>
    %c0_64 = arith.constant 0 : index
    %c0_65 = arith.constant 0 : index
    %215 = vector.load %arg6[%c0_64, %c0_65] : memref<1x256xf32, #tpu.memory_space<vmem>>, vector<1x256xf32>
    %216 = vector.broadcast %215 : vector<1x256xf32> to vector<16x256xf32>
    %217 = arith.addf %214, %216 : vector<16x256xf32>
    %cst_66 = arith.constant dense<0.000000e+00> : vector<16xf32>
    %218 = vector.multi_reduction <add>, %217, %cst_66 [1] : vector<16x256xf32> to vector<16xf32>
    %219 = vector.shape_cast %218 : vector<16xf32> to vector<16x1xf32>
    %cst_67 = arith.constant 2.560000e+02 : f32
    %220 = vector.broadcast %cst_67 : f32 to vector<16x1xf32>
    %221 = arith.divf %219, %220 : vector<16x1xf32>
    %222 = vector.broadcast %221 : vector<16x1xf32> to vector<16x256xf32>
    %223 = arith.subf %217, %222 : vector<16x256xf32>
    %224 = vector.broadcast %221 : vector<16x1xf32> to vector<16x256xf32>
    %225 = arith.subf %217, %224 : vector<16x256xf32>
    %226 = arith.mulf %223, %225 : vector<16x256xf32>
    %cst_68 = arith.constant dense<0.000000e+00> : vector<16xf32>
    %227 = vector.multi_reduction <add>, %226, %cst_68 [1] : vector<16x256xf32> to vector<16xf32>
    %228 = vector.shape_cast %227 : vector<16xf32> to vector<16x1xf32>
    %cst_69 = arith.constant 2.560000e+02 : f32
    %229 = vector.broadcast %cst_69 : f32 to vector<16x1xf32>
    %230 = arith.divf %228, %229 : vector<16x1xf32>
    %231 = vector.broadcast %221 : vector<16x1xf32> to vector<16x256xf32>
    %232 = arith.subf %217, %231 : vector<16x256xf32>
    %cst_70 = arith.constant 9.99999974E-6 : f32
    %233 = vector.broadcast %cst_70 : f32 to vector<16x1xf32>
    %234 = arith.addf %230, %233 : vector<16x1xf32>
    %235 = math.rsqrt %234 : vector<16x1xf32>
    %236 = vector.broadcast %235 : vector<16x1xf32> to vector<16x256xf32>
    %237 = arith.mulf %232, %236 : vector<16x256xf32>
    %c0_71 = arith.constant 0 : index
    %c0_72 = arith.constant 0 : index
    %238 = vector.load %arg7[%c0_71, %c0_72] : memref<1x256xf32, #tpu.memory_space<vmem>>, vector<1x256xf32>
    %239 = vector.broadcast %238 : vector<1x256xf32> to vector<16x256xf32>
    %240 = arith.mulf %237, %239 : vector<16x256xf32>
    %c0_73 = arith.constant 0 : index
    %c0_74 = arith.constant 0 : index
    %241 = vector.load %arg8[%c0_73, %c0_74] : memref<1x256xf32, #tpu.memory_space<vmem>>, vector<1x256xf32>
    %242 = vector.broadcast %241 : vector<1x256xf32> to vector<16x256xf32>
    %243 = arith.addf %240, %242 : vector<16x256xf32>
    %cst_75 = arith.constant 0.000000e+00 : f32
    %244 = vector.broadcast %cst_75 : f32 to vector<16x256xf32>
    %245 = arith.maximumf %243, %244 : vector<16x256xf32>
    %246 = arith.truncf %245 : vector<16x256xf32> to vector<16x256xbf16>
    %c0_76 = arith.constant 0 : index
    %c0_77 = arith.constant 0 : index
    %247 = vector.load %arg9[%c0_76, %c0_77] : memref<256x256xbf16, #tpu.memory_space<vmem>>, vector<256x256xbf16>
    %cst_78 = arith.constant dense<0.000000e+00> : vector<16x256xf32>
    %248 = tpu.matmul %246, %247, %cst_78 {dimension_numbers = #tpu.dot_dimension_numbers<[1], [0], [0], [1], [0, 0, 1, 1], [], []>} : vector<16x256xbf16>, vector<256x256xbf16>, vector<16x256xf32> -> vector<16x256xf32>
    %249 = vector.extract_strided_slice %248 {offsets = [0, 0], sizes = [16, 128], strides = [1, 1]} : vector<16x256xf32> to vector<16x128xf32>
    %250 = arith.truncf %249 : vector<16x128xf32> to vector<16x128xbf16>
    %cst_79 = arith.constant dense<0.000000e+00> : vector<16x128xf32>
    %251 = tpu.matmul %0, %250, %cst_79 {dimension_numbers = #tpu.dot_dimension_numbers<[1], [0], [0], [1], [0, 0, 1, 1], [], []>} : vector<16x16xbf16>, vector<16x128xbf16>, vector<16x128xf32> -> vector<16x128xf32>
    %252 = vector.extract_strided_slice %248 {offsets = [0, 128], sizes = [16, 128], strides = [1, 1]} : vector<16x256xf32> to vector<16x128xf32>
    %253 = arith.addf %251, %252 : vector<16x128xf32>
    %c0_80 = arith.constant 0 : index
    %c0_81 = arith.constant 0 : index
    %254 = vector.load %arg10[%c0_80, %c0_81] : memref<1x128xf32, #tpu.memory_space<vmem>>, vector<1x128xf32>
    %255 = vector.broadcast %254 : vector<1x128xf32> to vector<16x128xf32>
    %256 = arith.addf %253, %255 : vector<16x128xf32>
    %cst_82 = arith.constant dense<0.000000e+00> : vector<16xf32>
    %257 = vector.multi_reduction <add>, %256, %cst_82 [1] : vector<16x128xf32> to vector<16xf32>
    %258 = vector.shape_cast %257 : vector<16xf32> to vector<16x1xf32>
    %cst_83 = arith.constant 1.280000e+02 : f32
    %259 = vector.broadcast %cst_83 : f32 to vector<16x1xf32>
    %260 = arith.divf %258, %259 : vector<16x1xf32>
    %261 = vector.broadcast %260 : vector<16x1xf32> to vector<16x128xf32>
    %262 = arith.subf %256, %261 : vector<16x128xf32>
    %263 = vector.broadcast %260 : vector<16x1xf32> to vector<16x128xf32>
    %264 = arith.subf %256, %263 : vector<16x128xf32>
    %265 = arith.mulf %262, %264 : vector<16x128xf32>
    %cst_84 = arith.constant dense<0.000000e+00> : vector<16xf32>
    %266 = vector.multi_reduction <add>, %265, %cst_84 [1] : vector<16x128xf32> to vector<16xf32>
    %267 = vector.shape_cast %266 : vector<16xf32> to vector<16x1xf32>
    %cst_85 = arith.constant 1.280000e+02 : f32
    %268 = vector.broadcast %cst_85 : f32 to vector<16x1xf32>
    %269 = arith.divf %267, %268 : vector<16x1xf32>
    %270 = vector.broadcast %260 : vector<16x1xf32> to vector<16x128xf32>
    %271 = arith.subf %256, %270 : vector<16x128xf32>
    %cst_86 = arith.constant 9.99999974E-6 : f32
    %272 = vector.broadcast %cst_86 : f32 to vector<16x1xf32>
    %273 = arith.addf %269, %272 : vector<16x1xf32>
    %274 = math.rsqrt %273 : vector<16x1xf32>
    %275 = vector.broadcast %274 : vector<16x1xf32> to vector<16x128xf32>
    %276 = arith.mulf %271, %275 : vector<16x128xf32>
    %c0_87 = arith.constant 0 : index
    %c0_88 = arith.constant 0 : index
    %277 = vector.load %arg11[%c0_87, %c0_88] : memref<1x128xf32, #tpu.memory_space<vmem>>, vector<1x128xf32>
    %278 = vector.broadcast %277 : vector<1x128xf32> to vector<16x128xf32>
    %279 = arith.mulf %276, %278 : vector<16x128xf32>
    %c0_89 = arith.constant 0 : index
    %c0_90 = arith.constant 0 : index
    %280 = vector.load %arg12[%c0_89, %c0_90] : memref<1x128xf32, #tpu.memory_space<vmem>>, vector<1x128xf32>
    %281 = vector.broadcast %280 : vector<1x128xf32> to vector<16x128xf32>
    %282 = arith.addf %279, %281 : vector<16x128xf32>
    %cst_91 = arith.constant 0.000000e+00 : f32
    %283 = vector.broadcast %cst_91 : f32 to vector<16x128xf32>
    %284 = arith.maximumf %282, %283 : vector<16x128xf32>
    %285 = arith.truncf %284 : vector<16x128xf32> to vector<16x128xbf16>
    %c0_92 = arith.constant 0 : index
    %c0_93 = arith.constant 0 : index
    %286 = vector.load %arg13[%c0_92, %c0_93] : memref<128x576xbf16, #tpu.memory_space<vmem>>, vector<128x576xbf16>
    %cst_94 = arith.constant dense<0.000000e+00> : vector<16x576xf32>
    %287 = tpu.matmul %285, %286, %cst_94 {dimension_numbers = #tpu.dot_dimension_numbers<[1], [0], [0], [1], [0, 0, 1, 1], [], []>} : vector<16x128xbf16>, vector<128x576xbf16>, vector<16x576xf32> -> vector<16x576xf32>
    %288 = vector.extract_strided_slice %287 {offsets = [0, 0], sizes = [16, 512], strides = [1, 1]} : vector<16x576xf32> to vector<16x512xf32>
    %289 = arith.truncf %288 : vector<16x512xf32> to vector<16x512xbf16>
    %c0_95 = arith.constant 0 : index
    %c0_96 = arith.constant 0 : index
    %290 = vector.load %arg15[%c0_95, %c0_96] : memref<8x512xbf16, #tpu.memory_space<vmem>>, vector<8x512xbf16>
    %cst_97 = arith.constant dense<0.000000e+00> : vector<16x8xf32>
    %291 = tpu.matmul %289, %290, %cst_97 {dimension_numbers = #tpu.dot_dimension_numbers<[1], [1], [0], [0], [0, 0, 1, 0], [], []>} : vector<16x512xbf16>, vector<8x512xbf16>, vector<16x8xf32> -> vector<16x8xf32>
    %c0_98 = arith.constant 0 : index
    %c0_99 = arith.constant 0 : index
    %292 = vector.load %arg14[%c0_98, %c0_99] : memref<8x512xbf16, #tpu.memory_space<vmem>>, vector<8x512xbf16>
    %cst_100 = arith.constant dense<0.000000e+00> : vector<8x16xf32>
    %293 = tpu.matmul %292, %289, %cst_100 {dimension_numbers = #tpu.dot_dimension_numbers<[1], [1], [0], [0], [0, 0, 1, 0], [], []>} : vector<8x512xbf16>, vector<16x512xbf16>, vector<8x16xf32> -> vector<8x16xf32>
    %294 = vector.extract_strided_slice %291 {offsets = [0, 0], sizes = [16, 1], strides = [1, 1]} : vector<16x8xf32> to vector<16x1xf32>
    %295 = vector.extract_strided_slice %293 {offsets = [0, 0], sizes = [1, 16], strides = [1, 1]} : vector<8x16xf32> to vector<1x16xf32>
    %296 = vector.broadcast %294 : vector<16x1xf32> to vector<16x16xf32>
    %297 = vector.broadcast %295 : vector<1x16xf32> to vector<16x16xf32>
    %298 = arith.addf %296, %297 : vector<16x16xf32>
    %cst_101 = arith.constant 0.000000e+00 : f32
    %299 = vector.broadcast %cst_101 : f32 to vector<16x16xf32>
    %300 = arith.cmpf ogt, %298, %299 : vector<16x16xf32>
    %cst_102 = arith.constant 2.000000e-01 : f32
    %301 = vector.broadcast %cst_102 : f32 to vector<16x16xf32>
    %302 = arith.mulf %301, %298 : vector<16x16xf32>
    %303 = arith.select %300, %298, %302 : vector<16x16xi1>, vector<16x16xf32>
    %304 = arith.addf %303, %1 : vector<16x16xf32>
    %cst_103 = arith.constant dense<0xFF800000> : vector<16xf32>
    %305 = vector.multi_reduction <maximumf>, %304, %cst_103 [1] : vector<16x16xf32> to vector<16xf32>
    %306 = vector.shape_cast %305 : vector<16xf32> to vector<16x1xf32>
    %307 = vector.broadcast %306 : vector<16x1xf32> to vector<16x16xf32>
    %308 = arith.subf %304, %307 : vector<16x16xf32>
    %309 = math.exp %308 : vector<16x16xf32>
    %cst_104 = arith.constant dense<0.000000e+00> : vector<16xf32>
    %310 = vector.multi_reduction <add>, %309, %cst_104 [1] : vector<16x16xf32> to vector<16xf32>
    %311 = vector.shape_cast %310 : vector<16xf32> to vector<16x1xf32>
    %312 = tpu.reciprocal %311 {approx = true} : vector<16x1xf32> -> vector<16x1xf32>
    %313 = vector.broadcast %312 : vector<16x1xf32> to vector<16x16xf32>
    %314 = arith.mulf %309, %313 : vector<16x16xf32>
    %315 = vector.extract_strided_slice %289 {offsets = [0, 0], sizes = [16, 64], strides = [1, 1]} : vector<16x512xbf16> to vector<16x64xbf16>
    %316 = arith.truncf %314 : vector<16x16xf32> to vector<16x16xbf16>
    %cst_105 = arith.constant dense<0.000000e+00> : vector<16x64xf32>
    %317 = tpu.matmul %316, %315, %cst_105 {dimension_numbers = #tpu.dot_dimension_numbers<[1], [0], [0], [1], [0, 0, 1, 1], [], []>} : vector<16x16xbf16>, vector<16x64xbf16>, vector<16x64xf32> -> vector<16x64xf32>
    %318 = vector.extract_strided_slice %291 {offsets = [0, 1], sizes = [16, 1], strides = [1, 1]} : vector<16x8xf32> to vector<16x1xf32>
    %319 = vector.extract_strided_slice %293 {offsets = [1, 0], sizes = [1, 16], strides = [1, 1]} : vector<8x16xf32> to vector<1x16xf32>
    %320 = vector.broadcast %318 : vector<16x1xf32> to vector<16x16xf32>
    %321 = vector.broadcast %319 : vector<1x16xf32> to vector<16x16xf32>
    %322 = arith.addf %320, %321 : vector<16x16xf32>
    %cst_106 = arith.constant 0.000000e+00 : f32
    %323 = vector.broadcast %cst_106 : f32 to vector<16x16xf32>
    %324 = arith.cmpf ogt, %322, %323 : vector<16x16xf32>
    %cst_107 = arith.constant 2.000000e-01 : f32
    %325 = vector.broadcast %cst_107 : f32 to vector<16x16xf32>
    %326 = arith.mulf %325, %322 : vector<16x16xf32>
    %327 = arith.select %324, %322, %326 : vector<16x16xi1>, vector<16x16xf32>
    %328 = arith.addf %327, %1 : vector<16x16xf32>
    %cst_108 = arith.constant dense<0xFF800000> : vector<16xf32>
    %329 = vector.multi_reduction <maximumf>, %328, %cst_108 [1] : vector<16x16xf32> to vector<16xf32>
    %330 = vector.shape_cast %329 : vector<16xf32> to vector<16x1xf32>
    %331 = vector.broadcast %330 : vector<16x1xf32> to vector<16x16xf32>
    %332 = arith.subf %328, %331 : vector<16x16xf32>
    %333 = math.exp %332 : vector<16x16xf32>
    %cst_109 = arith.constant dense<0.000000e+00> : vector<16xf32>
    %334 = vector.multi_reduction <add>, %333, %cst_109 [1] : vector<16x16xf32> to vector<16xf32>
    %335 = vector.shape_cast %334 : vector<16xf32> to vector<16x1xf32>
    %336 = tpu.reciprocal %335 {approx = true} : vector<16x1xf32> -> vector<16x1xf32>
    %337 = vector.broadcast %336 : vector<16x1xf32> to vector<16x16xf32>
    %338 = arith.mulf %333, %337 : vector<16x16xf32>
    %339 = vector.extract_strided_slice %289 {offsets = [0, 64], sizes = [16, 64], strides = [1, 1]} : vector<16x512xbf16> to vector<16x64xbf16>
    %340 = arith.truncf %338 : vector<16x16xf32> to vector<16x16xbf16>
    %cst_110 = arith.constant dense<0.000000e+00> : vector<16x64xf32>
    %341 = tpu.matmul %340, %339, %cst_110 {dimension_numbers = #tpu.dot_dimension_numbers<[1], [0], [0], [1], [0, 0, 1, 1], [], []>} : vector<16x16xbf16>, vector<16x64xbf16>, vector<16x64xf32> -> vector<16x64xf32>
    %342 = arith.addf %317, %341 : vector<16x64xf32>
    %343 = vector.extract_strided_slice %291 {offsets = [0, 2], sizes = [16, 1], strides = [1, 1]} : vector<16x8xf32> to vector<16x1xf32>
    %344 = vector.extract_strided_slice %293 {offsets = [2, 0], sizes = [1, 16], strides = [1, 1]} : vector<8x16xf32> to vector<1x16xf32>
    %345 = vector.broadcast %343 : vector<16x1xf32> to vector<16x16xf32>
    %346 = vector.broadcast %344 : vector<1x16xf32> to vector<16x16xf32>
    %347 = arith.addf %345, %346 : vector<16x16xf32>
    %cst_111 = arith.constant 0.000000e+00 : f32
    %348 = vector.broadcast %cst_111 : f32 to vector<16x16xf32>
    %349 = arith.cmpf ogt, %347, %348 : vector<16x16xf32>
    %cst_112 = arith.constant 2.000000e-01 : f32
    %350 = vector.broadcast %cst_112 : f32 to vector<16x16xf32>
    %351 = arith.mulf %350, %347 : vector<16x16xf32>
    %352 = arith.select %349, %347, %351 : vector<16x16xi1>, vector<16x16xf32>
    %353 = arith.addf %352, %1 : vector<16x16xf32>
    %cst_113 = arith.constant dense<0xFF800000> : vector<16xf32>
    %354 = vector.multi_reduction <maximumf>, %353, %cst_113 [1] : vector<16x16xf32> to vector<16xf32>
    %355 = vector.shape_cast %354 : vector<16xf32> to vector<16x1xf32>
    %356 = vector.broadcast %355 : vector<16x1xf32> to vector<16x16xf32>
    %357 = arith.subf %353, %356 : vector<16x16xf32>
    %358 = math.exp %357 : vector<16x16xf32>
    %cst_114 = arith.constant dense<0.000000e+00> : vector<16xf32>
    %359 = vector.multi_reduction <add>, %358, %cst_114 [1] : vector<16x16xf32> to vector<16xf32>
    %360 = vector.shape_cast %359 : vector<16xf32> to vector<16x1xf32>
    %361 = tpu.reciprocal %360 {approx = true} : vector<16x1xf32> -> vector<16x1xf32>
    %362 = vector.broadcast %361 : vector<16x1xf32> to vector<16x16xf32>
    %363 = arith.mulf %358, %362 : vector<16x16xf32>
    %364 = vector.extract_strided_slice %289 {offsets = [0, 128], sizes = [16, 64], strides = [1, 1]} : vector<16x512xbf16> to vector<16x64xbf16>
    %365 = arith.truncf %363 : vector<16x16xf32> to vector<16x16xbf16>
    %cst_115 = arith.constant dense<0.000000e+00> : vector<16x64xf32>
    %366 = tpu.matmul %365, %364, %cst_115 {dimension_numbers = #tpu.dot_dimension_numbers<[1], [0], [0], [1], [0, 0, 1, 1], [], []>} : vector<16x16xbf16>, vector<16x64xbf16>, vector<16x64xf32> -> vector<16x64xf32>
    %367 = arith.addf %342, %366 : vector<16x64xf32>
    %368 = vector.extract_strided_slice %291 {offsets = [0, 3], sizes = [16, 1], strides = [1, 1]} : vector<16x8xf32> to vector<16x1xf32>
    %369 = vector.extract_strided_slice %293 {offsets = [3, 0], sizes = [1, 16], strides = [1, 1]} : vector<8x16xf32> to vector<1x16xf32>
    %370 = vector.broadcast %368 : vector<16x1xf32> to vector<16x16xf32>
    %371 = vector.broadcast %369 : vector<1x16xf32> to vector<16x16xf32>
    %372 = arith.addf %370, %371 : vector<16x16xf32>
    %cst_116 = arith.constant 0.000000e+00 : f32
    %373 = vector.broadcast %cst_116 : f32 to vector<16x16xf32>
    %374 = arith.cmpf ogt, %372, %373 : vector<16x16xf32>
    %cst_117 = arith.constant 2.000000e-01 : f32
    %375 = vector.broadcast %cst_117 : f32 to vector<16x16xf32>
    %376 = arith.mulf %375, %372 : vector<16x16xf32>
    %377 = arith.select %374, %372, %376 : vector<16x16xi1>, vector<16x16xf32>
    %378 = arith.addf %377, %1 : vector<16x16xf32>
    %cst_118 = arith.constant dense<0xFF800000> : vector<16xf32>
    %379 = vector.multi_reduction <maximumf>, %378, %cst_118 [1] : vector<16x16xf32> to vector<16xf32>
    %380 = vector.shape_cast %379 : vector<16xf32> to vector<16x1xf32>
    %381 = vector.broadcast %380 : vector<16x1xf32> to vector<16x16xf32>
    %382 = arith.subf %378, %381 : vector<16x16xf32>
    %383 = math.exp %382 : vector<16x16xf32>
    %cst_119 = arith.constant dense<0.000000e+00> : vector<16xf32>
    %384 = vector.multi_reduction <add>, %383, %cst_119 [1] : vector<16x16xf32> to vector<16xf32>
    %385 = vector.shape_cast %384 : vector<16xf32> to vector<16x1xf32>
    %386 = tpu.reciprocal %385 {approx = true} : vector<16x1xf32> -> vector<16x1xf32>
    %387 = vector.broadcast %386 : vector<16x1xf32> to vector<16x16xf32>
    %388 = arith.mulf %383, %387 : vector<16x16xf32>
    %389 = vector.extract_strided_slice %289 {offsets = [0, 192], sizes = [16, 64], strides = [1, 1]} : vector<16x512xbf16> to vector<16x64xbf16>
    %390 = arith.truncf %388 : vector<16x16xf32> to vector<16x16xbf16>
    %cst_120 = arith.constant dense<0.000000e+00> : vector<16x64xf32>
    %391 = tpu.matmul %390, %389, %cst_120 {dimension_numbers = #tpu.dot_dimension_numbers<[1], [0], [0], [1], [0, 0, 1, 1], [], []>} : vector<16x16xbf16>, vector<16x64xbf16>, vector<16x64xf32> -> vector<16x64xf32>
    %392 = arith.addf %367, %391 : vector<16x64xf32>
    %393 = vector.extract_strided_slice %291 {offsets = [0, 4], sizes = [16, 1], strides = [1, 1]} : vector<16x8xf32> to vector<16x1xf32>
    %394 = vector.extract_strided_slice %293 {offsets = [4, 0], sizes = [1, 16], strides = [1, 1]} : vector<8x16xf32> to vector<1x16xf32>
    %395 = vector.broadcast %393 : vector<16x1xf32> to vector<16x16xf32>
    %396 = vector.broadcast %394 : vector<1x16xf32> to vector<16x16xf32>
    %397 = arith.addf %395, %396 : vector<16x16xf32>
    %cst_121 = arith.constant 0.000000e+00 : f32
    %398 = vector.broadcast %cst_121 : f32 to vector<16x16xf32>
    %399 = arith.cmpf ogt, %397, %398 : vector<16x16xf32>
    %cst_122 = arith.constant 2.000000e-01 : f32
    %400 = vector.broadcast %cst_122 : f32 to vector<16x16xf32>
    %401 = arith.mulf %400, %397 : vector<16x16xf32>
    %402 = arith.select %399, %397, %401 : vector<16x16xi1>, vector<16x16xf32>
    %403 = arith.addf %402, %1 : vector<16x16xf32>
    %cst_123 = arith.constant dense<0xFF800000> : vector<16xf32>
    %404 = vector.multi_reduction <maximumf>, %403, %cst_123 [1] : vector<16x16xf32> to vector<16xf32>
    %405 = vector.shape_cast %404 : vector<16xf32> to vector<16x1xf32>
    %406 = vector.broadcast %405 : vector<16x1xf32> to vector<16x16xf32>
    %407 = arith.subf %403, %406 : vector<16x16xf32>
    %408 = math.exp %407 : vector<16x16xf32>
    %cst_124 = arith.constant dense<0.000000e+00> : vector<16xf32>
    %409 = vector.multi_reduction <add>, %408, %cst_124 [1] : vector<16x16xf32> to vector<16xf32>
    %410 = vector.shape_cast %409 : vector<16xf32> to vector<16x1xf32>
    %411 = tpu.reciprocal %410 {approx = true} : vector<16x1xf32> -> vector<16x1xf32>
    %412 = vector.broadcast %411 : vector<16x1xf32> to vector<16x16xf32>
    %413 = arith.mulf %408, %412 : vector<16x16xf32>
    %414 = vector.extract_strided_slice %289 {offsets = [0, 256], sizes = [16, 64], strides = [1, 1]} : vector<16x512xbf16> to vector<16x64xbf16>
    %415 = arith.truncf %413 : vector<16x16xf32> to vector<16x16xbf16>
    %cst_125 = arith.constant dense<0.000000e+00> : vector<16x64xf32>
    %416 = tpu.matmul %415, %414, %cst_125 {dimension_numbers = #tpu.dot_dimension_numbers<[1], [0], [0], [1], [0, 0, 1, 1], [], []>} : vector<16x16xbf16>, vector<16x64xbf16>, vector<16x64xf32> -> vector<16x64xf32>
    %417 = arith.addf %392, %416 : vector<16x64xf32>
    %418 = vector.extract_strided_slice %291 {offsets = [0, 5], sizes = [16, 1], strides = [1, 1]} : vector<16x8xf32> to vector<16x1xf32>
    %419 = vector.extract_strided_slice %293 {offsets = [5, 0], sizes = [1, 16], strides = [1, 1]} : vector<8x16xf32> to vector<1x16xf32>
    %420 = vector.broadcast %418 : vector<16x1xf32> to vector<16x16xf32>
    %421 = vector.broadcast %419 : vector<1x16xf32> to vector<16x16xf32>
    %422 = arith.addf %420, %421 : vector<16x16xf32>
    %cst_126 = arith.constant 0.000000e+00 : f32
    %423 = vector.broadcast %cst_126 : f32 to vector<16x16xf32>
    %424 = arith.cmpf ogt, %422, %423 : vector<16x16xf32>
    %cst_127 = arith.constant 2.000000e-01 : f32
    %425 = vector.broadcast %cst_127 : f32 to vector<16x16xf32>
    %426 = arith.mulf %425, %422 : vector<16x16xf32>
    %427 = arith.select %424, %422, %426 : vector<16x16xi1>, vector<16x16xf32>
    %428 = arith.addf %427, %1 : vector<16x16xf32>
    %cst_128 = arith.constant dense<0xFF800000> : vector<16xf32>
    %429 = vector.multi_reduction <maximumf>, %428, %cst_128 [1] : vector<16x16xf32> to vector<16xf32>
    %430 = vector.shape_cast %429 : vector<16xf32> to vector<16x1xf32>
    %431 = vector.broadcast %430 : vector<16x1xf32> to vector<16x16xf32>
    %432 = arith.subf %428, %431 : vector<16x16xf32>
    %433 = math.exp %432 : vector<16x16xf32>
    %cst_129 = arith.constant dense<0.000000e+00> : vector<16xf32>
    %434 = vector.multi_reduction <add>, %433, %cst_129 [1] : vector<16x16xf32> to vector<16xf32>
    %435 = vector.shape_cast %434 : vector<16xf32> to vector<16x1xf32>
    %436 = tpu.reciprocal %435 {approx = true} : vector<16x1xf32> -> vector<16x1xf32>
    %437 = vector.broadcast %436 : vector<16x1xf32> to vector<16x16xf32>
    %438 = arith.mulf %433, %437 : vector<16x16xf32>
    %439 = vector.extract_strided_slice %289 {offsets = [0, 320], sizes = [16, 64], strides = [1, 1]} : vector<16x512xbf16> to vector<16x64xbf16>
    %440 = arith.truncf %438 : vector<16x16xf32> to vector<16x16xbf16>
    %cst_130 = arith.constant dense<0.000000e+00> : vector<16x64xf32>
    %441 = tpu.matmul %440, %439, %cst_130 {dimension_numbers = #tpu.dot_dimension_numbers<[1], [0], [0], [1], [0, 0, 1, 1], [], []>} : vector<16x16xbf16>, vector<16x64xbf16>, vector<16x64xf32> -> vector<16x64xf32>
    %442 = arith.addf %417, %441 : vector<16x64xf32>
    %443 = vector.extract_strided_slice %291 {offsets = [0, 6], sizes = [16, 1], strides = [1, 1]} : vector<16x8xf32> to vector<16x1xf32>
    %444 = vector.extract_strided_slice %293 {offsets = [6, 0], sizes = [1, 16], strides = [1, 1]} : vector<8x16xf32> to vector<1x16xf32>
    %445 = vector.broadcast %443 : vector<16x1xf32> to vector<16x16xf32>
    %446 = vector.broadcast %444 : vector<1x16xf32> to vector<16x16xf32>
    %447 = arith.addf %445, %446 : vector<16x16xf32>
    %cst_131 = arith.constant 0.000000e+00 : f32
    %448 = vector.broadcast %cst_131 : f32 to vector<16x16xf32>
    %449 = arith.cmpf ogt, %447, %448 : vector<16x16xf32>
    %cst_132 = arith.constant 2.000000e-01 : f32
    %450 = vector.broadcast %cst_132 : f32 to vector<16x16xf32>
    %451 = arith.mulf %450, %447 : vector<16x16xf32>
    %452 = arith.select %449, %447, %451 : vector<16x16xi1>, vector<16x16xf32>
    %453 = arith.addf %452, %1 : vector<16x16xf32>
    %cst_133 = arith.constant dense<0xFF800000> : vector<16xf32>
    %454 = vector.multi_reduction <maximumf>, %453, %cst_133 [1] : vector<16x16xf32> to vector<16xf32>
    %455 = vector.shape_cast %454 : vector<16xf32> to vector<16x1xf32>
    %456 = vector.broadcast %455 : vector<16x1xf32> to vector<16x16xf32>
    %457 = arith.subf %453, %456 : vector<16x16xf32>
    %458 = math.exp %457 : vector<16x16xf32>
    %cst_134 = arith.constant dense<0.000000e+00> : vector<16xf32>
    %459 = vector.multi_reduction <add>, %458, %cst_134 [1] : vector<16x16xf32> to vector<16xf32>
    %460 = vector.shape_cast %459 : vector<16xf32> to vector<16x1xf32>
    %461 = tpu.reciprocal %460 {approx = true} : vector<16x1xf32> -> vector<16x1xf32>
    %462 = vector.broadcast %461 : vector<16x1xf32> to vector<16x16xf32>
    %463 = arith.mulf %458, %462 : vector<16x16xf32>
    %464 = vector.extract_strided_slice %289 {offsets = [0, 384], sizes = [16, 64], strides = [1, 1]} : vector<16x512xbf16> to vector<16x64xbf16>
    %465 = arith.truncf %463 : vector<16x16xf32> to vector<16x16xbf16>
    %cst_135 = arith.constant dense<0.000000e+00> : vector<16x64xf32>
    %466 = tpu.matmul %465, %464, %cst_135 {dimension_numbers = #tpu.dot_dimension_numbers<[1], [0], [0], [1], [0, 0, 1, 1], [], []>} : vector<16x16xbf16>, vector<16x64xbf16>, vector<16x64xf32> -> vector<16x64xf32>
    %467 = arith.addf %442, %466 : vector<16x64xf32>
    %468 = vector.extract_strided_slice %291 {offsets = [0, 7], sizes = [16, 1], strides = [1, 1]} : vector<16x8xf32> to vector<16x1xf32>
    %469 = vector.extract_strided_slice %293 {offsets = [7, 0], sizes = [1, 16], strides = [1, 1]} : vector<8x16xf32> to vector<1x16xf32>
    %470 = vector.broadcast %468 : vector<16x1xf32> to vector<16x16xf32>
    %471 = vector.broadcast %469 : vector<1x16xf32> to vector<16x16xf32>
    %472 = arith.addf %470, %471 : vector<16x16xf32>
    %cst_136 = arith.constant 0.000000e+00 : f32
    %473 = vector.broadcast %cst_136 : f32 to vector<16x16xf32>
    %474 = arith.cmpf ogt, %472, %473 : vector<16x16xf32>
    %cst_137 = arith.constant 2.000000e-01 : f32
    %475 = vector.broadcast %cst_137 : f32 to vector<16x16xf32>
    %476 = arith.mulf %475, %472 : vector<16x16xf32>
    %477 = arith.select %474, %472, %476 : vector<16x16xi1>, vector<16x16xf32>
    %478 = arith.addf %477, %1 : vector<16x16xf32>
    %cst_138 = arith.constant dense<0xFF800000> : vector<16xf32>
    %479 = vector.multi_reduction <maximumf>, %478, %cst_138 [1] : vector<16x16xf32> to vector<16xf32>
    %480 = vector.shape_cast %479 : vector<16xf32> to vector<16x1xf32>
    %481 = vector.broadcast %480 : vector<16x1xf32> to vector<16x16xf32>
    %482 = arith.subf %478, %481 : vector<16x16xf32>
    %483 = math.exp %482 : vector<16x16xf32>
    %cst_139 = arith.constant dense<0.000000e+00> : vector<16xf32>
    %484 = vector.multi_reduction <add>, %483, %cst_139 [1] : vector<16x16xf32> to vector<16xf32>
    %485 = vector.shape_cast %484 : vector<16xf32> to vector<16x1xf32>
    %486 = tpu.reciprocal %485 {approx = true} : vector<16x1xf32> -> vector<16x1xf32>
    %487 = vector.broadcast %486 : vector<16x1xf32> to vector<16x16xf32>
    %488 = arith.mulf %483, %487 : vector<16x16xf32>
    %489 = vector.extract_strided_slice %289 {offsets = [0, 448], sizes = [16, 64], strides = [1, 1]} : vector<16x512xbf16> to vector<16x64xbf16>
    %490 = arith.truncf %488 : vector<16x16xf32> to vector<16x16xbf16>
    %cst_140 = arith.constant dense<0.000000e+00> : vector<16x64xf32>
    %491 = tpu.matmul %490, %489, %cst_140 {dimension_numbers = #tpu.dot_dimension_numbers<[1], [0], [0], [1], [0, 0, 1, 1], [], []>} : vector<16x16xbf16>, vector<16x64xbf16>, vector<16x64xf32> -> vector<16x64xf32>
    %492 = arith.addf %467, %491 : vector<16x64xf32>
    %cst_141 = arith.constant 1.250000e-01 : f32
    %493 = vector.broadcast %cst_141 : f32 to vector<16x64xf32>
    %494 = arith.mulf %492, %493 : vector<16x64xf32>
    %495 = vector.extract_strided_slice %287 {offsets = [0, 512], sizes = [16, 64], strides = [1, 1]} : vector<16x576xf32> to vector<16x64xf32>
    %496 = arith.addf %494, %495 : vector<16x64xf32>
    %c0_142 = arith.constant 0 : index
    %c0_143 = arith.constant 0 : index
    %497 = vector.load %arg16[%c0_142, %c0_143] : memref<1x64xf32, #tpu.memory_space<vmem>>, vector<1x64xf32>
    %498 = vector.broadcast %497 : vector<1x64xf32> to vector<16x64xf32>
    %499 = arith.addf %496, %498 : vector<16x64xf32>
    %cst_144 = arith.constant dense<0.000000e+00> : vector<16xf32>
    %500 = vector.multi_reduction <add>, %499, %cst_144 [1] : vector<16x64xf32> to vector<16xf32>
    %501 = vector.shape_cast %500 : vector<16xf32> to vector<16x1xf32>
    %cst_145 = arith.constant 6.400000e+01 : f32
    %502 = vector.broadcast %cst_145 : f32 to vector<16x1xf32>
    %503 = arith.divf %501, %502 : vector<16x1xf32>
    %504 = vector.broadcast %503 : vector<16x1xf32> to vector<16x64xf32>
    %505 = arith.subf %499, %504 : vector<16x64xf32>
    %506 = vector.broadcast %503 : vector<16x1xf32> to vector<16x64xf32>
    %507 = arith.subf %499, %506 : vector<16x64xf32>
    %508 = arith.mulf %505, %507 : vector<16x64xf32>
    %cst_146 = arith.constant dense<0.000000e+00> : vector<16xf32>
    %509 = vector.multi_reduction <add>, %508, %cst_146 [1] : vector<16x64xf32> to vector<16xf32>
    %510 = vector.shape_cast %509 : vector<16xf32> to vector<16x1xf32>
    %cst_147 = arith.constant 6.400000e+01 : f32
    %511 = vector.broadcast %cst_147 : f32 to vector<16x1xf32>
    %512 = arith.divf %510, %511 : vector<16x1xf32>
    %513 = vector.broadcast %503 : vector<16x1xf32> to vector<16x64xf32>
    %514 = arith.subf %499, %513 : vector<16x64xf32>
    %cst_148 = arith.constant 9.99999974E-6 : f32
    %515 = vector.broadcast %cst_148 : f32 to vector<16x1xf32>
    %516 = arith.addf %512, %515 : vector<16x1xf32>
    %517 = math.rsqrt %516 : vector<16x1xf32>
    %518 = vector.broadcast %517 : vector<16x1xf32> to vector<16x64xf32>
    %519 = arith.mulf %514, %518 : vector<16x64xf32>
    %c0_149 = arith.constant 0 : index
    %c0_150 = arith.constant 0 : index
    %520 = vector.load %arg17[%c0_149, %c0_150] : memref<1x64xf32, #tpu.memory_space<vmem>>, vector<1x64xf32>
    %521 = vector.broadcast %520 : vector<1x64xf32> to vector<16x64xf32>
    %522 = arith.mulf %519, %521 : vector<16x64xf32>
    %c0_151 = arith.constant 0 : index
    %c0_152 = arith.constant 0 : index
    %523 = vector.load %arg18[%c0_151, %c0_152] : memref<1x64xf32, #tpu.memory_space<vmem>>, vector<1x64xf32>
    %524 = vector.broadcast %523 : vector<1x64xf32> to vector<16x64xf32>
    %525 = arith.addf %522, %524 : vector<16x64xf32>
    %cst_153 = arith.constant 0.000000e+00 : f32
    %526 = vector.broadcast %cst_153 : f32 to vector<16x64xf32>
    %527 = arith.maximumf %525, %526 : vector<16x64xf32>
    %528 = arith.truncf %527 : vector<16x64xf32> to vector<16x64xbf16>
    %c0_154 = arith.constant 0 : index
    %c0_155 = arith.constant 0 : index
    %529 = vector.load %arg19[%c0_154, %c0_155] : memref<64x256xbf16, #tpu.memory_space<vmem>>, vector<64x256xbf16>
    %cst_156 = arith.constant dense<0.000000e+00> : vector<16x256xf32>
    %530 = tpu.matmul %528, %529, %cst_156 {dimension_numbers = #tpu.dot_dimension_numbers<[1], [0], [0], [1], [0, 0, 1, 1], [], []>} : vector<16x64xbf16>, vector<64x256xbf16>, vector<16x256xf32> -> vector<16x256xf32>
    %531 = vector.extract_strided_slice %530 {offsets = [0, 0], sizes = [16, 128], strides = [1, 1]} : vector<16x256xf32> to vector<16x128xf32>
    %532 = arith.truncf %531 : vector<16x128xf32> to vector<16x128xbf16>
    %cst_157 = arith.constant dense<0.000000e+00> : vector<16x128xf32>
    %533 = tpu.matmul %0, %532, %cst_157 {dimension_numbers = #tpu.dot_dimension_numbers<[1], [0], [0], [1], [0, 0, 1, 1], [], []>} : vector<16x16xbf16>, vector<16x128xbf16>, vector<16x128xf32> -> vector<16x128xf32>
    %534 = vector.extract_strided_slice %530 {offsets = [0, 128], sizes = [16, 128], strides = [1, 1]} : vector<16x256xf32> to vector<16x128xf32>
    %535 = arith.addf %533, %534 : vector<16x128xf32>
    %c0_158 = arith.constant 0 : index
    %c0_159 = arith.constant 0 : index
    %536 = vector.load %arg20[%c0_158, %c0_159] : memref<1x128xf32, #tpu.memory_space<vmem>>, vector<1x128xf32>
    %537 = vector.broadcast %536 : vector<1x128xf32> to vector<16x128xf32>
    %538 = arith.addf %535, %537 : vector<16x128xf32>
    %c0_160 = arith.constant 0 : index
    %c0_161 = arith.constant 0 : index
    %539 = vector.load %arg21[%c0_160, %c0_161] : memref<16x128xf32, #tpu.memory_space<vmem>>, vector<16x128xf32>
    tpu.vector_store %arg21[%c0_160, %c0_161], %538 {strides = array<i32>} : memref<16x128xf32, #tpu.memory_space<vmem>>, vector<16x128xf32>,
    return
  }
}

</mosaic_0001>

<bundles_post_ra>
// kernel: tpu_custom_call.1
= control target key start
LH: loop header
LB: loop body
LE: loop exit
PB: predicated region body
PF: predicated region fallthrough
CT: control target
= control target key end

     0   :  { %s7404_s0 = inlined_call_operand.vmem [shape: f32[16,1024], index: 0, kind: input, shape index: {}]   ;;  %s7405_s1 = inlined_call_operand.vmem [shape: bf16[16,16], index: 1, kind: input, shape index: {}]   ;;  %s7406_s2 = inlined_call_operand.vmem [shape: f32[16,16], index: 2, kind: input, shape index: {}]   ;;  %s7407_s3 = inlined_call_operand.hbm [shape: bf16[1024,512], index: 3, kind: input, shape index: {}]   ;;  %s7408_s4 = inlined_call_operand.vmem [shape: bf16[8,256], index: 4, kind: input, shape index: {}]   ;;  %s7409_s5 = inlined_call_operand.vmem [shape: bf16[8,256], index: 5, kind: input, shape index: {}]   ;;  %s7410_s6 = inlined_call_operand.vmem [shape: f32[1,256], index: 6, kind: input, shape index: {}]   ;;  %s7411_s7 = inlined_call_operand.vmem [shape: f32[1,256], index: 7, kind: input, shape index: {}]   ;;  %s7412_s8 = inlined_call_operand.vmem [shape: f32[1,256], index: 8, kind: input, shape index: {}]   ;;  %s7413_s9 = inlined_call_operand.vmem [shape: bf16[256,256], index: 9, kind: input, shape index: {}]   ;;  %s7414_s10 = inlined_call_operand.vmem [shape: f32[1,128], index: 10, kind: input, shape index: {}]   ;;  %s7415_s11 = inlined_call_operand.vmem [shape: f32[1,128], index: 11, kind: input, shape index: {}]   ;;  %s7416_s12 = inlined_call_operand.vmem [shape: f32[1,128], index: 12, kind: input, shape index: {}]   ;;  %s7417_s13 = inlined_call_operand.vmem [shape: bf16[128,576], index: 13, kind: input, shape index: {}]   ;;  %s7418_s14 = inlined_call_operand.vmem [shape: bf16[8,512], index: 14, kind: input, shape index: {}]   ;;  %s7419_s15 = inlined_call_operand.vmem [shape: bf16[8,512], index: 15, kind: input, shape index: {}]   ;;  %s7420_s16 = inlined_call_operand.vmem [shape: f32[1,64], index: 16, kind: input, shape index: {}]   ;;  %s7421_s17 = inlined_call_operand.vmem [shape: f32[1,64], index: 17, kind: input, shape index: {}]   ;;  %s7422_s18 = inlined_call_operand.vmem [shape: f32[1,64], index: 18, kind: input, shape index: {}]   ;;  %s7423_s19 = inlined_call_operand.vmem [shape: bf16[64,256], index: 19, kind: input, shape index: {}]   ;;  %s7424_s20 = inlined_call_operand.vmem [shape: f32[1,128], index: 20, kind: input, shape index: {}]   ;;  %s7425_s21 = inlined_call_operand.hbm [shape: f32[16,128], index: 21, kind: output, shape index: {}]  }
   0x1   :  { %7430 = sst [smem:[#allocation9_spill]] %s7404_s0 }
   0x2   :  { %7431 = sst [smem:[#allocation10_spill]] %s7405_s1 }
   0x3   :  { %7432 = sst [smem:[#allocation11_spill]] %s7406_s2 }
   0x4   :  { %7433 = sst [smem:[#allocation12_spill]] %s7407_s3 }
   0x5   :  { %7434 = sst [smem:[#allocation13_spill]] %s7408_s4 }
   0x6   :  { %7435 = sst [smem:[#allocation14_spill]] %s7409_s5 }
   0x7   :  { %26 = vsyncpa [#allocation4], 0 }
   0x8   :  { %27 = vsyncpa [#allocation5], 0  ;;  %s6237_s2 = smov [#allocation3]   ;;  %s7436_s3 = sld [smem:[#allocation12_spill]] }
   0x9   :  { %s39_s25 = sshll.u32 %s6237_s2, 4  ;;  %s40_s25 = int_to_ptr.vmem [resolvable:$true] %s39_s25 }
   0xe   :  { %s6189_s28 = scalar_lea.hbm %s7436_s3, 32768 }
   0xf   :  { %p6190_p0 = scmp.ne.s32.totalorder %s7436_s3, %s6189_s28  ;;  %p6193_p1 = scmp.lt.u32.totalorder %s6189_s28, %s7436_s3 }
  0x11   :  { %p6195_p2 = pnand %p6193_p1, %p6190_p0 }
  0x13   :  { %6198 = shalt.err (!%p6195_p2)
}
  0x14   :  { %s6199_s5 = scalar_lea.vmem %s40_s25, 32768  ;;  %p6204_p4 = scmp.lt.s32.totalorder %s40_s25, %s40_s25 }
  0x15   :  { %p6200_p3 = scmp.ne.s32.totalorder %s40_s25, %s6199_s5  ;;  %p6205_p5 = scmp.lt.s32.totalorder %s6199_s5, %s6199_s5 }
  0x17   :  { %p6206_p6 = por %p6205_p5, %p6204_p4 }
  0x19   :  { %p6207_p7 = pnand %p6206_p6, %p6200_p3 }
  0x1b   :  { %6210 = shalt.err (!%p6207_p7)
}
  0x1c   :  { %s6238_s22 = smov 256   ;;  %s6239_s23 = smov 16  }
  0x1d   :  { %45 = dma.hbm_to_vmem [thread:$0]  %s7436_s3, 32768, %s40_s25, [#allocation4], %s6238_s22, %s6238_s22, %s6239_s23  }
  0x1e   :  { %6233 = dma.done.wait [#allocation4], 32768  }
  0x1f   :  { %6234 = vsyncadd [#allocation4], 4294934528  ;;  %v5533_v0 = vld [vmem:[#allocation3 + $0x4] ss:$16 sps:$4 sm:$0xff]   ;;  %v5535_v1 = vld [vmem:[#allocation3] ss:$16 sps:$4 sm:$0xff]  }
  0x20   :  { %1648 = vmatprep.subr.bf16.mxu0 %v5533_v0  ;;  %v5536_v2 = vld [vmem:[#allocation3 + $0x24] ss:$16 sps:$4 sm:$0xff]   ;;  %v5538_v3 = vld [vmem:[#allocation3 + $0x20] ss:$16 sps:$4 sm:$0xff]   ;;  %v5542_v5 = vld [vmem:[#allocation3 + $0xc] ss:$16 sps:$4 sm:$0xff]  }
  0x21   :  { %1649 = vmatpush1.bf16.msra.mxu0 %v5535_v1  ;;  %v5539_v4 = vld [vmem:[#allocation3 + $0x44] ss:$16 sps:$4 sm:$0xff]   ;;  %v5541_v6 = vld [vmem:[#allocation3 + $0x40] ss:$16 sps:$4 sm:$0xff]   ;;  %1820 = vmatprep.subr.bf16.mxu1 %v5542_v5  ;;  %v5546_v7 = vld [vmem:[#allocation3 + $0x8] ss:$16 sps:$4 sm:$0xff]  }
  0x22   :  { %1650 = vmatprep.subr.bf16.mxu0 %v5536_v2  ;;  %v5548_v8 = vld [vmem:[#allocation3 + $0x2c] ss:$16 sps:$4 sm:$0xff]   ;;  %v5544_v9 = vld [vmem:[#allocation3 + $0x64] ss:$16 sps:$4 sm:$0xff]   ;;  %1821 = vmatpush1.bf16.msra.mxu1 %v5546_v7  ;;  %v5552_v10 = vld [vmem:[#allocation3 + $0x28] ss:$16 sps:$4 sm:$0xff]  }
  0x23   :  { %1822 = vmatprep.subr.bf16.mxu1 %v5548_v8  ;;  %v5554_v11 = vld [vmem:[#allocation3 + $0x4c] ss:$16 sps:$4 sm:$0xff]   ;;  %v5547_v12 = vld [vmem:[#allocation3 + $0x60] ss:$16 sps:$4 sm:$0xff]   ;;  %v5550_v13 = vld [vmem:[#allocation3 + $0x84] ss:$16 sps:$4 sm:$0xff]  }
  0x24   :  { %v5558_v14 = vld [vmem:[#allocation3 + $0x48] ss:$16 sps:$4 sm:$0xff]   ;;  %v5560_v15 = vld [vmem:[#allocation3 + $0x6c] ss:$16 sps:$4 sm:$0xff]   ;;  %v5553_v16 = vld [vmem:[#allocation3 + $0x80] ss:$16 sps:$4 sm:$0xff]  }
  0x25   :  { %1651 = vmatpush1.bf16.msra.mxu0 %v5538_v3  ;;  %v5556_v17 = vld [vmem:[#allocation3 + $0xa4] ss:$16 sps:$4 sm:$0xff]   ;;  %v5564_v18 = vld [vmem:[#allocation3 + $0x68] ss:$16 sps:$4 sm:$0xff]   ;;  %v5566_v19 = vld [vmem:[#allocation3 + $0x8c] ss:$16 sps:$4 sm:$0xff]  }
  0x26   :  { %1652 = vmatprep.subr.bf16.mxu0 %v5539_v4  ;;  %1823 = vmatpush1.bf16.msra.mxu1 %v5552_v10  ;;  %v5559_v20 = vld [vmem:[#allocation3 + $0xa0] ss:$16 sps:$4 sm:$0xff]   ;;  %v5562_v21 = vld [vmem:[#allocation3 + $0xc4] ss:$16 sps:$4 sm:$0xff]   ;;  %v5570_v22 = vld [vmem:[#allocation3 + $0x88] ss:$16 sps:$4 sm:$0xff]  }
  0x27   :  { %1824 = vmatprep.subr.bf16.mxu1 %v5554_v11  ;;  %v5572_v23 = vld [vmem:[#allocation3 + $0xac] ss:$16 sps:$4 sm:$0xff]   ;;  %v5565_v24 = vld [vmem:[#allocation3 + $0xc0] ss:$16 sps:$4 sm:$0xff]   ;;  %v5568_v25 = vld [vmem:[#allocation3 + $0xe4] ss:$16 sps:$4 sm:$0xff]  }
  0x28   :  { %v5576_v26 = vld [vmem:[#allocation3 + $0xa8] ss:$16 sps:$4 sm:$0xff]   ;;  %v5578_v27 = vld [vmem:[#allocation3 + $0xcc] ss:$16 sps:$4 sm:$0xff]   ;;  %v5571_v28 = vld [vmem:[#allocation3 + $0xe0] ss:$16 sps:$4 sm:$0xff]  }
  0x29   :  { %1653 = vmatpush1.bf16.msra.mxu0 %v5541_v6  ;;  %v5574_v29 = vld [vmem:[#allocation3 + $0x104] ss:$16 sps:$4 sm:$0xff]   ;;  %v5582_v30 = vld [vmem:[#allocation3 + $0xc8] ss:$16 sps:$4 sm:$0xff]   ;;  %v5584_v31 = vld [vmem:[#allocation3 + $0xec] ss:$16 sps:$4 sm:$0xff]  }
  0x2a   :  { %1654 = vmatprep.subr.bf16.mxu0 %v5544_v9  ;;  %1825 = vmatpush1.bf16.msra.mxu1 %v5558_v14  ;;  %v5577_v32 = vld [vmem:[#allocation3 + $0x100] ss:$16 sps:$4 sm:$0xff]   ;;  %v5580_v33 = vld [vmem:[#allocation3 + $0x124] ss:$16 sps:$4 sm:$0xff]   ;;  %v5588_v34 = vld [vmem:[#allocation3 + $0xe8] ss:$16 sps:$4 sm:$0xff]  }
  0x2b   :  { %1826 = vmatprep.subr.bf16.mxu1 %v5560_v15  ;;  %v5590_v35 = vld [vmem:[#allocation3 + $0x10c] ss:$16 sps:$4 sm:$0xff]   ;;  %v5583_v36 = vld [vmem:[#allocation3 + $0x120] ss:$16 sps:$4 sm:$0xff]   ;;  %v5586_v37 = vld [vmem:[#allocation3 + $0x144] ss:$16 sps:$4 sm:$0xff]  }
  0x2c   :  { %v5594_v38 = vld [vmem:[#allocation3 + $0x108] ss:$16 sps:$4 sm:$0xff]   ;;  %v5596_v39 = vld [vmem:[#allocation3 + $0x12c] ss:$16 sps:$4 sm:$0xff]   ;;  %v5589_v40 = vld [vmem:[#allocation3 + $0x140] ss:$16 sps:$4 sm:$0xff]  }
  0x2d   :  { %1655 = vmatpush1.bf16.msra.mxu0 %v5547_v12  ;;  %v5592_v41 = vld [vmem:[#allocation3 + $0x164] ss:$16 sps:$4 sm:$0xff]   ;;  %v5600_v42 = vld [vmem:[#allocation3 + $0x128] ss:$16 sps:$4 sm:$0xff]   ;;  %s7437_s26 = sld [smem:[#allocation9_spill]]  ;;  %s7438_s0 = sld [smem:[#allocation14_spill]] }
  0x2e   :  { %1656 = vmatprep.subr.bf16.mxu0 %v5550_v13  ;;  %1827 = vmatpush1.bf16.msra.mxu1 %v5564_v18  ;;  %v5602_v45 = vld [vmem:[#allocation3 + $0x14c] ss:$16 sps:$4 sm:$0xff]   ;;  %v5595_v47 = vld [vmem:[#allocation3 + $0x160] ss:$16 sps:$4 sm:$0xff]   ;;  %v5598_v48 = vld [vmem:[#allocation3 + $0x184] ss:$16 sps:$4 sm:$0xff]  }
  0x2f   :  { %1828 = vmatprep.subr.bf16.mxu1 %v5566_v19  ;;  %v5606_v49 = vld [vmem:[#allocation3 + $0x148] ss:$16 sps:$4 sm:$0xff]   ;;  %v5608_v50 = vld [vmem:[#allocation3 + $0x16c] ss:$16 sps:$4 sm:$0xff]   ;;  %v5601_v51 = vld [vmem:[#allocation3 + $0x180] ss:$16 sps:$4 sm:$0xff]  }
  0x30   :  { %v5604_v52 = vld [vmem:[#allocation3 + $0x1a4] ss:$16 sps:$4 sm:$0xff]   ;;  %v5612_v53 = vld [vmem:[#allocation3 + $0x168] ss:$16 sps:$4 sm:$0xff]   ;;  %v5614_v54 = vld [vmem:[#allocation3 + $0x18c] ss:$16 sps:$4 sm:$0xff]  }
  0x31   :  { %1657 = vmatpush1.bf16.msra.mxu0 %v5553_v16  ;;  %v5607_v55 = vld [vmem:[#allocation3 + $0x1a0] ss:$16 sps:$4 sm:$0xff]   ;;  %v5610_v56 = vld [vmem:[#allocation3 + $0x1c4] ss:$16 sps:$4 sm:$0xff]   ;;  %v5618_v57 = vld [vmem:[#allocation3 + $0x188] ss:$16 sps:$4 sm:$0xff]  }
  0x32   :  { %1658 = vmatprep.subr.bf16.mxu0 %v5556_v17  ;;  %1829 = vmatpush1.bf16.msra.mxu1 %v5570_v22  ;;  %v5620_v58 = vld [vmem:[#allocation3 + $0x1ac] ss:$16 sps:$4 sm:$0xff]   ;;  %v5613_v59 = vld [vmem:[#allocation3 + $0x1c0] ss:$16 sps:$4 sm:$0xff]   ;;  %v5616_v60 = vld [vmem:[#allocation3 + $0x1e4] ss:$16 sps:$4 sm:$0xff]  }
  0x33   :  { %1830 = vmatprep.subr.bf16.mxu1 %v5572_v23  ;;  %v89_v43 = vld [vmem:[%s7437_s26 + $0x8] sm:$0xff]  ;;  %v5619_v63 = vld [vmem:[#allocation3 + $0x1e0] ss:$16 sps:$4 sm:$0xff]   ;;  %v5624_v0 = vld [vmem:[#allocation3 + $0x204] ss:$16 sps:$4 sm:$0xff]   ;;  %s7439_s30 = sld [smem:[#allocation13_spill]] }
  0x34   :  { %v97_v44 = vld [vmem:[%s7437_s26 + $0x48] sm:$0xff]  ;;  %v88_v1 = vld [vmem:[%s7437_s26] sm:$0xff]  ;;  %s7440_s23 = sld [smem:[#allocation11_spill]]  ;;  %vm2115_vm2 = vcmask 130048   ;;  %s6249_s2 = smov 96  }
  0x35   :  { %1659 = vmatpush1.bf16.msra.mxu0 %v5559_v20  ;;  %v105_v46 = vpack.c.bf16 %v97_v44, %v89_v43  ;;  %v5625_v61 = vld [vmem:[#allocation3 + $0x1a8] ss:$16 sps:$4 sm:$0xff]   ;;  %v5626_v62 = vld [vmem:[#allocation3 + $0x1cc] ss:$16 sps:$4 sm:$0xff]   ;;  %v96_v2 = vld [vmem:[%s7437_s26 + $0x40] sm:$0xff]  ;;  %s6250_s25 = smov 32  }
  0x36   :  { %1660 = vmatprep.subr.bf16.mxu0 %v5562_v21  ;;  %1831 = vmatpush1.bf16.msra.mxu1 %v5576_v26  ;;  %v5631_v3 = vld [vmem:[#allocation3 + $0x1c8] ss:$16 sps:$4 sm:$0xff]   ;;  %v5632_v4 = vld [vmem:[#allocation3 + $0x1ec] ss:$16 sps:$4 sm:$0xff]   ;;  %v104_v5 = vpack.c.bf16 %v96_v2, %v88_v1  ;;  %v5622_v6 = vld [vmem:[#allocation3 + $0x200] ss:$16 sps:$4 sm:$0xff]  }
  0x37   :  { %1832 = vmatprep.subr.bf16.mxu1 %v5578_v27  ;;  %1680 = vmatprep.mubr.bf16.mxu0 %v105_v46  ;;  %v5630_v7 = vld [vmem:[#allocation3 + $0x224] ss:$16 sps:$4 sm:$0xff]   ;;  %v5637_v8 = vld [vmem:[#allocation3 + $0x1e8] ss:$16 sps:$4 sm:$0xff]   ;;  %v5640_v9 = vld [vmem:[#allocation3 + $0x20c] ss:$16 sps:$4 sm:$0xff]  }
  0x38   :  { %1852 = vmatprep.mubr.bf16.mxu1 %v105_v46  ;;  %v5628_v10 = vld [vmem:[#allocation3 + $0x220] ss:$16 sps:$4 sm:$0xff]   ;;  %v5636_v11 = vld [vmem:[#allocation3 + $0x244] ss:$16 sps:$4 sm:$0xff]   ;;  %v5638_v12 = vld [vmem:[#allocation3 + $0x208] ss:$16 sps:$4 sm:$0xff]  }
  0x39   :  { %1661 = vmatpush1.bf16.msra.mxu0 %v5565_v24  ;;  %v5646_v13 = vld [vmem:[#allocation3 + $0x22c] ss:$16 sps:$4 sm:$0xff]   ;;  %v5634_v14 = vld [vmem:[#allocation3 + $0x240] ss:$16 sps:$4 sm:$0xff]   ;;  %v5643_v15 = vld [vmem:[#allocation3 + $0x264] ss:$16 sps:$4 sm:$0xff]  }
  0x3a   :  { %1662 = vmatprep.subr.bf16.mxu0 %v5568_v25  ;;  %1833 = vmatpush1.bf16.msra.mxu1 %v5582_v30  ;;  %v5644_v16 = vld [vmem:[#allocation3 + $0x228] ss:$16 sps:$4 sm:$0xff]   ;;  %v5652_v17 = vld [vmem:[#allocation3 + $0x24c] ss:$16 sps:$4 sm:$0xff]   ;;  %v5641_v18 = vld [vmem:[#allocation3 + $0x260] ss:$16 sps:$4 sm:$0xff]  }
  0x3b   :  { %1834 = vmatprep.subr.bf16.mxu1 %v5584_v31  ;;  %v5649_v19 = vld [vmem:[#allocation3 + $0x284] ss:$16 sps:$4 sm:$0xff]   ;;  %v5650_v20 = vld [vmem:[#allocation3 + $0x248] ss:$16 sps:$4 sm:$0xff]   ;;  %v5658_v21 = vld [vmem:[#allocation3 + $0x26c] ss:$16 sps:$4 sm:$0xff]  }
  0x3c   :  { %v5647_v22 = vld [vmem:[#allocation3 + $0x280] ss:$16 sps:$4 sm:$0xff]   ;;  %v5655_v23 = vld [vmem:[#allocation3 + $0x2a4] ss:$16 sps:$4 sm:$0xff]   ;;  %v5656_v24 = vld [vmem:[#allocation3 + $0x268] ss:$16 sps:$4 sm:$0xff]  }
  0x3d   :  { %1663 = vmatpush1.bf16.msra.mxu0 %v5571_v28  ;;  %v5664_v25 = vld [vmem:[#allocation3 + $0x28c] ss:$16 sps:$4 sm:$0xff]   ;;  %v5653_v26 = vld [vmem:[#allocation3 + $0x2a0] ss:$16 sps:$4 sm:$0xff]   ;;  %v5661_v27 = vld [vmem:[#allocation3 + $0x2c4] ss:$16 sps:$4 sm:$0xff]  }
  0x3e   :  { %1664 = vmatprep.subr.bf16.mxu0 %v5574_v29  ;;  %1835 = vmatpush1.bf16.msra.mxu1 %v5588_v34  ;;  %v5662_v28 = vld [vmem:[#allocation3 + $0x288] ss:$16 sps:$4 sm:$0xff]   ;;  %v5670_v31 = vld [vmem:[#allocation3 + $0x2ac] ss:$16 sps:$4 sm:$0xff]   ;;  %v5667_v34 = vld [vmem:[#allocation3 + $0x2e4] ss:$16 sps:$4 sm:$0xff]  }
  0x3f   :  { %1836 = vmatprep.subr.bf16.mxu1 %v5590_v35  ;;  %v91_v29 = vld [vmem:[%s7437_s26 + $0x18] sm:$0xff]  ;;  %v5685_v46 = vld [vmem:[#allocation3 + $0x344] ss:$16 sps:$4 sm:$0xff]   ;;  %v5707_v1 = vld [vmem:[#allocation3 + $0x3c0] ss:$16 sps:$4 sm:$0xff]   ;;  %s6251_s27 = smov 64  }
  0x40   :  { %v99_v30 = vld [vmem:[%s7437_s26 + $0x58] sm:$0xff]  ;;  %v5715_v2 = vld [vmem:[#allocation3 + $0x3e4] ss:$16 sps:$4 sm:$0xff]  }
  0x41   :  { %1665 = vmatpush1.bf16.msra.mxu0 %v5577_v32  ;;  %v107_v32 = vpack.c.bf16 %v99_v30, %v91_v29  ;;  %v5668_v35 = vld [vmem:[#allocation3 + $0x2a8] ss:$16 sps:$4 sm:$0xff]   ;;  %v5688_v44 = vld [vmem:[#allocation3 + $0x30c] ss:$16 sps:$4 sm:$0xff]  }
  0x42   :  { %1666 = vmatprep.subr.bf16.mxu0 %v5580_v33  ;;  %1837 = vmatpush1.bf16.msra.mxu1 %v5594_v38  ;;  %v5659_v33 = vld [vmem:[#allocation3 + $0x2c0] ss:$16 sps:$4 sm:$0xff]   ;;  %v5673_v38 = vld [vmem:[#allocation3 + $0x304] ss:$16 sps:$4 sm:$0xff]   ;;  %v5680_v43 = vld [vmem:[#allocation3 + $0x2e8] ss:$16 sps:$4 sm:$0xff]  }
  0x43   :  { %1838 = vmatprep.subr.bf16.mxu1 %v5596_v39  ;;  %v5674_v39 = vld [vmem:[#allocation3 + $0x2c8] ss:$16 sps:$4 sm:$0xff]   ;;  %v5754_v30 = vld [vmem:[#allocation3 + $0x46c] ss:$16 sps:$4 sm:$0xff]  }
  0x44   :  { %v5746_v29 = vld [vmem:[#allocation3 + $0x448] ss:$16 sps:$4 sm:$0xff]  }
  0x45   :  { %1667 = vmatpush1.bf16.msra.mxu0 %v5583_v36  ;;  %v5676_v36 = vld [vmem:[#allocation3 + $0x2cc] ss:$16 sps:$4 sm:$0xff]  }
  0x46   :  { %1668 = vmatprep.subr.bf16.mxu0 %v5586_v37  ;;  %1839 = vmatpush1.bf16.msra.mxu1 %v5600_v42  ;;  %v5665_v37 = vld [vmem:[#allocation3 + $0x2e0] ss:$16 sps:$4 sm:$0xff]   ;;  %v5679_v42 = vld [vmem:[#allocation3 + $0x324] ss:$16 sps:$4 sm:$0xff]  }
  0x47   :  { %1840 = vmatprep.subr.bf16.mxu1 %v5602_v45  ;;  %v5677_v45 = vld [vmem:[#allocation3 + $0x320] ss:$16 sps:$4 sm:$0xff]  }
  0x49   :  { %1669 = vmatpush1.bf16.msra.mxu0 %v5589_v40  ;;  %v5682_v40 = vld [vmem:[#allocation3 + $0x2ec] ss:$16 sps:$4 sm:$0xff]  }
  0x4a   :  { %1670 = vmatprep.subr.bf16.mxu0 %v5592_v41  ;;  %1841 = vmatpush1.bf16.msra.mxu1 %v5606_v49  ;;  %v5671_v41 = vld [vmem:[#allocation3 + $0x300] ss:$16 sps:$4 sm:$0xff]  }
  0x4b   :  { %1842 = vmatprep.subr.bf16.mxu1 %v5608_v50  ;;  %v5683_v49 = vld [vmem:[#allocation3 + $0x340] ss:$16 sps:$4 sm:$0xff]   ;;  %v5691_v50 = vld [vmem:[#allocation3 + $0x364] ss:$16 sps:$4 sm:$0xff]  }
  0x4d   :  { %1671 = vmatpush1.bf16.msra.mxu0 %v5595_v47  ;;  %v5686_v47 = vld [vmem:[#allocation3 + $0x308] ss:$16 sps:$4 sm:$0xff]  }
  0x4e   :  { %1672 = vmatprep.subr.bf16.mxu0 %v5598_v48  ;;  %1843 = vmatpush1.bf16.msra.mxu1 %v5612_v53  ;;  %v5694_v48 = vld [vmem:[#allocation3 + $0x32c] ss:$16 sps:$4 sm:$0xff]   ;;  %v5689_v53 = vld [vmem:[#allocation3 + $0x360] ss:$16 sps:$4 sm:$0xff]  }
  0x4f   :  { %1844 = vmatprep.subr.bf16.mxu1 %v5614_v54  ;;  %v5697_v54 = vld [vmem:[#allocation3 + $0x384] ss:$16 sps:$4 sm:$0xff]  }
  0x51   :  { %1673 = vmatpush1.bf16.msra.mxu0 %v5601_v51  ;;  %v5692_v51 = vld [vmem:[#allocation3 + $0x328] ss:$16 sps:$4 sm:$0xff]  }
  0x52   :  { %1674 = vmatprep.subr.bf16.mxu0 %v5604_v52  ;;  %1845 = vmatpush1.bf16.msra.mxu1 %v5618_v57  ;;  %v5700_v52 = vld [vmem:[#allocation3 + $0x34c] ss:$16 sps:$4 sm:$0xff]   ;;  %v5695_v57 = vld [vmem:[#allocation3 + $0x380] ss:$16 sps:$4 sm:$0xff]  }
  0x53   :  { %1846 = vmatprep.subr.bf16.mxu1 %v5620_v58  ;;  %v5703_v58 = vld [vmem:[#allocation3 + $0x3a4] ss:$16 sps:$4 sm:$0xff]  }
  0x55   :  { %1675 = vmatpush1.bf16.msra.mxu0 %v5607_v55  ;;  %v5698_v55 = vld [vmem:[#allocation3 + $0x348] ss:$16 sps:$4 sm:$0xff]  }
  0x56   :  { %1676 = vmatprep.subr.bf16.mxu0 %v5610_v56  ;;  %1847 = vmatpush1.bf16.msra.mxu1 %v5625_v61  ;;  %v5706_v56 = vld [vmem:[#allocation3 + $0x36c] ss:$16 sps:$4 sm:$0xff]   ;;  %v5701_v61 = vld [vmem:[#allocation3 + $0x3a0] ss:$16 sps:$4 sm:$0xff]  }
  0x57   :  { %1848 = vmatprep.subr.bf16.mxu1 %v5626_v62  ;;  %v5709_v62 = vld [vmem:[#allocation3 + $0x3c4] ss:$16 sps:$4 sm:$0xff]  }
  0x59   :  { %1677 = vmatpush1.bf16.msra.mxu0 %v5613_v59  ;;  %v5704_v59 = vld [vmem:[#allocation3 + $0x368] ss:$16 sps:$4 sm:$0xff]  }
  0x5a   :  { %1678 = vmatprep.subr.bf16.mxu0 %v5616_v60  ;;  %1849 = vmatpush1.bf16.msra.mxu1 %v5631_v3  ;;  %v5712_v60 = vld [vmem:[#allocation3 + $0x38c] ss:$16 sps:$4 sm:$0xff]   ;;  %v5716_v3 = vld [vmem:[#allocation3 + $0x3a8] ss:$16 sps:$4 sm:$0xff]  }
  0x5b   :  { %1850 = vmatprep.subr.bf16.mxu1 %v5632_v4  ;;  %v5724_v4 = vld [vmem:[#allocation3 + $0x3cc] ss:$16 sps:$4 sm:$0xff]  }
  0x5d   :  { %1679 = vmatpush1.bf16.msra.mxu0 %v5619_v63  ;;  %v5710_v63 = vld [vmem:[#allocation3 + $0x388] ss:$16 sps:$4 sm:$0xff]  }
  0x5e   :  { %1691 = vmatprep.subr.bf16.mxu0 %v5624_v0  ;;  %1851 = vmatpush1.bf16.msra.mxu1 %v5637_v8  ;;  %v5718_v0 = vld [vmem:[#allocation3 + $0x3ac] ss:$16 sps:$4 sm:$0xff]   ;;  %v98_v8 = vld [vmem:[%s7437_s26 + $0x50] sm:$0xff] }
  0x5f   :  { %1863 = vmatprep.subr.bf16.mxu1 %v5640_v9  ;;  %v5722_v9 = vld [vmem:[#allocation3 + $0x3c8] ss:$16 sps:$4 sm:$0xff]  }
  0x60   :  { %1681 = vmatmul.mubr.bf16.vlgmr.msra.gmra.mrb[0].mxu0 %v104_v5 }
  0x61   :  { %1692 = vmatpush1.bf16.msra.mxu0 %v5622_v6  ;;  %1853 = vmatmul.mubr.bf16.vlgmr.msra.gmra.mrb[0].mxu1 %v104_v5  ;;  %v5713_v5 = vld [vmem:[#allocation3 + $0x3e0] ss:$16 sps:$4 sm:$0xff]   ;;  %v5721_v6 = vld [vmem:[#allocation3 + $0x404] ss:$16 sps:$4 sm:$0xff]  }
  0x62   :  { %1693 = vmatprep.subr.bf16.mxu0 %v5630_v7  ;;  %1864 = vmatpush1.bf16.msra.mxu1 %v5638_v12  ;;  %v90_v7 = vld [vmem:[%s7437_s26 + $0x10] sm:$0xff] }
  0x63   :  { %1865 = vmatprep.subr.bf16.mxu1 %v5646_v13  ;;  %1723 = vmatprep.mubr.bf16.mxu0 %v107_v32  ;;  %v106_v12 = vpack.c.bf16 %v98_v8, %v90_v7  ;;  %v5727_v13 = vld [vmem:[#allocation3 + $0x424] ss:$16 sps:$4 sm:$0xff]   ;;  %v5803_v7 = vld [vmem:[#allocation3 + $0x5c0] ss:$16 sps:$4 sm:$0xff]  }
  0x64   :  { %1895 = vmatprep.mubr.bf16.mxu1 %v107_v32  ;;  %v5751_v32 = vld [vmem:[#allocation3 + $0x4a4] ss:$16 sps:$4 sm:$0xff]  }
  0x65   :  { %1694 = vmatpush1.bf16.msra.mxu0 %v5628_v10  ;;  %v5730_v10 = vld [vmem:[#allocation3 + $0x3ec] ss:$16 sps:$4 sm:$0xff]   ;;  %v5811_v8 = vld [vmem:[#allocation3 + $0x5e4] ss:$16 sps:$4 sm:$0xff]  }
  0x66   :  { %1695 = vmatprep.subr.bf16.mxu0 %v5636_v11  ;;  %1866 = vmatpush1.bf16.msra.mxu1 %v5644_v16  ;;  %v5719_v11 = vld [vmem:[#allocation3 + $0x400] ss:$16 sps:$4 sm:$0xff]   ;;  %v101_v16 = vld [vmem:[%s7437_s26 + $0x68] sm:$0xff] }
  0x67   :  { %1867 = vmatprep.subr.bf16.mxu1 %v5652_v17  ;;  %v5736_v17 = vld [vmem:[#allocation3 + $0x40c] ss:$16 sps:$4 sm:$0xff]  }
  0x69   :  { %1696 = vmatpush1.bf16.msra.mxu0 %v5634_v14  ;;  %v5728_v14 = vld [vmem:[#allocation3 + $0x3e8] ss:$16 sps:$4 sm:$0xff]  }
  0x6a   :  { %1697 = vmatprep.subr.bf16.mxu0 %v5643_v15  ;;  %1868 = vmatpush1.bf16.msra.mxu1 %v5650_v20  ;;  %v93_v15 = vld [vmem:[%s7437_s26 + $0x28] sm:$0xff]  ;;  %v5733_v20 = vld [vmem:[#allocation3 + $0x444] ss:$16 sps:$4 sm:$0xff]  }
  0x6b   :  { %1869 = vmatprep.subr.bf16.mxu1 %v5658_v21  ;;  %v5734_v21 = vld [vmem:[#allocation3 + $0x408] ss:$16 sps:$4 sm:$0xff]  }
  0x6d   :  { %1698 = vmatpush1.bf16.msra.mxu0 %v5641_v18  ;;  %v109_v18 = vpack.c.bf16 %v101_v16, %v93_v15  ;;  %v5818_v15 = vld [vmem:[#allocation3 + $0x5c8] ss:$16 sps:$4 sm:$0xff]  }
  0x6e   :  { %1699 = vmatprep.subr.bf16.mxu0 %v5649_v19  ;;  %1870 = vmatpush1.bf16.msra.mxu1 %v5656_v24  ;;  %v5725_v19 = vld [vmem:[#allocation3 + $0x420] ss:$16 sps:$4 sm:$0xff]   ;;  %v5739_v24 = vld [vmem:[#allocation3 + $0x464] ss:$16 sps:$4 sm:$0xff]   ;;  %v95_v16 = vld [vmem:[%s7437_s26 + $0x38] sm:$0xff] }
  0x6f   :  { %1871 = vmatprep.subr.bf16.mxu1 %v5664_v25  ;;  %v5740_v25 = vld [vmem:[#allocation3 + $0x428] ss:$16 sps:$4 sm:$0xff]  }
  0x71   :  { %1700 = vmatpush1.bf16.msra.mxu0 %v5647_v22  ;;  %v5742_v22 = vld [vmem:[#allocation3 + $0x42c] ss:$16 sps:$4 sm:$0xff]  }
  0x72   :  { %1701 = vmatprep.subr.bf16.mxu0 %v5655_v23  ;;  %1872 = vmatpush1.bf16.msra.mxu1 %v5662_v28  ;;  %v5731_v23 = vld [vmem:[#allocation3 + $0x440] ss:$16 sps:$4 sm:$0xff]   ;;  %v5745_v28 = vld [vmem:[#allocation3 + $0x484] ss:$16 sps:$4 sm:$0xff]  }
  0x73   :  { %1873 = vmatprep.subr.bf16.mxu1 %v5670_v31  ;;  %v5743_v31 = vld [vmem:[#allocation3 + $0x480] ss:$16 sps:$4 sm:$0xff]  }
  0x75   :  { %1702 = vmatpush1.bf16.msra.mxu0 %v5653_v26  ;;  %v5748_v26 = vld [vmem:[#allocation3 + $0x44c] ss:$16 sps:$4 sm:$0xff]  }
  0x76   :  { %1703 = vmatprep.subr.bf16.mxu0 %v5661_v27  ;;  %1874 = vmatpush1.bf16.msra.mxu1 %v5668_v35  ;;  %v5737_v27 = vld [vmem:[#allocation3 + $0x460] ss:$16 sps:$4 sm:$0xff]  }
  0x77   :  { %1875 = vmatprep.subr.bf16.mxu1 %v5676_v36  ;;  %v5749_v35 = vld [vmem:[#allocation3 + $0x4a0] ss:$16 sps:$4 sm:$0xff]   ;;  %v5757_v36 = vld [vmem:[#allocation3 + $0x4c4] ss:$16 sps:$4 sm:$0xff]  }
  0x79   :  { %1704 = vmatpush1.bf16.msra.mxu0 %v5659_v33  ;;  %v5752_v33 = vld [vmem:[#allocation3 + $0x468] ss:$16 sps:$4 sm:$0xff]  }
  0x7a   :  { %1705 = vmatprep.subr.bf16.mxu0 %v5667_v34  ;;  %1876 = vmatpush1.bf16.msra.mxu1 %v5674_v39  ;;  %v5760_v34 = vld [vmem:[#allocation3 + $0x48c] ss:$16 sps:$4 sm:$0xff]   ;;  %v5755_v39 = vld [vmem:[#allocation3 + $0x4c0] ss:$16 sps:$4 sm:$0xff]  }
  0x7b   :  { %1877 = vmatprep.subr.bf16.mxu1 %v5682_v40  ;;  %v5763_v40 = vld [vmem:[#allocation3 + $0x4e4] ss:$16 sps:$4 sm:$0xff]  }
  0x7d   :  { %1706 = vmatpush1.bf16.msra.mxu0 %v5665_v37  ;;  %v5758_v37 = vld [vmem:[#allocation3 + $0x488] ss:$16 sps:$4 sm:$0xff]  }
  0x7e   :  { %1707 = vmatprep.subr.bf16.mxu0 %v5673_v38  ;;  %1878 = vmatpush1.bf16.msra.mxu1 %v5680_v43  ;;  %v5766_v38 = vld [vmem:[#allocation3 + $0x4ac] ss:$16 sps:$4 sm:$0xff]   ;;  %v5761_v43 = vld [vmem:[#allocation3 + $0x4e0] ss:$16 sps:$4 sm:$0xff]  }
  0x7f   :  { %1879 = vmatprep.subr.bf16.mxu1 %v5688_v44  ;;  %v5769_v44 = vld [vmem:[#allocation3 + $0x504] ss:$16 sps:$4 sm:$0xff]  }
  0x81   :  { %1708 = vmatpush1.bf16.msra.mxu0 %v5671_v41  ;;  %v5764_v41 = vld [vmem:[#allocation3 + $0x4a8] ss:$16 sps:$4 sm:$0xff]  }
  0x82   :  { %1709 = vmatprep.subr.bf16.mxu0 %v5679_v42  ;;  %1880 = vmatpush1.bf16.msra.mxu1 %v5686_v47  ;;  %v5772_v42 = vld [vmem:[#allocation3 + $0x4cc] ss:$16 sps:$4 sm:$0xff]   ;;  %v5767_v47 = vld [vmem:[#allocation3 + $0x500] ss:$16 sps:$4 sm:$0xff]  }
  0x83   :  { %1881 = vmatprep.subr.bf16.mxu1 %v5694_v48  ;;  %v5775_v48 = vld [vmem:[#allocation3 + $0x524] ss:$16 sps:$4 sm:$0xff]  }
  0x85   :  { %1710 = vmatpush1.bf16.msra.mxu0 %v5677_v45  ;;  %v5770_v45 = vld [vmem:[#allocation3 + $0x4c8] ss:$16 sps:$4 sm:$0xff]  }
  0x86   :  { %1711 = vmatprep.subr.bf16.mxu0 %v5685_v46  ;;  %1882 = vmatpush1.bf16.msra.mxu1 %v5692_v51  ;;  %v5778_v46 = vld [vmem:[#allocation3 + $0x4ec] ss:$16 sps:$4 sm:$0xff]   ;;  %v5773_v51 = vld [vmem:[#allocation3 + $0x520] ss:$16 sps:$4 sm:$0xff]  }
  0x87   :  { %1883 = vmatprep.subr.bf16.mxu1 %v5700_v52  ;;  %v5781_v52 = vld [vmem:[#allocation3 + $0x544] ss:$16 sps:$4 sm:$0xff]  }
  0x89   :  { %1712 = vmatpush1.bf16.msra.mxu0 %v5683_v49  ;;  %v5776_v49 = vld [vmem:[#allocation3 + $0x4e8] ss:$16 sps:$4 sm:$0xff]  }
  0x8a   :  { %1713 = vmatprep.subr.bf16.mxu0 %v5691_v50  ;;  %1884 = vmatpush1.bf16.msra.mxu1 %v5698_v55  ;;  %v5784_v50 = vld [vmem:[#allocation3 + $0x50c] ss:$16 sps:$4 sm:$0xff]   ;;  %v5779_v55 = vld [vmem:[#allocation3 + $0x540] ss:$16 sps:$4 sm:$0xff]  }
  0x8b   :  { %1885 = vmatprep.subr.bf16.mxu1 %v5706_v56  ;;  %v5787_v56 = vld [vmem:[#allocation3 + $0x564] ss:$16 sps:$4 sm:$0xff]  }
  0x8d   :  { %1714 = vmatpush1.bf16.msra.mxu0 %v5689_v53  ;;  %v5782_v53 = vld [vmem:[#allocation3 + $0x508] ss:$16 sps:$4 sm:$0xff]  }
  0x8e   :  { %1715 = vmatprep.subr.bf16.mxu0 %v5697_v54  ;;  %1886 = vmatpush1.bf16.msra.mxu1 %v5704_v59  ;;  %v5790_v54 = vld [vmem:[#allocation3 + $0x52c] ss:$16 sps:$4 sm:$0xff]   ;;  %v5785_v59 = vld [vmem:[#allocation3 + $0x560] ss:$16 sps:$4 sm:$0xff]  }
  0x8f   :  { %1887 = vmatprep.subr.bf16.mxu1 %v5712_v60  ;;  %v5793_v60 = vld [vmem:[#allocation3 + $0x584] ss:$16 sps:$4 sm:$0xff]  }
  0x91   :  { %1716 = vmatpush1.bf16.msra.mxu0 %v5695_v57  ;;  %v5788_v57 = vld [vmem:[#allocation3 + $0x528] ss:$16 sps:$4 sm:$0xff]  }
  0x92   :  { %1717 = vmatprep.subr.bf16.mxu0 %v5703_v58  ;;  %1888 = vmatpush1.bf16.msra.mxu1 %v5710_v63  ;;  %v5796_v58 = vld [vmem:[#allocation3 + $0x54c] ss:$16 sps:$4 sm:$0xff]   ;;  %v5791_v63 = vld [vmem:[#allocation3 + $0x580] ss:$16 sps:$4 sm:$0xff]  }
  0x93   :  { %1889 = vmatprep.subr.bf16.mxu1 %v5718_v0  ;;  %v5799_v0 = vld [vmem:[#allocation3 + $0x5a4] ss:$16 sps:$4 sm:$0xff]  }
  0x95   :  { %1718 = vmatpush1.bf16.msra.mxu0 %v5701_v61  ;;  %v5794_v61 = vld [vmem:[#allocation3 + $0x548] ss:$16 sps:$4 sm:$0xff]  }
  0x96   :  { %1719 = vmatprep.subr.bf16.mxu0 %v5709_v62  ;;  %1890 = vmatpush1.bf16.msra.mxu1 %v5716_v3  ;;  %v5802_v62 = vld [vmem:[#allocation3 + $0x56c] ss:$16 sps:$4 sm:$0xff]   ;;  %v5797_v3 = vld [vmem:[#allocation3 + $0x5a0] ss:$16 sps:$4 sm:$0xff]  }
  0x97   :  { %1891 = vmatprep.subr.bf16.mxu1 %v5724_v4  ;;  %v5805_v4 = vld [vmem:[#allocation3 + $0x5c4] ss:$16 sps:$4 sm:$0xff]  }
  0x99   :  { %1720 = vmatpush1.bf16.msra.mxu0 %v5707_v1  ;;  %v5800_v1 = vld [vmem:[#allocation3 + $0x568] ss:$16 sps:$4 sm:$0xff]  }
  0x9a   :  { %1721 = vmatprep.subr.bf16.mxu0 %v5715_v2  ;;  %1892 = vmatpush1.bf16.msra.mxu1 %v5722_v9  ;;  %v5808_v2 = vld [vmem:[#allocation3 + $0x58c] ss:$16 sps:$4 sm:$0xff]   ;;  %v5812_v9 = vld [vmem:[#allocation3 + $0x5a8] ss:$16 sps:$4 sm:$0xff]  }
  0x9b   :  { %1893 = vmatprep.subr.bf16.mxu1 %v5730_v10  ;;  %v5820_v10 = vld [vmem:[#allocation3 + $0x5cc] ss:$16 sps:$4 sm:$0xff]  }
  0x9d   :  { %1722 = vmatpush1.bf16.msra.mxu0 %v5713_v5  ;;  %v5806_v5 = vld [vmem:[#allocation3 + $0x588] ss:$16 sps:$4 sm:$0xff]  }
  0x9e   :  { %1734 = vmatprep.subr.bf16.mxu0 %v5721_v6  ;;  %1894 = vmatpush1.bf16.msra.mxu1 %v5728_v14  ;;  %v5814_v6 = vld [vmem:[#allocation3 + $0x5ac] ss:$16 sps:$4 sm:$0xff]   ;;  %v5817_v14 = vld [vmem:[#allocation3 + $0x604] ss:$16 sps:$4 sm:$0xff]  }
  0x9f   :  { %1906 = vmatprep.subr.bf16.mxu1 %v5736_v17  ;;  %v103_v17 = vld [vmem:[%s7437_s26 + $0x78] sm:$0xff] }
  0xa0   :  { %1724 = vmatmul.mubr.bf16.vlgmr.msra.gmra.mrb[0].mxu0 %v106_v12 }
  0xa1   :  { %1735 = vmatpush1.bf16.msra.mxu0 %v5719_v11  ;;  %1766 = vmatprep.mubr.bf16.mxu0 %v109_v18  ;;  %v5809_v11 = vld [vmem:[#allocation3 + $0x5e0] ss:$16 sps:$4 sm:$0xff]  }
  0xa2   :  { %1736 = vmatprep.subr.bf16.mxu0 %v5727_v13  ;;  %1896 = vmatmul.mubr.bf16.vlgmr.msra.gmra.mrb[0].mxu1 %v106_v12  ;;  %v92_v12 = vld [vmem:[%s7437_s26 + $0x20] sm:$0xff] }
  0xa3   :  { %1907 = vmatpush1.bf16.msra.mxu1 %v5734_v21  ;;  %1938 = vmatprep.mubr.bf16.mxu1 %v109_v18  ;;  %v100_v13 = vld [vmem:[%s7437_s26 + $0x60] sm:$0xff]  ;;  %v5826_v18 = vld [vmem:[#allocation3 + $0x5ec] ss:$16 sps:$4 sm:$0xff]  }
  0xa4   :  { %1908 = vmatprep.subr.bf16.mxu1 %v5742_v22  ;;  %v5823_v21 = vld [vmem:[#allocation3 + $0x624] ss:$16 sps:$4 sm:$0xff]   ;;  %v5824_v22 = vld [vmem:[#allocation3 + $0x5e8] ss:$16 sps:$4 sm:$0xff]  }
  0xa5   :  { %1737 = vmatpush1.bf16.msra.mxu0 %v5725_v19  ;;  %v5815_v19 = vld [vmem:[#allocation3 + $0x600] ss:$16 sps:$4 sm:$0xff]  }
  0xa6   :  { %1738 = vmatprep.subr.bf16.mxu0 %v5733_v20  ;;  %v108_v20 = vpack.c.bf16 %v100_v13, %v92_v12  ;;  %v5910_v12 = vld [vmem:[#allocation3 + $0x7ac] ss:$16 sps:$4 sm:$0xff]   ;;  %v5899_v13 = vld [vmem:[#allocation3 + $0x7c0] ss:$16 sps:$4 sm:$0xff]  }
  0xa7   :  { %1909 = vmatpush1.bf16.msra.mxu1 %v5740_v25  ;;  %v5821_v25 = vld [vmem:[#allocation3 + $0x620] ss:$16 sps:$4 sm:$0xff]  }
  0xa8   :  { %1910 = vmatprep.subr.bf16.mxu1 %v5748_v26  ;;  %v5829_v26 = vld [vmem:[#allocation3 + $0x644] ss:$16 sps:$4 sm:$0xff]  }
  0xa9   :  { %1739 = vmatpush1.bf16.msra.mxu0 %v5731_v23  ;;  %v5832_v23 = vld [vmem:[#allocation3 + $0x60c] ss:$16 sps:$4 sm:$0xff]  }
  0xaa   :  { %1740 = vmatprep.subr.bf16.mxu0 %v5739_v24  ;;  %v111_v24 = vpack.c.bf16 %v103_v17, %v95_v16  ;;  %v5913_v16 = vld [vmem:[#allocation3 + $0x7cc] ss:$16 sps:$4 sm:$0xff]   ;;  %v5905_v17 = vld [vmem:[#allocation3 + $0x7e0] ss:$16 sps:$4 sm:$0xff]  }
  0xab   :  { %1911 = vmatpush1.bf16.msra.mxu1 %v5746_v29  ;;  %v5827_v29 = vld [vmem:[#allocation3 + $0x640] ss:$16 sps:$4 sm:$0xff]  }
  0xac   :  { %1912 = vmatprep.subr.bf16.mxu1 %v5754_v30  ;;  %v5835_v30 = vld [vmem:[#allocation3 + $0x664] ss:$16 sps:$4 sm:$0xff]  }
  0xad   :  { %1741 = vmatpush1.bf16.msra.mxu0 %v5737_v27  ;;  %v5830_v27 = vld [vmem:[#allocation3 + $0x608] ss:$16 sps:$4 sm:$0xff]  }
  0xae   :  { %1742 = vmatprep.subr.bf16.mxu0 %v5745_v28  ;;  %v5838_v28 = vld [vmem:[#allocation3 + $0x62c] ss:$16 sps:$4 sm:$0xff]  }
  0xaf   :  { %1913 = vmatpush1.bf16.msra.mxu1 %v5752_v33  ;;  %v5833_v33 = vld [vmem:[#allocation3 + $0x660] ss:$16 sps:$4 sm:$0xff]  }
  0xb0   :  { %1914 = vmatprep.subr.bf16.mxu1 %v5760_v34  ;;  %v5841_v34 = vld [vmem:[#allocation3 + $0x684] ss:$16 sps:$4 sm:$0xff]  }
  0xb1   :  { %1743 = vmatpush1.bf16.msra.mxu0 %v5743_v31  ;;  %v5836_v31 = vld [vmem:[#allocation3 + $0x628] ss:$16 sps:$4 sm:$0xff]  }
  0xb2   :  { %1744 = vmatprep.subr.bf16.mxu0 %v5751_v32  ;;  %v5844_v32 = vld [vmem:[#allocation3 + $0x64c] ss:$16 sps:$4 sm:$0xff]  }
  0xb3   :  { %1915 = vmatpush1.bf16.msra.mxu1 %v5758_v37  ;;  %v5839_v37 = vld [vmem:[#allocation3 + $0x680] ss:$16 sps:$4 sm:$0xff]  }
  0xb4   :  { %1916 = vmatprep.subr.bf16.mxu1 %v5766_v38  ;;  %v5847_v38 = vld [vmem:[#allocation3 + $0x6a4] ss:$16 sps:$4 sm:$0xff]  }
  0xb5   :  { %1745 = vmatpush1.bf16.msra.mxu0 %v5749_v35  ;;  %v5842_v35 = vld [vmem:[#allocation3 + $0x648] ss:$16 sps:$4 sm:$0xff]  }
  0xb6   :  { %1746 = vmatprep.subr.bf16.mxu0 %v5757_v36  ;;  %v5850_v36 = vld [vmem:[#allocation3 + $0x66c] ss:$16 sps:$4 sm:$0xff]  }
  0xb7   :  { %1917 = vmatpush1.bf16.msra.mxu1 %v5764_v41  ;;  %v5845_v41 = vld [vmem:[#allocation3 + $0x6a0] ss:$16 sps:$4 sm:$0xff]  }
  0xb8   :  { %1918 = vmatprep.subr.bf16.mxu1 %v5772_v42  ;;  %v5853_v42 = vld [vmem:[#allocation3 + $0x6c4] ss:$16 sps:$4 sm:$0xff]  }
  0xb9   :  { %1747 = vmatpush1.bf16.msra.mxu0 %v5755_v39  ;;  %v5848_v39 = vld [vmem:[#allocation3 + $0x668] ss:$16 sps:$4 sm:$0xff]  }
  0xba   :  { %1748 = vmatprep.subr.bf16.mxu0 %v5763_v40  ;;  %v5856_v40 = vld [vmem:[#allocation3 + $0x68c] ss:$16 sps:$4 sm:$0xff]  }
  0xbb   :  { %1919 = vmatpush1.bf16.msra.mxu1 %v5770_v45  ;;  %v5851_v45 = vld [vmem:[#allocation3 + $0x6c0] ss:$16 sps:$4 sm:$0xff]  }
  0xbc   :  { %1920 = vmatprep.subr.bf16.mxu1 %v5778_v46  ;;  %v5859_v46 = vld [vmem:[#allocation3 + $0x6e4] ss:$16 sps:$4 sm:$0xff]  }
  0xbd   :  { %1749 = vmatpush1.bf16.msra.mxu0 %v5761_v43  ;;  %v5854_v43 = vld [vmem:[#allocation3 + $0x688] ss:$16 sps:$4 sm:$0xff]  }
  0xbe   :  { %1750 = vmatprep.subr.bf16.mxu0 %v5769_v44  ;;  %v5862_v44 = vld [vmem:[#allocation3 + $0x6ac] ss:$16 sps:$4 sm:$0xff]  }
  0xbf   :  { %1921 = vmatpush1.bf16.msra.mxu1 %v5776_v49  ;;  %v5857_v49 = vld [vmem:[#allocation3 + $0x6e0] ss:$16 sps:$4 sm:$0xff]  }
  0xc0   :  { %1922 = vmatprep.subr.bf16.mxu1 %v5784_v50  ;;  %v5865_v50 = vld [vmem:[#allocation3 + $0x704] ss:$16 sps:$4 sm:$0xff]  }
  0xc1   :  { %1751 = vmatpush1.bf16.msra.mxu0 %v5767_v47  ;;  %v5860_v47 = vld [vmem:[#allocation3 + $0x6a8] ss:$16 sps:$4 sm:$0xff]  }
  0xc2   :  { %1752 = vmatprep.subr.bf16.mxu0 %v5775_v48  ;;  %v5868_v48 = vld [vmem:[#allocation3 + $0x6cc] ss:$16 sps:$4 sm:$0xff]  }
  0xc3   :  { %1923 = vmatpush1.bf16.msra.mxu1 %v5782_v53  ;;  %v5863_v53 = vld [vmem:[#allocation3 + $0x700] ss:$16 sps:$4 sm:$0xff]  }
  0xc4   :  { %1924 = vmatprep.subr.bf16.mxu1 %v5790_v54  ;;  %v5871_v54 = vld [vmem:[#allocation3 + $0x724] ss:$16 sps:$4 sm:$0xff]  }
  0xc5   :  { %1753 = vmatpush1.bf16.msra.mxu0 %v5773_v51  ;;  %v5866_v51 = vld [vmem:[#allocation3 + $0x6c8] ss:$16 sps:$4 sm:$0xff]  }
  0xc6   :  { %1754 = vmatprep.subr.bf16.mxu0 %v5781_v52  ;;  %v5874_v52 = vld [vmem:[#allocation3 + $0x6ec] ss:$16 sps:$4 sm:$0xff]  }
  0xc7   :  { %1925 = vmatpush1.bf16.msra.mxu1 %v5788_v57  ;;  %v5869_v57 = vld [vmem:[#allocation3 + $0x720] ss:$16 sps:$4 sm:$0xff]  }
  0xc8   :  { %1926 = vmatprep.subr.bf16.mxu1 %v5796_v58  ;;  %v5877_v58 = vld [vmem:[#allocation3 + $0x744] ss:$16 sps:$4 sm:$0xff]  }
  0xc9   :  { %1755 = vmatpush1.bf16.msra.mxu0 %v5779_v55  ;;  %v5872_v55 = vld [vmem:[#allocation3 + $0x6e8] ss:$16 sps:$4 sm:$0xff]  }
  0xca   :  { %1756 = vmatprep.subr.bf16.mxu0 %v5787_v56  ;;  %v5880_v56 = vld [vmem:[#allocation3 + $0x70c] ss:$16 sps:$4 sm:$0xff]  }
  0xcb   :  { %1927 = vmatpush1.bf16.msra.mxu1 %v5794_v61  ;;  %v5875_v61 = vld [vmem:[#allocation3 + $0x740] ss:$16 sps:$4 sm:$0xff]  }
  0xcc   :  { %1928 = vmatprep.subr.bf16.mxu1 %v5802_v62  ;;  %v5883_v62 = vld [vmem:[#allocation3 + $0x764] ss:$16 sps:$4 sm:$0xff]  }
  0xcd   :  { %1757 = vmatpush1.bf16.msra.mxu0 %v5785_v59  ;;  %v5878_v59 = vld [vmem:[#allocation3 + $0x708] ss:$16 sps:$4 sm:$0xff]  }
  0xce   :  { %1758 = vmatprep.subr.bf16.mxu0 %v5793_v60  ;;  %v5886_v60 = vld [vmem:[#allocation3 + $0x72c] ss:$16 sps:$4 sm:$0xff]  }
  0xcf   :  { %1929 = vmatpush1.bf16.msra.mxu1 %v5800_v1  ;;  %v5881_v1 = vld [vmem:[#allocation3 + $0x760] ss:$16 sps:$4 sm:$0xff]  }
  0xd0   :  { %1930 = vmatprep.subr.bf16.mxu1 %v5808_v2  ;;  %v5889_v2 = vld [vmem:[#allocation3 + $0x784] ss:$16 sps:$4 sm:$0xff]  }
  0xd1   :  { %1759 = vmatpush1.bf16.msra.mxu0 %v5791_v63  ;;  %v5884_v63 = vld [vmem:[#allocation3 + $0x728] ss:$16 sps:$4 sm:$0xff]  }
  0xd2   :  { %1760 = vmatprep.subr.bf16.mxu0 %v5799_v0  ;;  %v5892_v0 = vld [vmem:[#allocation3 + $0x74c] ss:$16 sps:$4 sm:$0xff]  }
  0xd3   :  { %1931 = vmatpush1.bf16.msra.mxu1 %v5806_v5  ;;  %v5887_v5 = vld [vmem:[#allocation3 + $0x780] ss:$16 sps:$4 sm:$0xff]  }
  0xd4   :  { %1932 = vmatprep.subr.bf16.mxu1 %v5814_v6  ;;  %v5895_v6 = vld [vmem:[#allocation3 + $0x7a4] ss:$16 sps:$4 sm:$0xff]  }
  0xd5   :  { %1761 = vmatpush1.bf16.msra.mxu0 %v5797_v3  ;;  %v5890_v3 = vld [vmem:[#allocation3 + $0x748] ss:$16 sps:$4 sm:$0xff]  }
  0xd6   :  { %1762 = vmatprep.subr.bf16.mxu0 %v5805_v4  ;;  %v5898_v4 = vld [vmem:[#allocation3 + $0x76c] ss:$16 sps:$4 sm:$0xff]  }
  0xd7   :  { %1933 = vmatpush1.bf16.msra.mxu1 %v5812_v9  ;;  %v5893_v9 = vld [vmem:[#allocation3 + $0x7a0] ss:$16 sps:$4 sm:$0xff]  }
  0xd8   :  { %1934 = vmatprep.subr.bf16.mxu1 %v5820_v10  ;;  %v5901_v10 = vld [vmem:[#allocation3 + $0x7c4] ss:$16 sps:$4 sm:$0xff]  }
  0xd9   :  { %1763 = vmatpush1.bf16.msra.mxu0 %v5803_v7  ;;  %v5896_v7 = vld [vmem:[#allocation3 + $0x768] ss:$16 sps:$4 sm:$0xff]  }
  0xda   :  { %1764 = vmatprep.subr.bf16.mxu0 %v5811_v8  ;;  %v5904_v8 = vld [vmem:[#allocation3 + $0x78c] ss:$16 sps:$4 sm:$0xff]  }
  0xdb   :  { %1935 = vmatpush1.bf16.msra.mxu1 %v5818_v15  ;;  %v5908_v15 = vld [vmem:[#allocation3 + $0x7a8] ss:$16 sps:$4 sm:$0xff]  }
  0xdc   :  { %1936 = vmatprep.subr.bf16.mxu1 %v5826_v18  ;;  %v94_v18 = vld [vmem:[%s7437_s26 + $0x30] sm:$0xff] }
  0xdd   :  { %1765 = vmatpush1.bf16.msra.mxu0 %v5809_v11  ;;  %v5902_v11 = vld [vmem:[#allocation3 + $0x788] ss:$16 sps:$4 sm:$0xff]  }
  0xde   :  { %1777 = vmatprep.subr.bf16.mxu0 %v5817_v14  ;;  %v5907_v14 = vld [vmem:[#allocation3 + $0x7e4] ss:$16 sps:$4 sm:$0xff]  }
  0xdf   :  { %1937 = vmatpush1.bf16.msra.mxu1 %v5824_v22 }
  0xe0   :  { %1767 = vmatmul.mubr.bf16.vlgmr.msra.gmra.mrb[0].mxu0 %v108_v20  ;;  %1949 = vmatprep.subr.bf16.mxu1 %v5832_v23  ;;  %v1994_v23 = vld [vmem:[%s7438_s0] sm:$0xff]  ;;  %s6253_s0 = smov [#allocation6]  }
  0xe1   :  { %1778 = vmatpush1.bf16.msra.mxu0 %v5815_v19  ;;  %1809 = vmatprep.mubr.bf16.mxu0 %v111_v24  ;;  %v102_v19 = vld [vmem:[%s7437_s26 + $0x70] sm:$0xff]  ;;  %s4864_s26 = sshll.u32 %s6253_s0, 4  ;;  %s4865_s26 = int_to_ptr.vmem [resolvable:$true] %s4864_s26 }
  0xe2   :  { %1779 = vmatprep.subr.bf16.mxu0 %v5823_v21  ;;  %1939 = vmatmul.mubr.bf16.vlgmr.msra.gmra.mrb[0].mxu1 %v108_v20  ;;  %v5911_v20 = vld [vmem:[#allocation3 + $0x7c8] ss:$16 sps:$4 sm:$0xff]   ;;  %v5916_v21 = vld [vmem:[#allocation3 + $0x7ec] ss:$16 sps:$4 sm:$0xff]   ;;  %v110_v22 = vpack.c.bf16 %v102_v19, %v94_v18  ;;  %p6216_p9 = scmp.lt.s32.totalorder %s4865_s26, %s4865_s26 }
  0xe3   :  { %1950 = vmatpush1.bf16.msra.mxu1 %v5830_v27  ;;  %1981 = vmatprep.mubr.bf16.mxu1 %v111_v24  ;;  %v5914_v24 = vld [vmem:[#allocation3 + $0x7e8] ss:$16 sps:$4 sm:$0xff]   ;;  %v6240_v27 = vmov 0.0  }
  0xe4   :  { %1951 = vmatprep.subr.bf16.mxu1 %v5838_v28  ;;  %v6241_v28 = vmov 1  }
  0xe5   :  { %1780 = vmatpush1.bf16.msra.mxu0 %v5821_v25  ;;  %v5133_v25 = vcombine.high %v1994_v23, %v1994_v23  ;;  %5504 = vset.pattern.permute.xlu1 %v6241_v28 }
  0xe6   :  { %1781 = vmatprep.subr.bf16.mxu0 %v5829_v26  ;;  %v5132_v26 = vcombine.low %v1994_v23, %v1994_v23 }
  0xe7   :  { %1952 = vmatpush1.bf16.msra.mxu1 %v5836_v31 }
  0xe8   :  { %1953 = vmatprep.subr.bf16.mxu1 %v5844_v32  ;;  %v2043_v32 = vld [vmem:[%s7439_s30] sm:$0xff] }
  0xe9   :  { %1782 = vmatpush1.bf16.msra.mxu0 %v5827_v29  ;;  %v6242_v29 = vmov 0  }
  0xea   :  { %1783 = vmatprep.subr.bf16.mxu0 %v5835_v30  ;;  %5503 = vset.pattern.permute.xlu0 %v6242_v29 }
  0xeb   :  { %1954 = vmatpush1.bf16.msra.mxu1 %v5842_v35 }
  0xec   :  { %1955 = vmatprep.subr.bf16.mxu1 %v5850_v36 }
  0xed   :  { %1784 = vmatpush1.bf16.msra.mxu0 %v5833_v33 }
  0xee   :  { %1785 = vmatprep.subr.bf16.mxu0 %v5841_v34 }
  0xef   :  { %1956 = vmatpush1.bf16.msra.mxu1 %v5848_v39 }
  0xf0   :  { %1957 = vmatprep.subr.bf16.mxu1 %v5856_v40 }
  0xf1   :  { %1786 = vmatpush1.bf16.msra.mxu0 %v5839_v37  ;;  %v5135_v37 = vcombine.high %v2043_v32, %v2043_v32 }
  0xf2   :  { %1787 = vmatprep.subr.bf16.mxu0 %v5847_v38 }
  0xf3   :  { %1958 = vmatpush1.bf16.msra.mxu1 %v5854_v43 }
  0xf4   :  { %1959 = vmatprep.subr.bf16.mxu1 %v5862_v44 }
  0xf5   :  { %1788 = vmatpush1.bf16.msra.mxu0 %v5845_v41 }
  0xf6   :  { %1789 = vmatprep.subr.bf16.mxu0 %v5853_v42  ;;  %v5134_v42 = vcombine.low %v2043_v32, %v2043_v32 }
  0xf7   :  { %1960 = vmatpush1.bf16.msra.mxu1 %v5860_v47  ;;  %v6243_v47 = vmov 3  }
  0xf8   :  { %1961 = vmatprep.subr.bf16.mxu1 %v5868_v48 }
  0xf9   :  { %1790 = vmatpush1.bf16.msra.mxu0 %v5851_v45 }
  0xfa   :  { %1791 = vmatprep.subr.bf16.mxu0 %v5859_v46 }
  0xfb   :  { %1962 = vmatpush1.bf16.msra.mxu1 %v5866_v51  ;;  %v6245_v51 = vmov 4  }
  0xfc   :  { %1963 = vmatprep.subr.bf16.mxu1 %v5874_v52 }
  0xfd   :  { %1792 = vmatpush1.bf16.msra.mxu0 %v5857_v49  ;;  %v6244_v49 = vmov 2  }
  0xfe   :  { %1793 = vmatprep.subr.bf16.mxu0 %v5865_v50 }
  0xff   :  { %1964 = vmatpush1.bf16.msra.mxu1 %v5872_v55  ;;  %v6247_v55 = vmov 6  }
 0x100   :  { %1965 = vmatprep.subr.bf16.mxu1 %v5880_v56  ;;  %v6248_v56 = vmov 7  }
 0x101   :  { %1794 = vmatpush1.bf16.msra.mxu0 %v5863_v53 }
 0x102   :  { %1795 = vmatprep.subr.bf16.mxu0 %v5871_v54  ;;  %v6246_v54 = vmov 5  }
 0x103   :  { %1966 = vmatpush1.bf16.msra.mxu1 %v5878_v59 }
 0x104   :  { %1967 = vmatprep.subr.bf16.mxu1 %v5886_v60 }
 0x105   :  { %1796 = vmatpush1.bf16.msra.mxu0 %v5869_v57  ;;  %v2101_v57 = vlaneseq }
 0x106   :  { %1797 = vmatprep.subr.bf16.mxu0 %v5877_v58 }
 0x107   :  { %1968 = vmatpush1.bf16.msra.mxu1 %v5884_v63  ;;  %v6470_v58 = vshrl.u32 %v2101_v57, 7 }
 0x108   :  { %1969 = vmatprep.subr.bf16.mxu1 %v5892_v0 }
 0x109   :  { %1798 = vmatpush1.bf16.msra.mxu0 %v5875_v61  ;;  %v6473_v59 = vsub.s32 1, %v6470_v58  ;;  %v6476_v60 = vsub.s32 0, %v6470_v58  ;;  %v2403_v63 = vsub.s32 3, %v6470_v58 }
 0x10a   :  { %1799 = vmatprep.subr.bf16.mxu0 %v5883_v62 }
 0x10b   :  { %1970 = vmatpush1.bf16.msra.mxu1 %v5890_v3 }
 0x10c   :  { %1971 = vmatprep.subr.bf16.mxu1 %v5898_v4 }
 0x10d   :  { %1800 = vmatpush1.bf16.msra.mxu0 %v5881_v1 }
 0x10e   :  { %1801 = vmatprep.subr.bf16.mxu0 %v5889_v2 }
 0x10f   :  { %1972 = vmatpush1.bf16.msra.mxu1 %v5896_v7  ;;  %v2506_v7 = vsub.s32 4, %v6470_v58 }
 0x110   :  { %1973 = vmatprep.subr.bf16.mxu1 %v5904_v8 }
 0x111   :  { %1802 = vmatpush1.bf16.msra.mxu0 %v5887_v5  ;;  %v2300_v5 = vsub.s32 2, %v6470_v58 }
 0x112   :  { %1803 = vmatprep.subr.bf16.mxu0 %v5895_v6  ;;  %v6490_v6 = vld [vmem:[%s7440_s23] sm:$0xff] }
 0x113   :  { %1974 = vmatpush1.bf16.msra.mxu1 %v5902_v11 }
 0x114   :  { %1975 = vmatprep.subr.bf16.mxu1 %v5910_v12 }
 0x115   :  { %1804 = vmatpush1.bf16.msra.mxu0 %v5893_v9 }
 0x116   :  { %1805 = vmatprep.subr.bf16.mxu0 %v5901_v10 }
 0x117   :  { %1976 = vmatpush1.bf16.msra.mxu1 %v5908_v15 }
 0x118   :  { %1977 = vmatprep.subr.bf16.mxu1 %v5913_v16 }
 0x119   :  { %1806 = vmatpush1.bf16.msra.mxu0 %v5899_v13 }
 0x11a   :  { %1807 = vmatprep.subr.bf16.mxu0 %v5907_v14 }
 0x11b   :  { %1978 = vmatpush1.bf16.msra.mxu1 %v5911_v20  ;;  %v6507_v20 = vld [vmem:[%s7440_s23 + $0x8] sm:$0xff] }
 0x11c   :  { %1979 = vmatprep.subr.bf16.mxu1 %v5916_v21 }
 0x11d   :  { %1808 = vmatpush1.bf16.msra.mxu0 %v5905_v17 }
 0x11e   :  { %5308 = vmatprep.subr.bf16.mxu0 %v6240_v27 }
 0x11f   :  { %1980 = vmatpush1.bf16.msra.mxu1 %v5914_v24 }
 0x120   :  { %1810 = vmatmul.mubr.bf16.vlgmr.msra.gmra.mrb[0].mxu0 %v110_v22  ;;  %2002 = vmatprep.subr.bf16.mxu1 %v5133_v25 }
 0x122   :  { %1982 = vmatmul.mubr.bf16.vlgmr.msra.gmra.mrb[0].mxu1 %v110_v22 }
 0x128   :  { %2003 = vmatpush1.bf16.xpose.msra.mxu1 %v5132_v26 }
 0x1f3   :  { %v1811_v30 = vpop.f32.mrb[0].mxu0 }
 0x1f4   :  { %v1813_v31 = vpop.f32.mrb[1].mxu0 }
 0x1f5   :  { %v1815_v33 = vpop.f32.mrb[2].mxu0  ;;  %v6439_v38 = vpop.f32.mrb[0].mxu1 }
 0x1f6   :  { %v6435_v34 = vpack.c.bf16 %v1815_v33, %v1811_v30  ;;  %v1817_v35 = vpop.f32.mrb[3].mxu0  ;;  %v6443_v39 = vpop.f32.mrb[1].mxu1 }
 0x1f7   :  { %v6437_v36 = vpack.c.bf16 %v1817_v35, %v1813_v31  ;;  %v6446_v40 = vpop.f32.mrb[2].mxu1 }
 0x1f8   :  { %v6449_v41 = vpop.f32.mrb[3].mxu1 }
 0x1f9   :  { %2034 = vmatprep.mubr.bf16.mxu1 %v6437_v36  ;;  %2051 = vmatprep.subr.bf16.mxu1 %v6437_v36 }
 0x1fa   :  { %2035 = vmatmul.mubr.bf16.vlgmr.msra.gmra.mrb[4].mxu1 %v6435_v34 }
 0x1fb   :  { %2052 = vmatpush1.bf16.xpose.msra.mxu1 %v6435_v34  ;;  %2083 = vmatprep.mubr.bf16.mxu1 %v5135_v37 }
 0x1fc   :  { %5296 = vmatprep.subr.bf16.mxu1 %v6240_v27 }
 0x202   :  { %2084 = vmatmul.mubr.bf16.vlgmr.msra.gmra.mrb[8].mxu1 %v5134_v42 }
 0x203   :  { %5297 = vmatpush3.bf16.msra.mxu1 %v6435_v34 }
 0x204   :  { %5302 = vmatprep.subr.bf16.mxu1 %v6240_v27 }
 0x2cd   :  { %v2036_v43 = vpop.f32.mrb[4].mxu1 }
 0x2ce   :  { %2187 = vperm.xlu1 %5504, %v2036_v43   ;;  %2093 = vperm.xlu0 %5503, %v2036_v43   ;;  %v2038_v44 = vpop.f32.mrb[5].mxu1 }
 0x2cf   :  { %v2039_v45 = vpop.f32.mrb[6].mxu1 }
 0x2d0   :  { %v2041_v46 = vpop.f32.mrb[7].mxu1 }
 0x2d1   :  { %v2597_v46 = vsub.s32 5, %v6470_v58 }
 0x2d2   :  { %5506 = vset.pattern.permute.xlu1 %v6243_v47  ;;  %2098 = vperm.xlu0 %5503, %v2039_v45  }
 0x2d3   :  { %2394 = vperm.xlu1 %5506, %v2036_v43  }
 0x2d5   :  { %v6455_v48 = vpop.f32.mrb[8].mxu1 }
 0x2d6   :  { %5505 = vset.pattern.permute.xlu0 %v6244_v49  ;;  %v2087_v50 = vpop.f32.mrb[9].mxu1  ;;  %v2197_v61 = vrot.slane %v6455_v48, %v6473_v59  ;;  %v2104_v62 = vrot.slane %v6455_v48, %v6476_v60  ;;  %v2404_v4 = vrot.slane %v6455_v48, %v2403_v63  ;;  %v2301_v16 = vrot.slane %v6455_v48, %v2300_v5 }
 0x2d7   :  { %5507 = vset.pattern.permute.xlu1 %v6245_v51  ;;  %2291 = vperm.xlu0 %5505, %v2036_v43   ;;  %v2088_v52 = vpop.f32.mrb[10].mxu1  ;;  %v6502_v19 = vrot.slane %v6455_v48, %v2506_v7 }
 0x2d8   :  { %2497 = vperm.xlu1 %5507, %v2036_v43   ;;  %v2089_v53 = vpop.f32.mrb[11].mxu1 }
 0x2db   :  { %5510 = vset.pattern.permute.xlu0 %v6243_v47 }
 0x2dc   :  { %5508 = vset.pattern.permute.xlu1 %v6241_v28  ;;  %2398 = vperm.xlu0 %5510, %v2039_v45  }
 0x2dd   :  { %2191 = vperm.xlu1 %5508, %v2039_v45  }
 0x2e0   :  { %5511 = vset.pattern.permute.xlu0 %v6246_v54 }
 0x2e1   :  { %5509 = vset.pattern.permute.xlu1 %v6244_v49  ;;  %2588 = vperm.xlu0 %5511, %v2036_v43  }
 0x2e2   :  { %2295 = vperm.xlu1 %5509, %v2039_v45  }
 0x2e5   :  { %5516 = vset.pattern.permute.xlu0 %v6247_v55 }
 0x2e6   :  { %5512 = vset.pattern.permute.xlu1 %v6247_v55  ;;  %2695 = vperm.xlu0 %5516, %v2039_v45  }
 0x2e7   :  { %2691 = vperm.xlu1 %5512, %v2036_v43  }
 0x2ea   :  { %5522 = vset.pattern.permute.xlu0 %v6246_v54 }
 0x2eb   :  { %5513 = vset.pattern.permute.xlu1 %v6245_v51 }
 0x2ec   :  { %2501 = vperm.xlu1 %5513, %v2039_v45  }
 0x2f0   :  { %5514 = vset.pattern.permute.xlu1 %v6246_v54 }
 0x2f1   :  { %2592 = vperm.xlu1 %5514, %v2039_v45  }
 0x2f5   :  { %5515 = vset.pattern.permute.xlu1 %v6248_v56 }
 0x2f6   :  { %2793 = vperm.xlu1 %5515, %v2036_v43  }
 0x2fa   :  { %2797 = vperm.xlu1 %5515, %v2039_v45  }
 0x2fe   :  { %5517 = vset.pattern.permute.xlu1 %v6241_v28 }
 0x34d   :  { %v2188_v0 = vpop.permute.xlu1 %2187  ;;  %v2094_v1 = vpop.permute.xlu0 %2093 }
 0x34e   :  { %v2198_v2 = vadd.f32 %v2197_v61, %v2188_v0  ;;  %v2105_v3 = vadd.f32 %v2104_v62, %v2094_v1 }
 0x350   :  { %v2202_v8 = vmul.f32 0.2, %v2198_v2  ;;  %v2109_v9 = vmul.f32 0.2, %v2105_v3  ;;  %vm2107_vm0 = vcmp.gt.f32.partialorder %v2105_v3, 0.0  ;;  %vm2200_vm1 = vcmp.gt.f32.partialorder %v2198_v2, 0.0 }
 0x351   :  { %v2099_v10 = vpop.permute.xlu0 %2098 }
 0x352   :  { %v2106_v11 = vadd.f32 %v2104_v62, %v2099_v10  ;;  %v2395_v12 = vpop.permute.xlu1 %2394  ;;  %v2111_v13 = vsel %vm2107_vm0, %v2105_v3, %v2109_v9  ;;  %v2204_v14 = vsel %vm2200_vm1, %v2198_v2, %v2202_v8  ;;  %v2598_v2 = vrot.slane %v6455_v48, %v2597_v46 }
 0x353   :  { %v2405_v15 = vadd.f32 %v2404_v4, %v2395_v12  ;;  %v6497_v17 = vadd.f32 %v2111_v13, %v6490_v6  ;;  %v6512_v22 = vadd.f32 %v2204_v14, %v6490_v6  ;;  %vm6252_vm1 = vmmov 0  }
 0x354   :  { %v2110_v18 = vmul.f32 0.2, %v2106_v11  ;;  %vm2108_vm3 = vcmp.gt.f32.partialorder %v2106_v11, 0.0  ;;  %5298 = vmatprep.mubr.msk.bf16.mxu1 %vm6252_vm1, %v6240_v27  ;;  %5310 = vmatprep.mubr.msk.bf16.mxu0 %vm6252_vm1, %v6240_v27 }
 0x355   :  { %v2116_v21 = vsel %vm2115_vm2, %v6497_v17, -inf  ;;  %v2409_v23 = vmul.f32 0.2, %v2405_v15  ;;  %vm2407_vm4 = vcmp.gt.f32.partialorder %v2405_v15, 0.0  ;;  %v2208_v37 = vsel %vm2115_vm2, %v6512_v22, -inf }
 0x356   :  { %v2292_v24 = vpop.permute.xlu0 %2291  ;;  %2117 = vmax.xlane.f32.xlu0 %v2116_v21  ;;  %v2112_v25 = vsel %vm2108_vm3, %v2106_v11, %v2110_v18  ;;  %v2700_v11 = vsub.s32 6, %v6470_v58  ;;  %vm2183_vm3 = vcmask 261120  }
 0x357   :  { %v2302_v26 = vadd.f32 %v2301_v16, %v2292_v24  ;;  %v2498_v30 = vpop.permute.xlu1 %2497  ;;  %v6515_v31 = vadd.f32 %v2112_v25, %v6507_v20  ;;  %v2411_v42 = vsel %vm2407_vm4, %v2405_v15, %v2409_v23  ;;  %vm2287_vm4 = vcmask 523520  }
 0x358   :  { %v2508_v32 = vadd.f32 %v6502_v19, %v2498_v30  ;;  %v6527_v57 = vadd.f32 %v2411_v42, %v6490_v6  ;;  %v2701_v24 = vrot.slane %v6455_v48, %v2700_v11 }
 0x359   :  { %v2306_v33 = vmul.f32 0.2, %v2302_v26  ;;  %v2119_v35 = vsel %vm2115_vm2, %v6515_v31, -inf  ;;  %vm2304_vm5 = vcmp.gt.f32.partialorder %v2302_v26, 0.0 }
 0x35a   :  { %2120 = vmax.xlane.f32.xlu1 %v2119_v35  ;;  %2209 = vmax.xlane.f32.xlu0 %v2208_v37  ;;  %v2512_v43 = vmul.f32 0.2, %v2508_v32  ;;  %vm2510_vm6 = vcmp.gt.f32.partialorder %v2508_v32, 0.0 }
 0x35b   :  { %v2399_v44 = vpop.permute.xlu0 %2398  ;;  %v2308_v45 = vsel %vm2304_vm5, %v2302_v26, %v2306_v33  ;;  %vm2390_vm5 = vcmask 785920  }
 0x35c   :  { %v2192_v50 = vpop.permute.xlu1 %2191  ;;  %v6524_v52 = vadd.f32 %v2308_v45, %v6490_v6  ;;  %v2406_v62 = vadd.f32 %v2404_v4, %v2399_v44  ;;  %v2514_v3 = vsel %vm2510_vm6, %v2508_v32, %v2512_v43  ;;  %vm2493_vm6 = vcmask 1048320  }
 0x35d   :  { %v2199_v53 = vadd.f32 %v2197_v61, %v2192_v50  ;;  %v2415_v61 = vsel %vm2115_vm2, %v6527_v57, -inf  ;;  %v6541_v15 = vadd.f32 %v2514_v3, %v6490_v6 }
 0x35e   :  { %v2312_v0 = vsel %vm2115_vm2, %v6524_v52, -inf  ;;  %v2410_v12 = vmul.f32 0.2, %v2406_v62  ;;  %vm2408_vm9 = vcmp.gt.f32.partialorder %v2406_v62, 0.0 }
 0x35f   :  { %v2203_v1 = vmul.f32 0.2, %v2199_v53  ;;  %2313 = vmax.xlane.f32.xlu1 %v2312_v0  ;;  %vm2201_vm7 = vcmp.gt.f32.partialorder %v2199_v53, 0.0  ;;  %v2518_v26 = vsel %vm2115_vm2, %v6541_v15, -inf }
 0x360   :  { %v2589_v8 = vpop.permute.xlu0 %2588  ;;  %v2412_v33 = vsel %vm2408_vm9, %v2406_v62, %v2410_v12  ;;  %v2802_v12 = vsub.s32 7, %v6470_v58 }
 0x361   :  { %v2599_v9 = vadd.f32 %v2598_v2, %v2589_v8  ;;  %v2296_v10 = vpop.permute.xlu1 %2295  ;;  %v2205_v4 = vsel %vm2201_vm7, %v2199_v53, %v2203_v1  ;;  %v6559_v44 = vadd.f32 %v2412_v33, %v6507_v20 }
 0x362   :  { %v2303_v13 = vadd.f32 %v2301_v16, %v2296_v10  ;;  %v6538_v14 = vadd.f32 %v2205_v4, %v6507_v20 }
 0x363   :  { %v2603_v18 = vmul.f32 0.2, %v2599_v9  ;;  %2416 = vmax.xlane.f32.xlu1 %v2415_v61  ;;  %vm2601_vm8 = vcmp.gt.f32.partialorder %v2599_v9, 0.0  ;;  %v2418_v8 = vsel %vm2115_vm2, %v6559_v44, -inf }
 0x364   :  { %v2307_v21 = vmul.f32 0.2, %v2303_v13  ;;  %v2211_v23 = vsel %vm2115_vm2, %v6538_v14, -inf  ;;  %vm2305_vm10 = vcmp.gt.f32.partialorder %v2303_v13, 0.0 }
 0x365   :  { %2212 = vmax.xlane.f32.xlu0 %v2211_v23  ;;  %v2605_v16 = vsel %vm2601_vm8, %v2599_v9, %v2603_v18  ;;  %v2696_v45 = vpop.permute.xlu0 %2695 }
 0x366   :  { %v2692_v25 = vpop.permute.xlu1 %2691  ;;  %v2309_v30 = vsel %vm2305_vm10, %v2303_v13, %v2307_v21  ;;  %v6551_v32 = vadd.f32 %v2605_v16, %v6490_v6  ;;  %v2703_v3 = vadd.f32 %v2701_v24, %v2696_v45 }
 0x367   :  { %v2702_v35 = vadd.f32 %v2701_v24, %v2692_v25  ;;  %2519 = vmax.xlane.f32.xlu1 %v2518_v26  ;;  %v6554_v37 = vadd.f32 %v2309_v30, %v6507_v20  ;;  %v2803_v24 = vrot.slane %v6455_v48, %v2802_v12 }
 0x368   :  { %v2609_v50 = vsel %vm2115_vm2, %v6551_v32, -inf  ;;  %v2707_v13 = vmul.f32 0.2, %v2703_v3  ;;  %vm2705_vm13 = vcmp.gt.f32.partialorder %v2703_v3, 0.0 }
 0x369   :  { %v2706_v42 = vmul.f32 0.2, %v2702_v35  ;;  %v2315_v43 = vsel %vm2115_vm2, %v6554_v37, -inf  ;;  %vm2704_vm11 = vcmp.gt.f32.partialorder %v2702_v35, 0.0 }
 0x36a   :  { %2316 = vmax.xlane.f32.xlu0 %v2315_v43  ;;  %v2709_v26 = vsel %vm2705_vm13, %v2703_v3, %v2707_v13 }
 0x36b   :  { %v2502_v53 = vpop.permute.xlu1 %2501  ;;  %2610 = vmax.xlane.f32.xlu1 %v2609_v50  ;;  %v2708_v62 = vsel %vm2704_vm11, %v2702_v35, %v2706_v42  ;;  %v6586_v42 = vadd.f32 %v2709_v26, %v6507_v20 }
 0x36c   :  { %v2509_v0 = vadd.f32 %v6502_v19, %v2502_v53  ;;  %v6565_v1 = vadd.f32 %v2708_v62, %v6490_v6 }
 0x36d   :  { %v2715_v62 = vsel %vm2115_vm2, %v6586_v42, -inf }
 0x36e   :  { %v2513_v9 = vmul.f32 0.2, %v2509_v0  ;;  %2419 = vmax.xlane.f32.xlu0 %v2418_v8  ;;  %v2712_v10 = vsel %vm2115_vm2, %v6565_v1, -inf  ;;  %vm2511_vm12 = vcmp.gt.f32.partialorder %v2509_v0, 0.0 }
 0x36f   :  { %2713 = vmax.xlane.f32.xlu1 %v2712_v10 }
 0x370   :  { %v2593_v61 = vpop.permute.xlu1 %2592  ;;  %v2515_v4 = vsel %vm2511_vm12, %v2509_v0, %v2513_v9 }
 0x371   :  { %v2600_v19 = vadd.f32 %v2598_v2, %v2593_v61  ;;  %v6573_v18 = vadd.f32 %v2515_v4, %v6507_v20 }
 0x373   :  { %v2604_v21 = vmul.f32 0.2, %v2600_v19  ;;  %v2521_v23 = vsel %vm2115_vm2, %v6573_v18, -inf  ;;  %vm2602_vm14 = vcmp.gt.f32.partialorder %v2600_v19, 0.0 }
 0x374   :  { %2522 = vmax.xlane.f32.xlu0 %v2521_v23 }
 0x375   :  { %v2794_v16 = vpop.permute.xlu1 %2793  ;;  %v2606_v25 = vsel %vm2602_vm14, %v2600_v19, %v2604_v21 }
 0x376   :  { %v2804_v30 = vadd.f32 %v2803_v24, %v2794_v16  ;;  %v6581_v2 = vadd.f32 %v2606_v25, %v6507_v20 }
 0x378   :  { %v2808_v33 = vmul.f32 0.2, %v2804_v30  ;;  %v2612_v35 = vsel %vm2115_vm2, %v6581_v2, -inf  ;;  %vm2806_vm15 = vcmp.gt.f32.partialorder %v2804_v30, 0.0 }
 0x379   :  { %v2798_v43 = vpop.permute.xlu1 %2797  ;;  %2613 = vmax.xlane.f32.xlu0 %v2612_v35 }
 0x37a   :  { %v2805_v45 = vadd.f32 %v2803_v24, %v2798_v43  ;;  %v2810_v50 = vsel %vm2806_vm15, %v2804_v30, %v2808_v33 }
 0x37b   :  { %v6589_v48 = vadd.f32 %v2810_v50, %v6490_v6 }
 0x37c   :  { %v2809_v53 = vmul.f32 0.2, %v2805_v45  ;;  %vm2807_vm0 = vcmp.gt.f32.partialorder %v2805_v45, 0.0 }
 0x37d   :  { %2716 = vmax.xlane.f32.xlu0 %v2715_v62  ;;  %v2814_v0 = vsel %vm2115_vm2, %v6589_v48, -inf }
 0x37e   :  { %2815 = vmax.xlane.f32.xlu1 %v2814_v0  ;;  %v2811_v3 = vsel %vm2807_vm0, %v2805_v45, %v2809_v53 }
 0x37f   :  { %v6596_v8 = vadd.f32 %v2811_v3, %v6507_v20 }
 0x381   :  { %v2817_v9 = vsel %vm2115_vm2, %v6596_v8, -inf }
 0x382   :  { %2818 = vmax.xlane.f32.xlu0 %v2817_v9 }
 0x38f   :  { %2232 = vrot.lane.b32.xlu1 %v6435_v34, %s6249_s2 }
 0x393   :  { %2438 = vrot.lane.b32.xlu1 %v6435_v34, %s6250_s25 }
 0x397   :  { %2633 = vrot.lane.b32.xlu1 %v6437_v36, %s6249_s2 }
 0x398   :  { %2335 = vrot.lane.b32.xlu0 %v6435_v34, %s6251_s27 }
 0x3e3   :  { %v2118_v6 = vpop.xlane.xlu0 %2117 }
 0x3e4   :  { %v2122_v20 = vsub.f32 %v6497_v17, %v2118_v6 }
 0x3e6   :  { %v2124_v10 = vmul.f32 1.442695, %v2122_v20 }
 0x3e7   :  { %v2121_v61 = vpop.xlane.xlu1 %2120  ;;  %v2210_v4 = vpop.xlane.xlu0 %2209 }
 0x3e8   :  { %6046 = vpow2.f32 %v2124_v10  ;;  %v2123_v13 = vsub.f32 %v6515_v31, %v2121_v61  ;;  %v2214_v19 = vsub.f32 %v6512_v22, %v2210_v4 }
 0x3ea   :  { %v2126_v21 = vmul.f32 1.442695, %v2123_v13  ;;  %v2216_v23 = vmul.f32 1.442695, %v2214_v19 }
 0x3ec   :  { %6048 = vpow2.f32 %v2126_v21  ;;  %v2314_v24 = vpop.xlane.xlu1 %2313 }
 0x3ed   :  { %6050 = vpow2.f32 %v2216_v23  ;;  %v2318_v16 = vsub.f32 %v6524_v52, %v2314_v24 }
 0x3ef   :  { %v2320_v25 = vmul.f32 1.442695, %v2318_v16 }
 0x3f0   :  { %v2417_v34 = vpop.xlane.xlu1 %2416 }
 0x3f1   :  { %6052 = vpow2.f32 %v2320_v25  ;;  %v2421_v17 = vsub.f32 %v6527_v57, %v2417_v34 }
 0x3f2   :  { %v6613_v26 = vpop.eup %6046  ;;  %v2213_v30 = vpop.xlane.xlu0 %2212 }
 0x3f3   :  { %v2423_v33 = vmul.f32 1.442695, %v2421_v17  ;;  %v2215_v31 = vsub.f32 %v6538_v14, %v2213_v30  ;;  %v2128_v22 = vsel %vm2115_vm2, %v6613_v26, 0.0 }
 0x3f4   :  { %v2520_v35 = vpop.xlane.xlu1 %2519  ;;  %2129 = vadd.xlane.f32.xlu1 %v2128_v22 }
 0x3f5   :  { %6054 = vpow2.f32 %v2423_v33  ;;  %v2218_v43 = vmul.f32 1.442695, %v2215_v31  ;;  %v2524_v52 = vsub.f32 %v6541_v15, %v2520_v35 }
 0x3f6   :  { %v6619_v45 = vpop.eup %6048 }
 0x3f7   :  { %v6621_v50 = vpop.eup %6050  ;;  %6056 = vpow2.f32 %v2218_v43  ;;  %v2526_v57 = vmul.f32 1.442695, %v2524_v52  ;;  %v2317_v53 = vpop.xlane.xlu0 %2316  ;;  %v2131_v62 = vsel %vm2115_vm2, %v6619_v45, 0.0 }
 0x3f8   :  { %v2319_v14 = vsub.f32 %v6554_v37, %v2317_v53  ;;  %v2611_v0 = vpop.xlane.xlu1 %2610  ;;  %2132 = vadd.xlane.f32.xlu0 %v2131_v62  ;;  %v2220_v3 = vsel %vm2115_vm2, %v6621_v50, 0.0 }
 0x3f9   :  { %6058 = vpow2.f32 %v2526_v57  ;;  %v2615_v15 = vsub.f32 %v6551_v32, %v2611_v0  ;;  %2221 = vadd.xlane.f32.xlu1 %v2220_v3 }
 0x3fa   :  { %v2322_v9 = vmul.f32 1.442695, %v2319_v14 }
 0x3fb   :  { %v6629_v6 = vpop.eup %6052  ;;  %v2617_v20 = vmul.f32 1.442695, %v2615_v15  ;;  %v2420_v10 = vpop.xlane.xlu0 %2419 }
 0x3fc   :  { %6060 = vpow2.f32 %v2322_v9  ;;  %v2422_v61 = vsub.f32 %v6559_v44, %v2420_v10  ;;  %v2714_v4 = vpop.xlane.xlu1 %2713  ;;  %v2324_v37 = vsel %vm2115_vm2, %v6629_v6, 0.0 }
 0x3fd   :  { %6062 = vpow2.f32 %v2617_v20  ;;  %v2718_v13 = vsub.f32 %v6565_v1, %v2714_v4  ;;  %2325 = vadd.xlane.f32.xlu1 %v2324_v37 }
 0x3fe   :  { %v2425_v19 = vmul.f32 1.442695, %v2422_v61 }
 0x3ff   :  { %v6635_v21 = vpop.eup %6054  ;;  %v2720_v32 = vmul.f32 1.442695, %v2718_v13 }
 0x400   :  { %6064 = vpow2.f32 %v2425_v19  ;;  %v2427_v23 = vsel %vm2115_vm2, %v6635_v21, 0.0 }
 0x401   :  { %v6639_v24 = vpop.eup %6056  ;;  %6066 = vpow2.f32 %v2720_v32  ;;  %2428 = vadd.xlane.f32.xlu1 %v2427_v23  ;;  %v2523_v44 = vpop.xlane.xlu0 %2522 }
 0x402   :  { %v2525_v16 = vsub.f32 %v6573_v18, %v2523_v44  ;;  %v2223_v25 = vsel %vm2115_vm2, %v6639_v24, 0.0 }
 0x403   :  { %v6644_v1 = vpop.eup %6058  ;;  %2224 = vadd.xlane.f32.xlu0 %v2223_v25 }
 0x404   :  { %v2528_v34 = vmul.f32 1.442695, %v2525_v16  ;;  %v2530_v17 = vsel %vm2115_vm2, %v6644_v1, 0.0 }
 0x405   :  { %2531 = vadd.xlane.f32.xlu1 %v2530_v17 }
 0x406   :  { %v6648_v30 = vpop.eup %6060  ;;  %6068 = vpow2.f32 %v2528_v34  ;;  %v2614_v33 = vpop.xlane.xlu0 %2613 }
 0x407   :  { %v6650_v31 = vpop.eup %6062  ;;  %v2616_v22 = vsub.f32 %v6581_v2, %v2614_v33  ;;  %v2327_v18 = vsel %vm2115_vm2, %v6648_v30, 0.0 }
 0x408   :  { %2328 = vadd.xlane.f32.xlu0 %v2327_v18  ;;  %v2621_v35 = vsel %vm2115_vm2, %v6650_v31, 0.0 }
 0x409   :  { %v2619_v43 = vmul.f32 1.442695, %v2616_v22  ;;  %2622 = vadd.xlane.f32.xlu1 %v2621_v35 }
 0x40a   :  { %v6657_v52 = vpop.eup %6064  ;;  %v2717_v57 = vpop.xlane.xlu0 %2716 }
 0x40b   :  { %v6659_v53 = vpop.eup %6066  ;;  %6070 = vpow2.f32 %v2619_v43  ;;  %v2719_v62 = vsub.f32 %v6586_v42, %v2717_v57  ;;  %v2816_v14 = vpop.xlane.xlu1 %2815  ;;  %v2430_v2 = vsel %vm2115_vm2, %v6657_v52, 0.0 }
 0x40c   :  { %v2820_v0 = vsub.f32 %v6589_v48, %v2816_v14  ;;  %2431 = vadd.xlane.f32.xlu0 %v2430_v2  ;;  %v2724_v3 = vsel %vm2115_vm2, %v6659_v53, 0.0 }
 0x40d   :  { %v2722_v15 = vmul.f32 1.442695, %v2719_v62  ;;  %2725 = vadd.xlane.f32.xlu1 %v2724_v3 }
 0x40e   :  { %v2822_v9 = vmul.f32 1.442695, %v2820_v0 }
 0x40f   :  { %6072 = vpow2.f32 %v2722_v15  ;;  %v2819_v20 = vpop.xlane.xlu0 %2818  ;;  %v2233_v25 = vpop.permute.xlu1 %2232 }
 0x410   :  { %v6667_v10 = vpop.eup %6068  ;;  %6074 = vpow2.f32 %v2822_v9  ;;  %v2821_v42 = vsub.f32 %v6596_v8, %v2819_v20 }
 0x411   :  { %v2533_v61 = vsel %vm2115_vm2, %v6667_v10, 0.0 }
 0x412   :  { %v2824_v4 = vmul.f32 1.442695, %v2821_v42  ;;  %2534 = vadd.xlane.f32.xlu0 %v2533_v61 }
 0x413   :  { %v2336_v48 = vpop.permute.xlu0 %2335  ;;  %v2439_v34 = vpop.permute.xlu1 %2438 }
 0x414   :  { %6076 = vpow2.f32 %v2824_v4  ;;  %5309 = vmatpush3.bf16.msra.mxu0 %v2336_v48 }
 0x415   :  { %v6672_v37 = vpop.eup %6070  ;;  %5320 = vmatprep.subr.bf16.mxu0 %v6240_v27 }
 0x416   :  { %v2624_v8 = vsel %vm2115_vm2, %v6672_v37, 0.0 }
 0x417   :  { %2625 = vadd.xlane.f32.xlu0 %v2624_v8  ;;  %v6697_v17 = vpop.permute.xlu1 %2633 }
 0x419   :  { %v6681_v13 = vpop.eup %6072 }
 0x41a   :  { %v6683_v19 = vpop.eup %6074  ;;  %v2727_v32 = vsel %vm2115_vm2, %v6681_v13, 0.0 }
 0x41b   :  { %2728 = vadd.xlane.f32.xlu0 %v2727_v32  ;;  %v2826_v23 = vsel %vm2115_vm2, %v6683_v19, 0.0 }
 0x41c   :  { %2827 = vadd.xlane.f32.xlu1 %v2826_v23 }
 0x41e   :  { %v6689_v44 = vpop.eup %6076 }
 0x41f   :  { %v2829_v16 = vsel %vm2115_vm2, %v6689_v44, 0.0 }
 0x420   :  { %2830 = vadd.xlane.f32.xlu0 %v2829_v16 }
 0x42d   :  { %2837 = vrot.lane.b32.xlu1 %v6437_v36, %s6250_s25 }
 0x436   :  { %2735 = vrot.lane.b32.xlu0 %v6437_v36, %s6251_s27 }
 0x481   :  { %v2130_v33 = vpop.xlane.xlu1 %2129 }
 0x482   :  { %6078 = vrcp.f32 %v2130_v33 }
 0x485   :  { %v2133_v22 = vpop.xlane.xlu0 %2132 }
 0x486   :  { %v2222_v18 = vpop.xlane.xlu1 %2221  ;;  %6080 = vrcp.f32 %v2133_v22 }
 0x487   :  { %6082 = vrcp.f32 %v2222_v18 }
 0x48a   :  { %v2326_v35 = vpop.xlane.xlu1 %2325 }
 0x48c   :  { %v6079_v43 = vpop.eup %6078 }
 0x48d   :  { %v2136_v14 = vmul.f32 %v6079_v43, %v6613_v26 }
 0x48e   :  { %v2429_v0 = vpop.xlane.xlu1 %2428 }
 0x490   :  { %v6081_v57 = vpop.eup %6080  ;;  %v2225_v62 = vpop.xlane.xlu0 %2224 }
 0x491   :  { %v2137_v2 = vmul.f32 %v6081_v57, %v6619_v45  ;;  %6084 = vrcp.f32 %v2225_v62  ;;  %v6083_v20 = vpop.eup %6082 }
 0x492   :  { %6086 = vrcp.f32 %v2326_v35  ;;  %v2532_v9 = vpop.xlane.xlu1 %2531  ;;  %v2228_v42 = vmul.f32 %v6083_v20, %v6621_v50 }
 0x493   :  { %v2138_v3 = vpack.c.bf16 %v2137_v2, %v2136_v14 }
 0x495   :  { %5299 = vmatmul.mubr.msk.bf16.vlgmr.msra.gmra.mrb[12].mxu1 %vm2115_vm2, %v2138_v3  ;;  %v2329_v15 = vpop.xlane.xlu0 %2328 }
 0x496   :  { %5303 = vmatpush3.bf16.msra.mxu1 %v2233_v25  ;;  %6088 = vrcp.f32 %v2329_v15  ;;  %5304 = vmatprep.mubr.msk.bf16.mxu1 %vm6252_vm1, %v6240_v27  ;;  %v2623_v48 = vpop.xlane.xlu1 %2622 }
 0x497   :  { %5314 = vmatprep.subr.bf16.mxu1 %v6240_v27  ;;  %6090 = vrcp.f32 %v2429_v0 }
 0x499   :  { %v2432_v26 = vpop.xlane.xlu0 %2431 }
 0x49a   :  { %6092 = vrcp.f32 %v2432_v26  ;;  %v2726_v22 = vpop.xlane.xlu1 %2725 }
 0x49b   :  { %v6085_v45 = vpop.eup %6084  ;;  %6094 = vrcp.f32 %v2532_v9 }
 0x49c   :  { %v2229_v61 = vmul.f32 %v6085_v45, %v6639_v24  ;;  %v6087_v4 = vpop.eup %6086 }
 0x49d   :  { %v2332_v16 = vmul.f32 %v6087_v4, %v6629_v6 }
 0x49e   :  { %v2230_v8 = vpack.c.bf16 %v2229_v61, %v2228_v42 }
 0x49f   :  { %v2535_v32 = vpop.xlane.xlu0 %2534 }
 0x4a0   :  { %v6089_v23 = vpop.eup %6088  ;;  %6096 = vrcp.f32 %v2535_v32  ;;  %5305 = vmatmul.mubr.msk.bf16.vlgmr.msra.gmra.mrb[16].mxu1 %vm2115_vm2, %v2230_v8 }
 0x4a1   :  { %v2333_v25 = vmul.f32 %v6089_v23, %v6648_v30  ;;  %5315 = vmatpush3.bf16.msra.mxu1 %v2439_v34  ;;  %5316 = vmatprep.mubr.msk.bf16.mxu1 %vm6252_vm1, %v6240_v27  ;;  %v6091_v50 = vpop.eup %6090  ;;  %6098 = vrcp.f32 %v2623_v48 }
 0x4a2   :  { %5326 = vmatprep.subr.bf16.mxu1 %v6240_v27  ;;  %v2435_v35 = vmul.f32 %v6091_v50, %v6635_v21 }
 0x4a3   :  { %v2334_v24 = vpack.c.bf16 %v2333_v25, %v2332_v16 }
 0x4a4   :  { %v6093_v33 = vpop.eup %6092  ;;  %v2626_v18 = vpop.xlane.xlu0 %2625 }
 0x4a5   :  { %v2436_v43 = vmul.f32 %v6093_v33, %v6657_v52  ;;  %6100 = vrcp.f32 %v2626_v18  ;;  %5311 = vmatmul.mubr.msk.bf16.vlgmr.msra.gmra.mrb[4].mxu0 %vm2115_vm2, %v2334_v24  ;;  %v6095_v30 = vpop.eup %6094 }
 0x4a6   :  { %5321 = vmatpush3.bf16.msra.mxu0 %v6437_v36  ;;  %5322 = vmatprep.mubr.msk.bf16.mxu0 %vm6252_vm1, %v6240_v27  ;;  %6102 = vrcp.f32 %v2726_v22  ;;  %v2538_v36 = vmul.f32 %v6095_v30, %v6644_v1 }
 0x4a7   :  { %v2437_v6 = vpack.c.bf16 %v2436_v43, %v2435_v35  ;;  %5332 = vmatprep.subr.bf16.mxu0 %v6240_v27 }
 0x4a8   :  { %v2729_v34 = vpop.xlane.xlu0 %2728 }
 0x4a9   :  { %6104 = vrcp.f32 %v2729_v34  ;;  %v2828_v57 = vpop.xlane.xlu1 %2827  ;;  %5317 = vmatmul.mubr.msk.bf16.vlgmr.msra.gmra.mrb[20].mxu1 %vm2115_vm2, %v2437_v6 }
 0x4aa   :  { %v6097_v21 = vpop.eup %6096  ;;  %5327 = vmatpush3.bf16.msra.mxu1 %v6697_v17  ;;  %5328 = vmatprep.mubr.msk.bf16.mxu1 %vm6252_vm1, %v6240_v27  ;;  %6106 = vrcp.f32 %v2828_v57 }
 0x4ab   :  { %v2539_v52 = vmul.f32 %v6097_v21, %v6667_v10  ;;  %5338 = vmatprep.subr.bf16.mxu1 %v6240_v27  ;;  %v6099_v62 = vpop.eup %6098 }
 0x4ac   :  { %v2629_v3 = vmul.f32 %v6099_v62, %v6650_v31 }
 0x4ad   :  { %v2831_v14 = vpop.xlane.xlu0 %2830  ;;  %v2540_v2 = vpack.c.bf16 %v2539_v52, %v2538_v36  ;;  %v2838_v45 = vpop.permute.xlu1 %2837 }
 0x4ae   :  { %6108 = vrcp.f32 %v2831_v14 }
 0x4af   :  { %v6101_v0 = vpop.eup %6100  ;;  %5323 = vmatmul.mubr.msk.bf16.vlgmr.msra.gmra.mrb[8].mxu0 %vm2115_vm2, %v2540_v2 }
 0x4b0   :  { %v2630_v17 = vmul.f32 %v6101_v0, %v6672_v37  ;;  %5334 = vmatprep.mubr.msk.bf16.mxu0 %vm6252_vm1, %v6240_v27  ;;  %v6103_v1 = vpop.eup %6102 }
 0x4b1   :  { %v2736_v15 = vpop.permute.xlu0 %2735  ;;  %v2732_v20 = vmul.f32 %v6103_v1, %v6659_v53 }
 0x4b2   :  { %5333 = vmatpush3.bf16.msra.mxu0 %v2736_v15  ;;  %v2631_v10 = vpack.c.bf16 %v2630_v17, %v2629_v3 }
 0x4b3   :  { %v6105_v9 = vpop.eup %6104 }
 0x4b4   :  { %v2733_v26 = vmul.f32 %v6105_v9, %v6681_v13  ;;  %5329 = vmatmul.mubr.msk.bf16.vlgmr.msra.gmra.mrb[24].mxu1 %vm2115_vm2, %v2631_v10  ;;  %v6107_v31 = vpop.eup %6106 }
 0x4b5   :  { %5339 = vmatpush3.bf16.msra.mxu1 %v2838_v45  ;;  %5340 = vmatprep.mubr.msk.bf16.mxu1 %vm6252_vm1, %v6240_v27  ;;  %v2834_v61 = vmul.f32 %v6107_v31, %v6683_v19 }
 0x4b6   :  { %v2734_v37 = vpack.c.bf16 %v2733_v26, %v2732_v20  ;;  %5344 = vmatprep.subr.bf16.mxu1 %v6240_v27 }
 0x4b8   :  { %v6109_v42 = vpop.eup %6108  ;;  %5335 = vmatmul.mubr.msk.bf16.vlgmr.msra.gmra.mrb[12].mxu0 %vm2115_vm2, %v2734_v37 }
 0x4b9   :  { %v2835_v53 = vmul.f32 %v6109_v42, %v6689_v44 }
 0x4bb   :  { %v2836_v4 = vpack.c.bf16 %v2835_v53, %v2834_v61 }
 0x4bd   :  { %5341 = vmatmul.mubr.msk.bf16.vlgmr.msra.gmra.mrb[28].mxu1 %vm2115_vm2, %v2836_v4 }
 0x4be   :  { %5346 = vmatprep.mubr.msk.bf16.mxu1 %vm6252_vm1, %v6240_v27 }
 0x568   :  { %v2176_v13 = vpop.f32.mrb[12].mxu1 }
 0x569   :  { %2184 = vst.msk [vmem:[#allocation2] sm:$0xff] %vm2183_vm3, %v2176_v13  ;;  %v5300_v48 = vpop.f32.mrb[13].mxu1 }
 0x56a   :  { %v2179_v8 = vpop.f32.mrb[14].mxu1 }
 0x56b   :  { %2185 = vst.msk [vmem:[#allocation2 + $0x10] sm:$0xff] %vm2183_vm3, %v2179_v8  ;;  %v5301_v32 = vpop.f32.mrb[15].mxu1 }
 0x56c   :  { %v2902_v32 = vld [vmem:[%s7410_s6] sm:$0x3] }
 0x573   :  { %v2272_v23 = vpop.f32.mrb[16].mxu1 }
 0x574   :  { %v5306_v16 = vpop.f32.mrb[17].mxu1 }
 0x575   :  { %v2275_v19 = vpop.f32.mrb[18].mxu1 }
 0x576   :  { %v5307_v25 = vpop.f32.mrb[19].mxu1 }
 0x577   :  { %v2911_v25 = vrot.slane %v2902_v32, %v6473_v59 }
 0x578   :  { %v2375_v44 = vpop.f32.mrb[4].mxu0 }
 0x579   :  { %2384 = vrot.lane.b32.xlu0 %v2375_v44, %s6251_s27  ;;  %v5312_v50 = vpop.f32.mrb[5].mxu0 }
 0x57a   :  { %v2378_v24 = vpop.f32.mrb[6].mxu0 }
 0x57b   :  { %2386 = vrot.lane.b32.xlu1 %v2378_v24, %s6251_s27  ;;  %v5313_v33 = vpop.f32.mrb[7].mxu0 }
 0x57c   :  { %v2478_v22 = vpop.f32.mrb[20].mxu1 }
 0x57d   :  { %2281 = vrot.lane.b32.xlu0 %v2272_v23, %s6250_s25  ;;  %v5318_v18 = vpop.f32.mrb[21].mxu1 }
 0x57e   :  { %v2481_v35 = vpop.f32.mrb[22].mxu1 }
 0x57f   :  { %2283 = vrot.lane.b32.xlu1 %v2275_v19, %s6250_s25  ;;  %v5319_v43 = vpop.f32.mrb[23].mxu1  ;;  %v2907_v19 = vrot.slane %v2902_v32, %v6476_v60 }
 0x582   :  { %v2578_v6 = vpop.f32.mrb[8].mxu0 }
 0x583   :  { %2585 = vst.msk [vmem:[#allocation2 + $0x8] sm:$0xff] %vm2183_vm3, %v2578_v6  ;;  %v5324_v30 = vpop.f32.mrb[9].mxu0 }
 0x584   :  { %v2581_v34 = vpop.f32.mrb[10].mxu0 }
 0x585   :  { %2586 = vst.msk [vmem:[#allocation2 + $0x18] sm:$0xff] %vm2183_vm3, %v2581_v34  ;;  %v5325_v57 = vpop.f32.mrb[11].mxu0 }
 0x586   :  { %v5929_v57 = vld [vmem:[%s7413_s9 + $0x24] ss:$8 sps:$4 sm:$0xff]  }
 0x587   :  { %v2673_v21 = vpop.f32.mrb[24].mxu1 }
 0x588   :  { %v5330_v36 = vpop.f32.mrb[25].mxu1 }
 0x589   :  { %v2676_v52 = vpop.f32.mrb[26].mxu1  ;;  %v5932_v36 = vld [vmem:[%s7413_s9 + $0x34] ss:$8 sps:$4 sm:$0xff]  }
 0x58a   :  { %v5331_v62 = vpop.f32.mrb[27].mxu1 }
 0x58b   :  { %v2775_v14 = vpop.f32.mrb[12].mxu0  ;;  %v5935_v62 = vld [vmem:[%s7413_s9 + $0x44] ss:$8 sps:$4 sm:$0xff]  }
 0x58c   :  { %2784 = vrot.lane.b32.xlu0 %v2775_v14, %s6251_s27  ;;  %v5336_v2 = vpop.f32.mrb[13].mxu0  ;;  %v5933_v14 = vld [vmem:[%s7413_s9 + $0x40] ss:$8 sps:$4 sm:$0xff]  }
 0x58d   :  { %v2778_v0 = vpop.f32.mrb[14].mxu0  ;;  %v5938_v2 = vld [vmem:[%s7413_s9 + $0x54] ss:$8 sps:$4 sm:$0xff]  }
 0x58e   :  { %2786 = vrot.lane.b32.xlu1 %v2778_v0, %s6251_s27  ;;  %v5337_v3 = vpop.f32.mrb[15].mxu0  ;;  %v5936_v0 = vld [vmem:[%s7413_s9 + $0x50] ss:$8 sps:$4 sm:$0xff]  }
 0x58f   :  { %v5941_v3 = vld [vmem:[%s7413_s9 + $0x64] ss:$8 sps:$4 sm:$0xff]  }
 0x590   :  { %v2877_v17 = vpop.f32.mrb[28].mxu1  ;;  %2487 = vrot.lane.b32.xlu0 %v2478_v22, %s6249_s2 }
 0x591   :  { %v5342_v1 = vpop.f32.mrb[29].mxu1 }
 0x592   :  { %v2880_v15 = vpop.f32.mrb[30].mxu1  ;;  %2489 = vrot.lane.b32.xlu1 %v2481_v35, %s6249_s2  ;;  %v5944_v1 = vld [vmem:[%s7413_s9 + $0x74] ss:$8 sps:$4 sm:$0xff]  }
 0x593   :  { %v5343_v10 = vpop.f32.mrb[31].mxu1 }
 0x594   :  { %2682 = vrot.lane.b32.xlu0 %v2673_v21, %s6250_s25  ;;  %v5927_v21 = vld [vmem:[%s7413_s9 + $0x20] ss:$8 sps:$4 sm:$0xff]   ;;  %v5947_v10 = vld [vmem:[%s7413_s9 + $0x84] ss:$8 sps:$4 sm:$0xff]  }
 0x596   :  { %2684 = vrot.lane.b32.xlu1 %v2676_v52, %s6250_s25  ;;  %v5930_v52 = vld [vmem:[%s7413_s9 + $0x30] ss:$8 sps:$4 sm:$0xff]   ;;  %s7441_s25 = sld [smem:[#allocation10_spill]] }
 0x598   :  { %2886 = vrot.lane.b32.xlu0 %v2877_v17, %s6249_s2  ;;  %v5939_v17 = vld [vmem:[%s7413_s9 + $0x60] ss:$8 sps:$4 sm:$0xff]  }
 0x59a   :  { %2888 = vrot.lane.b32.xlu1 %v2880_v15, %s6249_s2  ;;  %v5942_v15 = vld [vmem:[%s7413_s9 + $0x70] ss:$8 sps:$4 sm:$0xff]  }
 0x5eb   :  { %v2385_v9 = vpop.permute.xlu0 %2384 }
 0x5ed   :  { %v2387_v20 = vpop.permute.xlu1 %2386 }
 0x5ef   :  { %v2282_v26 = vpop.permute.xlu0 %2281 }
 0x5f0   :  { %2288 = vst.msk [vmem:[#allocation2] sm:$0xff] %vm2287_vm4, %v2282_v26 }
 0x5f1   :  { %v2284_v45 = vpop.permute.xlu1 %2283  ;;  %2391 = vst.msk [vmem:[#allocation2] sm:$0xff] %vm2390_vm5, %v2385_v9  ;;  %v5945_v9 = vld [vmem:[%s7413_s9 + $0x80] ss:$8 sps:$4 sm:$0xff]  }
 0x5f2   :  { %2289 = vst.msk [vmem:[#allocation2 + $0x10] sm:$0xff] %vm2287_vm4, %v2284_v45 }
 0x5f3   :  { %2392 = vst.msk [vmem:[#allocation2 + $0x10] sm:$0xff] %vm2390_vm5, %v2387_v20 }
 0x5fe   :  { %v2785_v31 = vpop.permute.xlu0 %2784 }
 0x600   :  { %v2787_v37 = vpop.permute.xlu1 %2786 }
 0x602   :  { %v2488_v42 = vpop.permute.xlu0 %2487 }
 0x603   :  { %2494 = vst.msk [vmem:[#allocation2] sm:$0xff] %vm2493_vm6, %v2488_v42 }
 0x604   :  { %v2490_v61 = vpop.permute.xlu1 %2489 }
 0x605   :  { %2495 = vst.msk [vmem:[#allocation2 + $0x10] sm:$0xff] %vm2493_vm6, %v2490_v61 }
 0x606   :  { %v2683_v53 = vpop.permute.xlu0 %2682 }
 0x607   :  { %2688 = vst.msk [vmem:[#allocation2 + $0x8] sm:$0xff] %vm2287_vm4, %v2683_v53 }
 0x608   :  { %2790 = vst.msk [vmem:[#allocation2 + $0x8] sm:$0xff] %vm2390_vm5, %v2785_v31  ;;  %v2685_v4 = vpop.permute.xlu1 %2684 }
 0x609   :  { %2689 = vst.msk [vmem:[#allocation2 + $0x18] sm:$0xff] %vm2287_vm4, %v2685_v4 }
 0x60a   :  { %2791 = vst.msk [vmem:[#allocation2 + $0x18] sm:$0xff] %vm2390_vm5, %v2787_v37  ;;  %v2887_v13 = vpop.permute.xlu0 %2886  ;;  %v2894_v8 = vld [vmem:[#allocation2] sm:$0xff] }
 0x60b   :  { %2892 = vst.msk [vmem:[#allocation2 + $0x8] sm:$0xff] %vm2493_vm6, %v2887_v13  ;;  %v2898_v16 = vadd.f32 %v2894_v8, %v6439_v38  ;;  %v5921_v38 = vld [vmem:[%s7413_s9] ss:$8 sps:$4 sm:$0xff]  }
 0x60c   :  { %v2889_v48 = vpop.permute.xlu1 %2888  ;;  %v2896_v23 = vld [vmem:[#allocation2 + $0x10] sm:$0xff] }
 0x60d   :  { %2893 = vst.msk [vmem:[#allocation2 + $0x18] sm:$0xff] %vm2493_vm6, %v2889_v48  ;;  %v2900_v24 = vadd.f32 %v2896_v23, %v6446_v40  ;;  %v2914_v22 = vadd.f32 %v2907_v19, %v2898_v16  ;;  %v5926_v40 = vld [vmem:[%s7413_s9 + $0x14] ss:$8 sps:$4 sm:$0xff]  }
 0x60e   :  { %v5950_v16 = vld [vmem:[%s7413_s9 + $0x94] ss:$8 sps:$4 sm:$0xff]  }
 0x60f   :  { %v2916_v6 = vadd.f32 %v2907_v19, %v2900_v24  ;;  %v5948_v19 = vld [vmem:[%s7413_s9 + $0x90] ss:$8 sps:$4 sm:$0xff]  }
 0x610   :  { %v5954_v24 = vld [vmem:[%s7413_s9 + $0xb0] ss:$8 sps:$4 sm:$0xff]  }
 0x612   :  { %v2895_v44 = vld [vmem:[#allocation2 + $0x8] sm:$0xff] }
 0x613   :  { %v2899_v50 = vadd.f32 %v2895_v44, %v6443_v39  ;;  %v5923_v39 = vld [vmem:[%s7413_s9 + $0x4] ss:$8 sps:$4 sm:$0xff]   ;;  %v5951_v44 = vld [vmem:[%s7413_s9 + $0xa0] ss:$8 sps:$4 sm:$0xff]  }
 0x614   :  { %v2897_v33 = vld [vmem:[#allocation2 + $0x18] sm:$0xff]  ;;  %3181 = vmatprep.subr.bf16.mxu0 %v5923_v39 }
 0x615   :  { %v2915_v18 = vadd.f32 %v2911_v25, %v2899_v50  ;;  %v2901_v35 = vadd.f32 %v2897_v33, %v6449_v41  ;;  %3182 = vmatpush1.bf16.msra.mxu0 %v5921_v38  ;;  %v5924_v41 = vld [vmem:[%s7413_s9 + $0x10] ss:$8 sps:$4 sm:$0xff]   ;;  %v5956_v50 = vld [vmem:[%s7413_s9 + $0xb4] ss:$8 sps:$4 sm:$0xff]   ;;  %v5959_v33 = vld [vmem:[%s7413_s9 + $0xc4] ss:$8 sps:$4 sm:$0xff]  }
 0x616   :  { %3183 = vmatprep.subr.bf16.mxu0 %v5926_v40 }
 0x617   :  { %v2918_v43 = vadd.f32 %v2915_v18, %v2914_v22  ;;  %v2917_v30 = vadd.f32 %v2911_v25, %v2901_v35  ;;  %v5953_v25 = vld [vmem:[%s7413_s9 + $0xa4] ss:$8 sps:$4 sm:$0xff]   ;;  %v5960_v35 = vld [vmem:[%s7413_s9 + $0xd0] ss:$8 sps:$4 sm:$0xff]  }
 0x619   :  { %2919 = vadd.xlane.f32.xlu0 %v2918_v43  ;;  %v2921_v34 = vadd.f32 %v2917_v30, %v2916_v6  ;;  %3184 = vmatpush1.bf16.msra.mxu0 %v5924_v41  ;;  %v5965_v43 = vld [vmem:[%s7413_s9 + $0xe4] ss:$8 sps:$4 sm:$0xff]  }
 0x61a   :  { %3185 = vmatprep.subr.bf16.mxu0 %v5929_v57 }
 0x61b   :  { %2922 = vadd.xlane.f32.xlu1 %v2921_v34  ;;  %v5966_v34 = vld [vmem:[%s7413_s9 + $0xf0] ss:$8 sps:$4 sm:$0xff]  }
 0x61d   :  { %3186 = vmatpush1.bf16.msra.mxu0 %v5927_v21 }
 0x61e   :  { %3187 = vmatprep.subr.bf16.mxu0 %v5932_v36  ;;  %v2951_v36 = vld [vmem:[%s7411_s7] sm:$0x3] }
 0x621   :  { %3188 = vmatpush1.bf16.msra.mxu0 %v5930_v52  ;;  %v2956_v52 = vrot.slane %v2951_v36, %v6476_v60 }
 0x622   :  { %3189 = vmatprep.subr.bf16.mxu0 %v5935_v62  ;;  %v2960_v62 = vrot.slane %v2951_v36, %v6473_v59 }
 0x625   :  { %3190 = vmatpush1.bf16.msra.mxu0 %v5933_v14 }
 0x626   :  { %3191 = vmatprep.subr.bf16.mxu0 %v5938_v2  ;;  %v2967_v2 = vld [vmem:[%s7412_s8] sm:$0x3] }
 0x629   :  { %3192 = vmatpush1.bf16.msra.mxu0 %v5936_v0 }
 0x62a   :  { %3193 = vmatprep.subr.bf16.mxu0 %v5941_v3 }
 0x62d   :  { %3194 = vmatpush1.bf16.msra.mxu0 %v5939_v17 }
 0x62e   :  { %3195 = vmatprep.subr.bf16.mxu0 %v5944_v1  ;;  %v2972_v1 = vrot.slane %v2967_v2, %v6476_v60 }
 0x631   :  { %3196 = vmatpush1.bf16.msra.mxu0 %v5942_v15  ;;  %v2976_v15 = vrot.slane %v2967_v2, %v6473_v59 }
 0x632   :  { %3197 = vmatprep.subr.bf16.mxu0 %v5947_v10 }
 0x635   :  { %3198 = vmatpush1.bf16.msra.mxu0 %v5945_v9 }
 0x636   :  { %3199 = vmatprep.subr.bf16.mxu0 %v5950_v16 }
 0x639   :  { %3200 = vmatpush1.bf16.msra.mxu0 %v5948_v19 }
 0x63a   :  { %3201 = vmatprep.subr.bf16.mxu0 %v5953_v25 }
 0x63d   :  { %3202 = vmatpush1.bf16.msra.mxu0 %v5951_v44 }
 0x63e   :  { %3203 = vmatprep.subr.bf16.mxu0 %v5956_v50 }
 0x641   :  { %3204 = vmatpush1.bf16.msra.mxu0 %v5954_v24  ;;  %v5969_v24 = vld [vmem:[%s7441_s25] sm:$0xff]  }
 0x642   :  { %3205 = vmatprep.subr.bf16.mxu0 %v5959_v33 }
 0x6a6   :  { %v2920_v20 = vpop.xlane.xlu0 %2919 }
 0x6a7   :  { %v2925_v26 = vmul.f32 0.00390625, %v2920_v20 }
 0x6a8   :  { %v2923_v45 = vpop.xlane.xlu1 %2922 }
 0x6a9   :  { %v2927_v31 = vsub.f32 %v2914_v22, %v2925_v26  ;;  %v2928_v37 = vsub.f32 %v2915_v18, %v2925_v26  ;;  %v2926_v42 = vmul.f32 0.00390625, %v2923_v45  ;;  %v5957_v22 = vld [vmem:[%s7413_s9 + $0xc0] ss:$8 sps:$4 sm:$0xff]   ;;  %v5962_v18 = vld [vmem:[%s7413_s9 + $0xd4] ss:$8 sps:$4 sm:$0xff]  }
 0x6aa   :  { %3206 = vmatpush1.bf16.msra.mxu0 %v5957_v22  ;;  %v5178_v22 = vld [vmem:[%s7414_s10] ss:$0 sm:$0xff] }
 0x6ab   :  { %v2929_v61 = vsub.f32 %v2916_v6, %v2926_v42  ;;  %v2930_v53 = vsub.f32 %v2917_v30, %v2926_v42  ;;  %v2931_v4 = vmul.f32 %v2927_v31, %v2927_v31  ;;  %v2932_v13 = vmul.f32 %v2928_v37, %v2928_v37  ;;  %3207 = vmatprep.subr.bf16.mxu0 %v5962_v18  ;;  %v5963_v6 = vld [vmem:[%s7413_s9 + $0xe0] ss:$8 sps:$4 sm:$0xff]   ;;  %v5968_v30 = vld [vmem:[%s7413_s9 + $0xf4] ss:$8 sps:$4 sm:$0xff]  }
 0x6ad   :  { %v2935_v48 = vadd.f32 %v2932_v13, %v2931_v4  ;;  %v2933_v8 = vmul.f32 %v2929_v61, %v2929_v61  ;;  %v2934_v32 = vmul.f32 %v2930_v53, %v2930_v53 }
 0x6ae   :  { %3208 = vmatpush1.bf16.msra.mxu0 %v5960_v35 }
 0x6af   :  { %2936 = vadd.xlane.f32.xlu0 %v2935_v48  ;;  %v2938_v23 = vadd.f32 %v2934_v32, %v2933_v8  ;;  %3209 = vmatprep.subr.bf16.mxu0 %v5965_v43 }
 0x6b2   :  { %3210 = vmatpush1.bf16.msra.mxu0 %v5963_v6 }
 0x6b3   :  { %2939 = vadd.xlane.f32.xlu0 %v2938_v23  ;;  %3211 = vmatprep.subr.bf16.mxu0 %v5968_v30 }
 0x6b6   :  { %3212 = vmatpush1.bf16.msra.mxu0 %v5966_v34 }
 0x6b7   :  { %5350 = vmatprep.subr.bf16.mxu0 %v6240_v27 }
 0x73c   :  { %v2937_v38 = vpop.xlane.xlu0 %2936 }
 0x73d   :  { %v2941_v39 = vmul.f32 0.00390625, %v2937_v38 }
 0x73f   :  { %v2943_v40 = vadd.f32 1e-05, %v2941_v39  ;;  %v5970_v39 = vld [vmem:[%s7417_s13] ss:$20 sps:$4 sm:$0xff]  }
 0x740   :  { %v2940_v41 = vpop.xlane.xlu0 %2939 }
 0x741   :  { %6110 = vrsqrt.f32 %v2943_v40  ;;  %v2942_v57 = vmul.f32 0.00390625, %v2940_v41  ;;  %v5972_v40 = vld [vmem:[%s7417_s13 + $0x4] ss:$20 sps:$4 sm:$0xff]  }
 0x742   :  { %v5973_v41 = vld [vmem:[%s7417_s13 + $0x10] ss:$20 sps:$4 sm:$0xff]  }
 0x743   :  { %v2944_v21 = vadd.f32 1e-05, %v2942_v57  ;;  %v5976_v57 = vld [vmem:[%s7417_s13 + $0x2c] ss:$20 sps:$4 sm:$0xff]  }
 0x745   :  { %6112 = vrsqrt.f32 %v2944_v21  ;;  %v5974_v21 = vld [vmem:[%s7417_s13 + $0x28] ss:$20 sps:$4 sm:$0xff]  }
 0x74b   :  { %v6111_v14 = vpop.eup %6110 }
 0x74c   :  { %v2947_v0 = vmul.f32 %v6111_v14, %v2927_v31  ;;  %v2948_v3 = vmul.f32 %v6111_v14, %v2928_v37 }
 0x74e   :  { %v2964_v17 = vmul.f32 %v2960_v62, %v2948_v3  ;;  %v2963_v10 = vmul.f32 %v2956_v52, %v2947_v0 }
 0x74f   :  { %v6113_v9 = vpop.eup %6112 }
 0x750   :  { %v2949_v20 = vmul.f32 %v6113_v9, %v2929_v61  ;;  %v2950_v26 = vmul.f32 %v6113_v9, %v2930_v53  ;;  %v2980_v42 = vadd.f32 %v2976_v15, %v2964_v17  ;;  %v2979_v13 = vadd.f32 %v2972_v1, %v2963_v10  ;;  %v5978_v10 = vld [vmem:[%s7417_s13 + $0x50] ss:$20 sps:$4 sm:$0xff]   ;;  %v5981_v9 = vld [vmem:[%s7417_s13 + $0x60] ss:$20 sps:$4 sm:$0xff]  }
 0x752   :  { %v2966_v45 = vmul.f32 %v2960_v62, %v2950_v26  ;;  %v2965_v4 = vmul.f32 %v2956_v52, %v2949_v20  ;;  %v2984_v32 = vmax.f32 %v2980_v42, 0.0  ;;  %v2983_v16 = vmax.f32 %v2979_v13, 0.0  ;;  %v5984_v20 = vld [vmem:[%s7417_s13 + $0x7c] ss:$20 sps:$4 sm:$0xff]   ;;  %v5982_v26 = vld [vmem:[%s7417_s13 + $0x78] ss:$20 sps:$4 sm:$0xff]  }
 0x753   :  { %v5988_v42 = vld [vmem:[%s7417_s13 + $0xa4] ss:$20 sps:$4 sm:$0xff]  }
 0x754   :  { %v2982_v48 = vadd.f32 %v2976_v15, %v2966_v45  ;;  %v2981_v8 = vadd.f32 %v2972_v1, %v2965_v4  ;;  %v5977_v1 = vld [vmem:[%s7417_s13 + $0x38] ss:$20 sps:$4 sm:$0xff]   ;;  %v5980_v15 = vld [vmem:[%s7417_s13 + $0x54] ss:$20 sps:$4 sm:$0xff]   ;;  %v5989_v13 = vld [vmem:[%s7417_s13 + $0xb0] ss:$20 sps:$4 sm:$0xff]  }
 0x755   :  { %v5985_v45 = vld [vmem:[%s7417_s13 + $0x88] ss:$20 sps:$4 sm:$0xff]   ;;  %v5986_v4 = vld [vmem:[%s7417_s13 + $0xa0] ss:$20 sps:$4 sm:$0xff]  }
 0x756   :  { %v2986_v23 = vmax.f32 %v2982_v48, 0.0  ;;  %v2985_v31 = vmax.f32 %v2981_v8, 0.0  ;;  %v5992_v48 = vld [vmem:[%s7417_s13 + $0xcc] ss:$20 sps:$4 sm:$0xff]   ;;  %v5990_v8 = vld [vmem:[%s7417_s13 + $0xc8] ss:$20 sps:$4 sm:$0xff]  }
 0x758   :  { %v2988_v37 = vpack.c.bf16 %v2986_v23, %v2984_v32  ;;  %v2987_v19 = vpack.c.bf16 %v2985_v31, %v2983_v16  ;;  %v5993_v32 = vld [vmem:[%s7417_s13 + $0xd8] ss:$20 sps:$4 sm:$0xff]   ;;  %v5994_v23 = vld [vmem:[%s7417_s13 + $0xf0] ss:$20 sps:$4 sm:$0xff]   ;;  %v5996_v16 = vld [vmem:[%s7417_s13 + $0xf4] ss:$20 sps:$4 sm:$0xff]  }
 0x759   :  { %v5997_v31 = vld [vmem:[%s7417_s13 + $0x100] ss:$20 sps:$4 sm:$0xff]  }
 0x75a   :  { %3213 = vmatprep.mubr.bf16.mxu0 %v2988_v37  ;;  %v6000_v37 = vld [vmem:[%s7417_s13 + $0x11c] ss:$20 sps:$4 sm:$0xff]  }
 0x75b   :  { %3214 = vmatmul.mubr.bf16.vlgmr.msra.gmra.mrb[16].mxu0 %v2987_v19  ;;  %v5998_v19 = vld [vmem:[%s7417_s13 + $0x118] ss:$20 sps:$4 sm:$0xff]  }
 0x75c   :  { %5366 = vmatprep.mubr.msk.bf16.mxu0 %vm6252_vm1, %v6240_v27  ;;  %5351 = vmatpush3.bf16.msra.mxu0 %v5973_v41 }
 0x75d   :  { %5352 = vmatprep.subr.bf16.mxu0 %v6240_v27 }
 0x760   :  { %5353 = vmatpush3.bf16.msra.mxu0 %v5977_v1  ;;  %v6016_v1 = vld [vmem:[%s7417_s13 + $0xac] ss:$20 sps:$4 sm:$0xff]  }
 0x761   :  { %5354 = vmatprep.subr.bf16.mxu0 %v6240_v27 }
 0x764   :  { %5355 = vmatpush3.bf16.msra.mxu0 %v5981_v9  ;;  %v6017_v9 = vld [vmem:[%s7417_s13 + $0xd0] ss:$20 sps:$4 sm:$0xff]  }
 0x765   :  { %5356 = vmatprep.subr.bf16.mxu0 %v6240_v27 }
 0x768   :  { %5357 = vmatpush3.bf16.msra.mxu0 %v5985_v45  ;;  %v6025_v45 = vld [vmem:[%s7417_s13 + $0x124] ss:$20 sps:$4 sm:$0xff]  }
 0x769   :  { %5358 = vmatprep.subr.bf16.mxu0 %v6240_v27 }
 0x76c   :  { %5359 = vmatpush3.bf16.msra.mxu0 %v5989_v13 }
 0x76d   :  { %5360 = vmatprep.subr.bf16.mxu0 %v6240_v27 }
 0x770   :  { %5361 = vmatpush3.bf16.msra.mxu0 %v5993_v32 }
 0x771   :  { %5362 = vmatprep.subr.bf16.mxu0 %v6240_v27 }
 0x774   :  { %5363 = vmatpush3.bf16.msra.mxu0 %v5997_v31 }
 0x775   :  { %5364 = vmatprep.subr.bf16.mxu0 %v6240_v27 }
 0x82e   :  { %v3215_v25 = vpop.f32.mrb[16].mxu0 }
 0x82f   :  { %v3217_v61 = vpop.f32.mrb[17].mxu0 }
 0x830   :  { %v3219_v53 = vpop.f32.mrb[18].mxu0 }
 0x831   :  { %v3224_v44 = vpack.c.bf16 %v3219_v53, %v3215_v25  ;;  %v3221_v50 = vpop.f32.mrb[19].mxu0  ;;  %v6001_v25 = vld [vmem:[%s7417_s13 + $0x128] ss:$20 sps:$4 sm:$0xff]  }
 0x832   :  { %5365 = vmatpush3.bf16.msra.mxu0 %v6001_v25 }
 0x833   :  { %5345 = vmatpush3.bf16.msra.mxu1 %v3224_v44  ;;  %5370 = vmatprep.subr.bf16.mxu0 %v6240_v27 }
 0x834   :  { %3583 = vmatprep.subr.bf16.mxu1 %v5972_v40 }
 0x836   :  { %5347 = vmatmul.mubr.msk.bf16.vlgmr.msra.gmra.mrb[32].mxu1 %vm2115_vm2, %v5969_v24 }
 0x837   :  { %3615 = vmatprep.mubr.bf16.mxu1 %v6242_v29  ;;  %3584 = vmatpush1.bf16.msra.mxu1 %v5970_v39 }
 0x838   :  { %3585 = vmatprep.subr.bf16.mxu1 %v5976_v57 }
 0x83b   :  { %3586 = vmatpush1.bf16.msra.mxu1 %v5974_v21 }
 0x83c   :  { %3587 = vmatprep.subr.bf16.mxu1 %v5980_v15  ;;  %v6014_v15 = vld [vmem:[%s7417_s13 + $0xa8] ss:$20 sps:$4 sm:$0xff]  }
 0x83f   :  { %3588 = vmatpush1.bf16.msra.mxu1 %v5978_v10  ;;  %v6019_v10 = vld [vmem:[%s7417_s13 + $0xd4] ss:$20 sps:$4 sm:$0xff]  }
 0x840   :  { %3589 = vmatprep.subr.bf16.mxu1 %v5984_v20  ;;  %v6022_v20 = vld [vmem:[%s7417_s13 + $0xfc] ss:$20 sps:$4 sm:$0xff]  }
 0x843   :  { %3590 = vmatpush1.bf16.msra.mxu1 %v5982_v26  ;;  %v6020_v26 = vld [vmem:[%s7417_s13 + $0xf8] ss:$20 sps:$4 sm:$0xff]  }
 0x844   :  { %3591 = vmatprep.subr.bf16.mxu1 %v5988_v42  ;;  %v3714_v42 = vld [vmem:[%s7419_s15] sm:$0xff] }
 0x845   :  { %v5222_v13 = vcombine.high %v3714_v42, %v3714_v42 }
 0x847   :  { %3592 = vmatpush1.bf16.msra.mxu1 %v5986_v4  ;;  %v6023_v4 = vld [vmem:[%s7417_s13 + $0x120] ss:$20 sps:$4 sm:$0xff]  }
 0x848   :  { %3593 = vmatprep.subr.bf16.mxu1 %v5992_v48  ;;  %v5221_v48 = vcombine.low %v3714_v42, %v3714_v42 }
 0x84b   :  { %3594 = vmatpush1.bf16.msra.mxu1 %v5990_v8  ;;  %v3715_v8 = vld [vmem:[%s7419_s15 + $0x8] sm:$0xff] }
 0x84c   :  { %3595 = vmatprep.subr.bf16.mxu1 %v5996_v16  ;;  %v5224_v32 = vcombine.high %v3715_v8, %v3715_v8 }
 0x84f   :  { %3596 = vmatpush1.bf16.msra.mxu1 %v5994_v23 }
 0x850   :  { %3597 = vmatprep.subr.bf16.mxu1 %v6000_v37 }
 0x853   :  { %3598 = vmatpush1.bf16.msra.mxu1 %v5998_v19 }
 0x909   :  { %v3267_v33 = vpop.f32.mrb[32].mxu1 }
 0x90a   :  { %v3268_v18 = vadd.f32 %v3267_v33, %v3217_v61  ;;  %v5348_v35 = vpop.f32.mrb[33].mxu1  ;;  %v6004_v61 = vld [vmem:[%s7417_s13 + $0xc] ss:$20 sps:$4 sm:$0xff]  }
 0x90b   :  { %v3270_v43 = vpop.f32.mrb[34].mxu1  ;;  %3626 = vmatprep.subr.bf16.mxu1 %v6004_v61  ;;  %v5179_v35 = vld [vmem:[%s7415_s11] ss:$0 sm:$0xff] }
 0x90c   :  { %v3271_v6 = vadd.f32 %v3270_v43, %v3221_v50  ;;  %v5349_v30 = vpop.f32.mrb[35].mxu1  ;;  %v3281_v34 = vadd.f32 %v5178_v22, %v3268_v18 }
 0x90d   :  { %v5180_v30 = vld [vmem:[%s7416_s12] ss:$0 sm:$0xff] }
 0x90e   :  { %3283 = vadd.xlane.f32.xlu1 %v3281_v34  ;;  %v3282_v38 = vadd.f32 %v5178_v22, %v3271_v6 }
 0x910   :  { %3285 = vadd.xlane.f32.xlu0 %v3282_v38 }
 0x99b   :  { %v3284_v36 = vpop.xlane.xlu1 %3283 }
 0x99c   :  { %v3288_v52 = vmul.f32 0.0078125, %v3284_v36  ;;  %v6002_v36 = vld [vmem:[%s7417_s13 + $0x8] ss:$20 sps:$4 sm:$0xff]  }
 0x99d   :  { %v3286_v62 = vpop.xlane.xlu0 %3285 }
 0x99e   :  { %v6910_v14 = vsub.f32 %v3281_v34, %v3288_v52  ;;  %v3289_v2 = vmul.f32 0.0078125, %v3286_v62  ;;  %v6007_v62 = vld [vmem:[%s7417_s13 + $0x34] ss:$20 sps:$4 sm:$0xff]  }
 0x9a0   :  { %v6912_v0 = vsub.f32 %v3282_v38, %v3289_v2  ;;  %v3292_v3 = vmul.f32 %v6910_v14, %v6910_v14  ;;  %v6010_v2 = vld [vmem:[%s7417_s13 + $0x5c] ss:$20 sps:$4 sm:$0xff]  }
 0x9a2   :  { %3294 = vadd.xlane.f32.xlu1 %v3292_v3  ;;  %v3293_v17 = vmul.f32 %v6912_v0, %v6912_v0  ;;  %v6013_v3 = vld [vmem:[%s7417_s13 + $0x84] ss:$20 sps:$4 sm:$0xff]  }
 0x9a4   :  { %3296 = vadd.xlane.f32.xlu0 %v3293_v17  ;;  %v6011_v17 = vld [vmem:[%s7417_s13 + $0x80] ss:$20 sps:$4 sm:$0xff]  }
 0xa2f   :  { %v3295_v53 = vpop.xlane.xlu1 %3294 }
 0xa30   :  { %v3298_v44 = vmul.f32 0.0078125, %v3295_v53 }
 0xa31   :  { %v3297_v50 = vpop.xlane.xlu0 %3296 }
 0xa32   :  { %v3300_v24 = vadd.f32 1e-05, %v3298_v44  ;;  %v3299_v33 = vmul.f32 0.0078125, %v3297_v50 }
 0xa34   :  { %6114 = vrsqrt.f32 %v3300_v24  ;;  %v3301_v22 = vadd.f32 1e-05, %v3299_v33  ;;  %v5223_v24 = vcombine.low %v3715_v8, %v3715_v8 }
 0xa36   :  { %6116 = vrsqrt.f32 %v3301_v22 }
 0xa3e   :  { %v6115_v18 = vpop.eup %6114 }
 0xa3f   :  { %v3304_v43 = vmul.f32 %v6115_v18, %v6910_v14  ;;  %v6005_v14 = vld [vmem:[%s7417_s13 + $0x30] ss:$20 sps:$4 sm:$0xff]  }
 0xa40   :  { %v6117_v6 = vpop.eup %6116  ;;  %v3812_v18 = vld [vmem:[%s7418_s14] sm:$0xff] }
 0xa41   :  { %v3305_v34 = vmul.f32 %v6117_v6, %v6912_v0  ;;  %v3313_v38 = vmul.f32 %v5179_v35, %v3304_v43  ;;  %v6008_v0 = vld [vmem:[%s7417_s13 + $0x58] ss:$20 sps:$4 sm:$0xff]  }
 0xa43   :  { %v3314_v39 = vmul.f32 %v5179_v35, %v3305_v34  ;;  %v3322_v40 = vadd.f32 %v5180_v30, %v3313_v38  ;;  %v5226_v34 = vcombine.high %v3812_v18, %v3812_v18  ;;  %v3813_v38 = vld [vmem:[%s7418_s14 + $0x8] sm:$0xff] }
 0xa45   :  { %v3323_v41 = vadd.f32 %v5180_v30, %v3314_v39  ;;  %v3324_v57 = vmax.f32 %v3322_v40, 0.0  ;;  %v5225_v39 = vcombine.low %v3812_v18, %v3812_v18  ;;  %v5228_v40 = vcombine.high %v3813_v38, %v3813_v38 }
 0xa47   :  { %v3325_v21 = vmax.f32 %v3323_v41, 0.0  ;;  %v5227_v41 = vcombine.low %v3813_v38, %v3813_v38 }
 0xa49   :  { %v3326_v52 = vpack.c.bf16 %v3325_v21, %v3324_v57 }
 0xa4b   :  { %3616 = vmatmul.mubr.bf16.vlgmr.msra.gmra.mrb[36].mxu1 %v3326_v52  ;;  %5367 = vmatmul.mubr.bf16.vlgmr.msra.gmra.mrb[20].mxu0 %v3326_v52 }
 0xa4c   :  { %3627 = vmatpush1.bf16.msra.mxu1 %v6002_v36  ;;  %3658 = vmatprep.mubr.bf16.mxu1 %v6242_v29 }
 0xa4d   :  { %3628 = vmatprep.subr.bf16.mxu1 %v6007_v62  ;;  %5372 = vmatprep.mubr.msk.bf16.mxu0 %vm6252_vm1, %v6240_v27 }
 0xa50   :  { %3629 = vmatpush1.bf16.msra.mxu1 %v6005_v14 }
 0xa51   :  { %3630 = vmatprep.subr.bf16.mxu1 %v6010_v2 }
 0xa54   :  { %3631 = vmatpush1.bf16.msra.mxu1 %v6008_v0 }
 0xa55   :  { %3632 = vmatprep.subr.bf16.mxu1 %v6013_v3 }
 0xa58   :  { %3633 = vmatpush1.bf16.msra.mxu1 %v6011_v17 }
 0xa59   :  { %3634 = vmatprep.subr.bf16.mxu1 %v6016_v1 }
 0xa5c   :  { %3635 = vmatpush1.bf16.msra.mxu1 %v6014_v15 }
 0xa5d   :  { %3636 = vmatprep.subr.bf16.mxu1 %v6019_v10  ;;  %v7105_v10 = vld [vmem:[%s7440_s23 + $0x8] sm:$0xff] }
 0xa60   :  { %3637 = vmatpush1.bf16.msra.mxu1 %v6017_v9 }
 0xa61   :  { %3638 = vmatprep.subr.bf16.mxu1 %v6022_v20 }
 0xa64   :  { %3639 = vmatpush1.bf16.msra.mxu1 %v6020_v26 }
 0xa65   :  { %3640 = vmatprep.subr.bf16.mxu1 %v6025_v45 }
 0xa68   :  { %3641 = vmatpush1.bf16.msra.mxu1 %v6023_v4 }
 0xa69   :  { %3730 = vmatprep.subr.bf16.mxu1 %v5222_v13 }
 0xa6b   :  { %3659 = vmatmul.mubr.bf16.vlgmr.msra.gmra.mrb[40].mxu1 %v3326_v52 }
 0xa71   :  { %3731 = vmatpush1.bf16.xpose.msra.mxu1 %v5221_v48 }
 0xa72   :  { %3771 = vmatprep.subr.bf16.mxu1 %v5224_v32 }
 0xb1e   :  { %v3617_v23 = vpop.f32.mrb[36].mxu1  ;;  %v7047_v16 = vpop.f32.mrb[20].mxu0 }
 0xb1f   :  { %v3619_v31 = vpop.f32.mrb[37].mxu1  ;;  %v5368_v37 = vpop.f32.mrb[21].mxu0 }
 0xb20   :  { %v3621_v19 = vpop.f32.mrb[38].mxu1  ;;  %v7049_v25 = vpop.f32.mrb[22].mxu0 }
 0xb21   :  { %v7051_v61 = vpack.c.bf16 %v3621_v19, %v3617_v23  ;;  %v3623_v53 = vpop.f32.mrb[39].mxu1  ;;  %v5369_v44 = vpop.f32.mrb[23].mxu0 }
 0xb22   :  { %v7053_v50 = vpack.c.bf16 %v3623_v53, %v3619_v31 }
 0xb24   :  { %3762 = vmatprep.mubr.bf16.mxu1 %v7053_v50 }
 0xb25   :  { %3763 = vmatmul.mubr.bf16.vlgmr.msra.gmra.mrb[44].mxu1 %v7051_v61 }
 0xb26   :  { %3772 = vmatpush1.bf16.xpose.msra.mxu1 %v5223_v24 }
 0xb27   :  { %3828 = vmatprep.subr.bf16.mxu1 %v7053_v50 }
 0xb3e   :  { %v3660_v33 = vpop.f32.mrb[40].mxu1 }
 0xb3f   :  { %v3662_v22 = vpop.f32.mrb[41].mxu1 }
 0xb40   :  { %v3664_v35 = vpop.f32.mrb[42].mxu1 }
 0xb41   :  { %v7061_v43 = vpack.c.bf16 %v3664_v35, %v3660_v33  ;;  %v3666_v6 = vpop.f32.mrb[43].mxu1 }
 0xb42   :  { %v7063_v30 = vpack.c.bf16 %v3666_v6, %v3662_v22 }
 0xb44   :  { %3803 = vmatprep.mubr.bf16.mxu1 %v7063_v30 }
 0xb45   :  { %3804 = vmatmul.mubr.bf16.vlgmr.msra.gmra.mrb[44].mxu1 %v7061_v43 }
 0xb46   :  { %3829 = vmatpush1.bf16.xpose.msra.mxu1 %v7051_v61  ;;  %3860 = vmatprep.mubr.bf16.mxu1 %v5226_v34 }
 0xb47   :  { %3868 = vmatprep.subr.bf16.mxu1 %v7063_v30 }
 0xb4d   :  { %3861 = vmatmul.mubr.bf16.vlgmr.msra.gmra.mrb[48].mxu1 %v5225_v39 }
 0xb4e   :  { %3869 = vmatpush1.bf16.xpose.msra.mxu1 %v7061_v43  ;;  %3900 = vmatprep.mubr.bf16.mxu1 %v5228_v40 }
 0xb59   :  { %3901 = vmatmul.mubr.bf16.vlgmr.msra.gmra.mrb[48].mxu1 %v5227_v41 }
 0xb5a   :  { %4795 = vmatprep.mubr.bf16.mxu1 %v6242_v29 }
 0xc18   :  { %v3805_v57 = vpop.f32.mrb[44].mxu1 }
 0xc19   :  { %4370 = vperm.xlu0 %5522, %v3805_v57   ;;  %3956 = vperm.xlu1 %5517, %v3805_v57   ;;  %v3807_v21 = vpop.f32.mrb[45].mxu1 }
 0xc1a   :  { %v3808_v36 = vpop.f32.mrb[46].mxu1 }
 0xc1b   :  { %v3810_v52 = vpop.f32.mrb[47].mxu1 }
 0xc1d   :  { %5524 = vset.pattern.permute.xlu0 %v6241_v28  ;;  %5518 = vset.pattern.permute.xlu1 %v6242_v29 }
 0xc1e   :  { %3910 = vperm.xlu1 %5518, %v3805_v57   ;;  %3960 = vperm.xlu0 %5524, %v3808_v36  }
 0xc22   :  { %5519 = vset.pattern.permute.xlu1 %v6244_v49  ;;  %5530 = vset.pattern.permute.xlu0 %v6247_v55 }
 0xc23   :  { %4093 = vperm.xlu1 %5519, %v3805_v57   ;;  %4469 = vperm.xlu0 %5530, %v3808_v36  }
 0xc27   :  { %5520 = vset.pattern.permute.xlu1 %v6243_v47  ;;  %5532 = vset.pattern.permute.xlu0 %v6248_v56 }
 0xc28   :  { %4184 = vperm.xlu1 %5520, %v3805_v57  }
 0xc2c   :  { %5521 = vset.pattern.permute.xlu1 %v6245_v51  ;;  %v7081_v62 = vpop.f32.mrb[48].mxu1 }
 0xc2d   :  { %4279 = vperm.xlu1 %5521, %v3805_v57   ;;  %v3904_v28 = vpop.f32.mrb[49].mxu1  ;;  %v3921_v48 = vrot.slane %v7081_v62, %v6476_v60  ;;  %v4103_v23 = vrot.slane %v7081_v62, %v2300_v5  ;;  %v4380_v19 = vrot.slane %v7081_v62, %v2597_v46  ;;  %v4194_v35 = vrot.slane %v7081_v62, %v2403_v63 }
 0xc2e   :  { %v3905_v14 = vpop.f32.mrb[50].mxu1  ;;  %v4475_v6 = vrot.slane %v7081_v62, %v2700_v11 }
 0xc2f   :  { %v3906_v2 = vpop.f32.mrb[51].mxu1 }
 0xc31   :  { %5523 = vset.pattern.permute.xlu1 %v6247_v55  ;;  %v3966_v55 = vrot.slane %v7081_v62, %v6473_v59 }
 0xc32   :  { %4465 = vperm.xlu1 %5523, %v3805_v57  }
 0xc36   :  { %5525 = vset.pattern.permute.xlu1 %v6242_v29 }
 0xc37   :  { %3915 = vperm.xlu1 %5525, %v3808_v36  }
 0xc3b   :  { %5526 = vset.pattern.permute.xlu1 %v6244_v49 }
 0xc3c   :  { %4097 = vperm.xlu1 %5526, %v3808_v36  }
 0xc40   :  { %5527 = vset.pattern.permute.xlu1 %v6243_v47 }
 0xc41   :  { %4188 = vperm.xlu1 %5527, %v3808_v36  }
 0xc45   :  { %5528 = vset.pattern.permute.xlu1 %v6245_v51  ;;  %v7095_v51 = vld [vmem:[%s7440_s23] sm:$0xff] }
 0xc46   :  { %4283 = vperm.xlu1 %5528, %v3808_v36  }
 0xc4a   :  { %5529 = vset.pattern.permute.xlu1 %v6246_v54 }
 0xc4b   :  { %4374 = vperm.xlu1 %5529, %v3808_v36  }
 0xc4f   :  { %5531 = vset.pattern.permute.xlu1 %v6248_v56 }
 0xc98   :  { %v4371_v0 = vpop.permute.xlu0 %4370  ;;  %v3957_v29 = vpop.permute.xlu1 %3956 }
 0xc99   :  { %v3967_v3 = vadd.f32 %v3966_v55, %v3957_v29  ;;  %v4381_v24 = vadd.f32 %v4380_v19, %v4371_v0 }
 0xc9b   :  { %vm3969_vm7 = vcmp.gt.f32.partialorder %v3967_v3, 0.0  ;;  %v3971_v49 = vmul.f32 0.2, %v3967_v3  ;;  %v4385_v5 = vmul.f32 0.2, %v4381_v24  ;;  %vm4383_vm12 = vcmp.gt.f32.partialorder %v4381_v24, 0.0 }
 0xc9d   :  { %v3961_v17 = vpop.permute.xlu0 %3960  ;;  %v3973_v1 = vsel %vm3969_vm7, %v3967_v3, %v3971_v49  ;;  %v3911_v26 = vpop.permute.xlu1 %3910 }
 0xc9e   :  { %v3968_v47 = vadd.f32 %v3966_v55, %v3961_v17  ;;  %v7098_v54 = vadd.f32 %v7095_v51, %v3973_v1  ;;  %v3922_v32 = vadd.f32 %v3921_v48, %v3911_v26  ;;  %v4289_v55 = vrot.slane %v7081_v62, %v2506_v7 }
 0xca0   :  { %vm3970_vm8 = vcmp.gt.f32.partialorder %v3968_v47, 0.0  ;;  %v3972_v56 = vmul.f32 0.2, %v3968_v47  ;;  %v3977_v59 = vsel %vm2115_vm2, %v7098_v54, -inf  ;;  %v3926_v31 = vmul.f32 0.2, %v3922_v32 }
 0xca1   :  { %3978 = vmax.xlane.f32.xlu1 %v3977_v59  ;;  %vm3924_vm9 = vcmp.gt.f32.partialorder %v3922_v32, 0.0 }
 0xca2   :  { %v3974_v15 = vsel %vm3970_vm8, %v3968_v47, %v3972_v56  ;;  %v4094_v45 = vpop.permute.xlu1 %4093  ;;  %v3928_v18 = vsel %vm3924_vm9, %v3922_v32, %v3926_v31  ;;  %vm4663_vm9 = vcmask 523264  }
 0xca3   :  { %v7108_v9 = vadd.f32 %v7105_v10, %v3974_v15  ;;  %v4104_v37 = vadd.f32 %v4103_v23, %v4094_v45  ;;  %v7127_v46 = vadd.f32 %v7095_v51, %v3928_v18 }
 0xca5   :  { %v3980_v20 = vsel %vm2115_vm2, %v7108_v9, -inf  ;;  %v4108_v33 = vmul.f32 0.2, %v4104_v37  ;;  %vm4106_vm10 = vcmp.gt.f32.partialorder %v4104_v37, 0.0  ;;  %v3932_v63 = vsel %vm2115_vm2, %v7127_v46, -inf }
 0xca6   :  { %3981 = vmax.xlane.f32.xlu0 %v3980_v20 }
 0xca7   :  { %v4185_v42 = vpop.permute.xlu1 %4184  ;;  %v4110_v39 = vsel %vm4106_vm10, %v4104_v37, %v4108_v33 }
 0xca8   :  { %v4195_v34 = vadd.f32 %v4194_v35, %v4185_v42  ;;  %v7132_v21 = vadd.f32 %v7095_v51, %v4110_v39 }
 0xcaa   :  { %v4199_v52 = vmul.f32 0.2, %v4195_v34  ;;  %vm4197_vm14 = vcmp.gt.f32.partialorder %v4195_v34, 0.0  ;;  %v4114_v29 = vsel %vm2115_vm2, %v7132_v21, -inf }
 0xcac   :  { %v4280_v4 = vpop.permute.xlu1 %4279  ;;  %v4201_v56 = vsel %vm4197_vm14, %v4195_v34, %v4199_v52  ;;  %v4566_v52 = vrot.slane %v7081_v62, %v2802_v12 }
 0xcad   :  { %v4290_v17 = vadd.f32 %v4289_v55, %v4280_v4  ;;  %v7155_v20 = vadd.f32 %v7095_v51, %v4201_v56 }
 0xcaf   :  { %v4294_v26 = vmul.f32 0.2, %v4290_v17  ;;  %vm4292_vm3 = vcmp.gt.f32.partialorder %v4290_v17, 0.0 }
 0xcb1   :  { %v4466_v13 = vpop.permute.xlu1 %4465  ;;  %v4296_v37 = vsel %vm4292_vm3, %v4290_v17, %v4294_v26 }
 0xcb2   :  { %4556 = vperm.xlu1 %5531, %v3805_v57   ;;  %v4476_v40 = vadd.f32 %v4475_v6, %v4466_v13 }
 0xcb4   :  { %v4480_v2 = vmul.f32 0.2, %v4476_v40  ;;  %vm4478_vm15 = vcmp.gt.f32.partialorder %v4476_v40, 0.0 }
 0xcb6   :  { %v3916_v8 = vpop.permute.xlu1 %3915  ;;  %v4482_v7 = vsel %vm4478_vm15, %v4476_v40, %v4480_v2 }
 0xcb7   :  { %v3923_v53 = vadd.f32 %v3921_v48, %v3916_v8  ;;  %v7158_v42 = vadd.f32 %v7095_v51, %v4482_v7  ;;  %v4205_v48 = vsel %vm2115_vm2, %v7155_v20, -inf }
 0xcb9   :  { %v3927_v60 = vmul.f32 0.2, %v3923_v53  ;;  %vm3925_vm11 = vcmp.gt.f32.partialorder %v3923_v53, 0.0  ;;  %v4486_v31 = vsel %vm2115_vm2, %v7158_v42, -inf }
 0xcbb   :  { %v4098_v44 = vpop.permute.xlu1 %4097  ;;  %v3929_v57 = vsel %vm3925_vm11, %v3923_v53, %v3927_v60  ;;  %v4470_v53 = vpop.permute.xlu0 %4469 }
 0xcbc   :  { %4560 = vperm.xlu0 %5532, %v3808_v36   ;;  %v4105_v22 = vadd.f32 %v4103_v23, %v4098_v44  ;;  %v4387_v36 = vsel %vm4383_vm12, %v4381_v24, %v4385_v5  ;;  %v7135_v28 = vadd.f32 %v7105_v10, %v3929_v57  ;;  %v7170_v24 = vadd.f32 %v7095_v51, %v4296_v37 }
 0xcbd   :  { %v7146_v49 = vadd.f32 %v7095_v51, %v4387_v36  ;;  %v4477_v33 = vadd.f32 %v4475_v6, %v4470_v53 }
 0xcbe   :  { %v4109_v38 = vmul.f32 0.2, %v4105_v22  ;;  %vm4107_vm13 = vcmp.gt.f32.partialorder %v4105_v22, 0.0  ;;  %v3935_v47 = vsel %vm2115_vm2, %v7135_v28, -inf }
 0xcbf   :  { %v4391_v15 = vsel %vm2115_vm2, %v7146_v49, -inf  ;;  %vm4479_vm6 = vcmp.gt.f32.partialorder %v4477_v33, 0.0 }
 0xcc0   :  { %v4189_v41 = vpop.permute.xlu1 %4188  ;;  %v4111_v14 = vsel %vm4107_vm13, %v4105_v22, %v4109_v38 }
 0xcc1   :  { %v4196_v11 = vadd.f32 %v4194_v35, %v4189_v41  ;;  %v7143_v3 = vadd.f32 %v7105_v10, %v4111_v14  ;;  %v4481_v35 = vmul.f32 0.2, %v4477_v33 }
 0xcc3   :  { %v4200_v1 = vmul.f32 0.2, %v4196_v11  ;;  %vm4198_vm0 = vcmp.gt.f32.partialorder %v4196_v11, 0.0  ;;  %v4117_v59 = vsel %vm2115_vm2, %v7143_v3, -inf  ;;  %v4483_v6 = vsel %vm4479_vm6, %v4477_v33, %v4481_v35 }
 0xcc4   :  { %v7185_v40 = vadd.f32 %v7105_v10, %v4483_v6 }
 0xcc5   :  { %v4284_v0 = vpop.permute.xlu1 %4283  ;;  %v4202_v4 = vsel %vm4198_vm0, %v4196_v11, %v4200_v1 }
 0xcc6   :  { %v4291_v45 = vadd.f32 %v4289_v55, %v4284_v0  ;;  %v7163_v8 = vadd.f32 %v7105_v10, %v4202_v4  ;;  %v4489_v41 = vsel %vm2115_vm2, %v7185_v40, -inf }
 0xcc8   :  { %v4295_v32 = vmul.f32 0.2, %v4291_v45  ;;  %vm4293_vm4 = vcmp.gt.f32.partialorder %v4291_v45, 0.0  ;;  %v4208_v44 = vsel %vm2115_vm2, %v7163_v8, -inf }
 0xcca   :  { %v4375_v13 = vpop.permute.xlu1 %4374  ;;  %v4297_v18 = vsel %vm4293_vm4, %v4291_v45, %v4295_v32 }
 0xccb   :  { %v4382_v23 = vadd.f32 %v4380_v19, %v4375_v13  ;;  %v4300_v19 = vsel %vm2115_vm2, %v7170_v24, -inf  ;;  %v7175_v60 = vadd.f32 %v7105_v10, %v4297_v18 }
 0xccd   :  { %v4386_v22 = vmul.f32 0.2, %v4382_v23  ;;  %vm4384_vm5 = vcmp.gt.f32.partialorder %v4382_v23, 0.0  ;;  %v4303_v34 = vsel %vm2115_vm2, %v7175_v60, -inf }
 0xccf   :  { %v4388_v5 = vsel %vm4384_vm5, %v4382_v23, %v4386_v22 }
 0xcd0   :  { %v7180_v38 = vadd.f32 %v7105_v10, %v4388_v5 }
 0xcd2   :  { %v4394_v39 = vsel %vm2115_vm2, %v7180_v38, -inf }
 0xcd6   :  { %3933 = vmax.xlane.f32.xlu1 %v3932_v63 }
 0xcda   :  { %4115 = vmax.xlane.f32.xlu1 %v4114_v29 }
 0xcdb   :  { %3936 = vmax.xlane.f32.xlu0 %v3935_v47 }
 0xcde   :  { %4118 = vmax.xlane.f32.xlu1 %v4117_v59 }
 0xcdf   :  { %4392 = vmax.xlane.f32.xlu0 %v4391_v15 }
 0xce2   :  { %4206 = vmax.xlane.f32.xlu1 %v4205_v48 }
 0xce3   :  { %4487 = vmax.xlane.f32.xlu0 %v4486_v31 }
 0xce6   :  { %4209 = vmax.xlane.f32.xlu1 %v4208_v44 }
 0xcea   :  { %4301 = vmax.xlane.f32.xlu1 %v4300_v19 }
 0xcee   :  { %4304 = vmax.xlane.f32.xlu1 %v4303_v34 }
 0xcf2   :  { %4395 = vmax.xlane.f32.xlu1 %v4394_v39 }
 0xcf6   :  { %4490 = vmax.xlane.f32.xlu1 %v4489_v41 }
 0xd2e   :  { %v3979_v57 = vpop.xlane.xlu1 %3978 }
 0xd2f   :  { %v3983_v63 = vsub.f32 %v7098_v54, %v3979_v57 }
 0xd31   :  { %v3985_v36 = vmul.f32 1.442695, %v3983_v63 }
 0xd32   :  { %v4557_v11 = vpop.permute.xlu1 %4556 }
 0xd33   :  { %6118 = vpow2.f32 %v3985_v36  ;;  %v4567_v14 = vadd.f32 %v4566_v52, %v4557_v11  ;;  %v3982_v55 = vpop.xlane.xlu0 %3981 }
 0xd34   :  { %v3984_v35 = vsub.f32 %v7108_v9, %v3982_v55 }
 0xd35   :  { %vm4569_vm7 = vcmp.gt.f32.partialorder %v4567_v14, 0.0  ;;  %v4571_v2 = vmul.f32 0.2, %v4567_v14 }
 0xd37   :  { %v4573_v0 = vsel %vm4569_vm7, %v4567_v14, %v4571_v2 }
 0xd38   :  { %v7194_v29 = vadd.f32 %v7095_v51, %v4573_v0 }
 0xd3a   :  { %v4577_v17 = vsel %vm2115_vm2, %v7194_v29, -inf }
 0xd3b   :  { %v4561_v1 = vpop.permute.xlu0 %4560  ;;  %4578 = vmax.xlane.f32.xlu0 %v4577_v17 }
 0xd3c   :  { %v4568_v54 = vadd.f32 %v4566_v52, %v4561_v1 }
 0xd3d   :  { %v7198_v47 = vpop.eup %6118 }
 0xd3e   :  { %vm4570_vm8 = vcmp.gt.f32.partialorder %v4568_v54, 0.0  ;;  %v4572_v58 = vmul.f32 0.2, %v4568_v54  ;;  %v3989_v12 = vsel %vm2115_vm2, %v7198_v47, 0.0 }
 0xd3f   :  { %3990 = vadd.xlane.f32.xlu0 %v3989_v12 }
 0xd40   :  { %v4574_v62 = vsel %vm4570_vm8, %v4568_v54, %v4572_v58 }
 0xd41   :  { %v7203_v56 = vadd.f32 %v7105_v10, %v4574_v62 }
 0xd43   :  { %v4580_v51 = vsel %vm2115_vm2, %v7203_v56, -inf }
 0xd44   :  { %4581 = vmax.xlane.f32.xlu1 %v4580_v51 }
 0xd63   :  { %v3934_v7 = vpop.xlane.xlu1 %3933 }
 0xd64   :  { %v3938_v59 = vsub.f32 %v7127_v46, %v3934_v7 }
 0xd66   :  { %v3940_v15 = vmul.f32 1.442695, %v3938_v59 }
 0xd67   :  { %v4116_v26 = vpop.xlane.xlu1 %4115 }
 0xd68   :  { %6120 = vpow2.f32 %v3940_v15  ;;  %v3937_v45 = vpop.xlane.xlu0 %3936  ;;  %v4120_v17 = vsub.f32 %v7132_v21, %v4116_v26 }
 0xd69   :  { %v3939_v6 = vsub.f32 %v7135_v28, %v3937_v45 }
 0xd6a   :  { %v4122_v58 = vmul.f32 1.442695, %v4120_v17 }
 0xd6b   :  { %v4119_v4 = vpop.xlane.xlu1 %4118 }
 0xd6c   :  { %v4393_v32 = vpop.xlane.xlu0 %4392  ;;  %v4121_v39 = vsub.f32 %v7143_v3, %v4119_v4 }
 0xd6d   :  { %v4397_v46 = vsub.f32 %v7146_v49, %v4393_v32  ;;  %v3987_v49 = vmul.f32 1.442695, %v3984_v35 }
 0xd6e   :  { %v4124_v63 = vmul.f32 1.442695, %v4121_v39 }
 0xd6f   :  { %v4207_v13 = vpop.xlane.xlu1 %4206  ;;  %v4399_v22 = vmul.f32 1.442695, %v4397_v46 }
 0xd70   :  { %v4211_v48 = vsub.f32 %v7155_v20, %v4207_v13  ;;  %v4488_v53 = vpop.xlane.xlu0 %4487 }
 0xd71   :  { %v4492_v18 = vsub.f32 %v7158_v42, %v4488_v53  ;;  %v3942_v42 = vmul.f32 1.442695, %v3939_v6 }
 0xd72   :  { %v7209_v23 = vpop.eup %6120  ;;  %v4213_v10 = vmul.f32 1.442695, %v4211_v48 }
 0xd73   :  { %v4210_v31 = vpop.xlane.xlu1 %4209  ;;  %v3944_v37 = vsel %vm2115_vm2, %v7209_v23, 0.0  ;;  %v4494_v5 = vmul.f32 1.442695, %v4492_v18 }
 0xd74   :  { %6122 = vpow2.f32 %v4213_v10  ;;  %3945 = vadd.xlane.f32.xlu0 %v3944_v37  ;;  %v4212_v36 = vsub.f32 %v7163_v8, %v4210_v31 }
 0xd76   :  { %v4215_v3 = vmul.f32 1.442695, %v4212_v36 }
 0xd77   :  { %v4302_v44 = vpop.xlane.xlu1 %4301 }
 0xd78   :  { %v4306_v33 = vsub.f32 %v7170_v24, %v4302_v44 }
 0xd7a   :  { %v4308_v20 = vmul.f32 1.442695, %v4306_v33 }
 0xd7b   :  { %v4305_v57 = vpop.xlane.xlu1 %4304 }
 0xd7c   :  { %6124 = vpow2.f32 %v4308_v20  ;;  %v4307_v11 = vsub.f32 %v7175_v60, %v4305_v57 }
 0xd7d   :  { %6126 = vpow2.f32 %v4399_v22 }
 0xd7e   :  { %v7216_v19 = vpop.eup %6122  ;;  %6128 = vpow2.f32 %v4494_v5  ;;  %v4310_v8 = vmul.f32 1.442695, %v4307_v11 }
 0xd7f   :  { %v4217_v34 = vsel %vm2115_vm2, %v7216_v19, 0.0  ;;  %6130 = vpow2.f32 %v3987_v49  ;;  %v4396_v14 = vpop.xlane.xlu1 %4395 }
 0xd80   :  { %4218 = vadd.xlane.f32.xlu1 %v4217_v34  ;;  %6132 = vpow2.f32 %v3942_v42  ;;  %v4398_v0 = vsub.f32 %v7180_v38, %v4396_v14 }
 0xd81   :  { %6134 = vpow2.f32 %v4124_v63 }
 0xd82   :  { %6136 = vpow2.f32 %v4215_v3  ;;  %v4401_v60 = vmul.f32 1.442695, %v4398_v0 }
 0xd83   :  { %6138 = vpow2.f32 %v4310_v8  ;;  %v4491_v13 = vpop.xlane.xlu1 %4490 }
 0xd84   :  { %6140 = vpow2.f32 %v4401_v60  ;;  %v4493_v48 = vsub.f32 %v7185_v40, %v4491_v13 }
 0xd85   :  { %6142 = vpow2.f32 %v4122_v58 }
 0xd86   :  { %v7222_v24 = vpop.eup %6124  ;;  %v4496_v37 = vmul.f32 1.442695, %v4493_v48 }
 0xd87   :  { %v4312_v41 = vsel %vm2115_vm2, %v7222_v24, 0.0  ;;  %v7227_v9 = vpop.eup %6126 }
 0xd88   :  { %4313 = vadd.xlane.f32.xlu1 %v4312_v41  ;;  %v4403_v28 = vsel %vm2115_vm2, %v7227_v9, 0.0  ;;  %v7234_v52 = vpop.eup %6128 }
 0xd89   :  { %v4498_v2 = vsel %vm2115_vm2, %v7234_v52, 0.0  ;;  %v7239_v55 = vpop.eup %6130 }
 0xd8a   :  { %4001 = vrot.lane.b32.xlu0 %v7051_v61, %s6251_s27  ;;  %v3992_v1 = vsel %vm2115_vm2, %v7239_v55, 0.0  ;;  %v7245_v54 = vpop.eup %6132 }
 0xd8b   :  { %v3947_v12 = vsel %vm2115_vm2, %v7245_v54, 0.0  ;;  %v7249_v62 = vpop.eup %6134 }
 0xd8c   :  { %4404 = vadd.xlane.f32.xlu1 %v4403_v28  ;;  %v4129_v21 = vsel %vm2115_vm2, %v7249_v62, 0.0  ;;  %v7253_v38 = vpop.eup %6136 }
 0xd8d   :  { %v4220_v51 = vsel %vm2115_vm2, %v7253_v38, 0.0  ;;  %v7257_v7 = vpop.eup %6138 }
 0xd8e   :  { %v4315_v59 = vsel %vm2115_vm2, %v7257_v7, 0.0  ;;  %v7261_v15 = vpop.eup %6140 }
 0xd8f   :  { %v7263_v26 = vpop.eup %6142  ;;  %v4406_v45 = vsel %vm2115_vm2, %v7261_v15, 0.0 }
 0xd90   :  { %4499 = vadd.xlane.f32.xlu1 %v4498_v2  ;;  %v4126_v4 = vsel %vm2115_vm2, %v7263_v26, 0.0 }
 0xd94   :  { %3993 = vadd.xlane.f32.xlu1 %v3992_v1 }
 0xd98   :  { %3948 = vadd.xlane.f32.xlu1 %v3947_v12 }
 0xd9c   :  { %4130 = vadd.xlane.f32.xlu1 %v4129_v21 }
 0xda0   :  { %4221 = vadd.xlane.f32.xlu1 %v4220_v51 }
 0xda4   :  { %4316 = vadd.xlane.f32.xlu1 %v4315_v59 }
 0xda8   :  { %4407 = vadd.xlane.f32.xlu1 %v4406_v45 }
 0xda9   :  { %4127 = vadd.xlane.f32.xlu0 %v4126_v4 }
 0xdbf   :  { %4229 = vrot.lane.b32.xlu0 %v7053_v50, %s6251_s27 }
 0xdc8   :  { %v4579_v32 = vpop.xlane.xlu0 %4578 }
 0xdc9   :  { %v4583_v10 = vsub.f32 %v7194_v29, %v4579_v32 }
 0xdcb   :  { %v4585_v31 = vmul.f32 1.442695, %v4583_v10 }
 0xdcc   :  { %v3991_v18 = vpop.xlane.xlu0 %3990 }
 0xdcd   :  { %6144 = vpow2.f32 %v4585_v31 }
 0xdce   :  { %6146 = vpow2.f32 %v4496_v37 }
 0xdd1   :  { %v4582_v40 = vpop.xlane.xlu1 %4581 }
 0xdd2   :  { %v4584_v29 = vsub.f32 %v7203_v56, %v4582_v40 }
 0xdd4   :  { %v4587_v22 = vmul.f32 1.442695, %v4584_v29 }
 0xdd6   :  { %6148 = vpow2.f32 %v4587_v22 }
 0xdd7   :  { %v7273_v46 = vpop.eup %6144  ;;  %6150 = vrcp.f32 %v3991_v18 }
 0xdd8   :  { %v4589_v53 = vsel %vm2115_vm2, %v7273_v46, 0.0  ;;  %v7277_v44 = vpop.eup %6146 }
 0xdd9   :  { %4590 = vadd.xlane.f32.xlu1 %v4589_v53  ;;  %v4501_v33 = vsel %vm2115_vm2, %v7277_v44, 0.0 }
 0xdde   :  { %4502 = vadd.xlane.f32.xlu0 %v4501_v33 }
 0xde0   :  { %v7285_v5 = vpop.eup %6148 }
 0xde1   :  { %v4592_v34 = vsel %vm2115_vm2, %v7285_v5, 0.0  ;;  %v6151_v57 = vpop.eup %6150 }
 0xde2   :  { %v3997_v36 = vmul.f32 %v6151_v57, %v7198_v47 }
 0xdea   :  { %4415 = vrot.lane.b32.xlu1 %v7061_v43, %s6251_s27 }
 0xe01   :  { %v3946_v20 = vpop.xlane.xlu0 %3945 }
 0xe05   :  { %v4002_v35 = vpop.permute.xlu0 %4001 }
 0xe06   :  { %5371 = vmatpush3.bf16.msra.mxu0 %v4002_v35 }
 0xe07   :  { %5376 = vmatprep.subr.bf16.mxu0 %v6240_v27 }
 0xe0d   :  { %v4219_v49 = vpop.xlane.xlu1 %4218 }
 0xe0e   :  { %4593 = vadd.xlane.f32.xlu1 %v4592_v34 }
 0xe15   :  { %v4314_v6 = vpop.xlane.xlu1 %4313 }
 0xe19   :  { %v4405_v42 = vpop.xlane.xlu1 %4404 }
 0xe1d   :  { %v7289_v39 = vpop.xlane.xlu1 %4499 }
 0xe1f   :  { %4601 = vrot.lane.b32.xlu1 %v7063_v30, %s6251_s27 }
 0xe21   :  { %v3994_v56 = vpop.xlane.xlu1 %3993 }
 0xe22   :  { %6152 = vrcp.f32 %v3994_v56 }
 0xe25   :  { %v3949_v41 = vpop.xlane.xlu1 %3948 }
 0xe26   :  { %6154 = vrcp.f32 %v3949_v41 }
 0xe27   :  { %6156 = vrcp.f32 %v3946_v20 }
 0xe29   :  { %v4131_v14 = vpop.xlane.xlu1 %4130 }
 0xe2c   :  { %v6153_v63 = vpop.eup %6152 }
 0xe2d   :  { %v3998_v28 = vmul.f32 %v6153_v63, %v7239_v55 }
 0xe2f   :  { %v3999_v3 = vpack.c.bf16 %v3998_v28, %v3997_v36 }
 0xe30   :  { %v6155_v11 = vpop.eup %6154 }
 0xe31   :  { %5373 = vmatmul.mubr.msk.bf16.vlgmr.msra.gmra.mrb[24].mxu0 %vm2115_vm2, %v3999_v3  ;;  %v6157_v2 = vpop.eup %6156  ;;  %v3953_v0 = vmul.f32 %v6155_v11, %v7245_v54 }
 0xe32   :  { %5377 = vmatpush3.bf16.msra.mxu0 %v7051_v61  ;;  %5378 = vmatprep.mubr.msk.bf16.mxu0 %vm6252_vm1, %v6240_v27  ;;  %v3952_v47 = vmul.f32 %v6157_v2, %v7209_v23  ;;  %v4222_v61 = vpop.xlane.xlu1 %4221 }
 0xe33   :  { %5382 = vmatprep.subr.bf16.mxu0 %v6240_v27 }
 0xe34   :  { %v3954_v55 = vpack.c.bf16 %v3953_v0, %v3952_v47 }
 0xe36   :  { %v4128_v8 = vpop.xlane.xlu0 %4127 }
 0xe37   :  { %6158 = vrcp.f32 %v4128_v8 }
 0xe38   :  { %6160 = vrcp.f32 %v4131_v14 }
 0xe39   :  { %6162 = vrcp.f32 %v4222_v61  ;;  %v6034_v61 = vld [vmem:[%s7423_s19] ss:$8 sps:$4 sm:$0xff]  }
 0xe3a   :  { %6164 = vrcp.f32 %v4219_v49  ;;  %v4230_v58 = vpop.permute.xlu0 %4229 }
 0xe3d   :  { %5379 = vmatmul.mubr.msk.bf16.vlgmr.msra.gmra.mrb[24].mxu0 %vm2115_vm2, %v3954_v55  ;;  %v6036_v55 = vld [vmem:[%s7423_s19 + $0x4] ss:$8 sps:$4 sm:$0xff]  }
 0xe3e   :  { %5383 = vmatpush3.bf16.msra.mxu0 %v7053_v50  ;;  %5384 = vmatprep.mubr.msk.bf16.mxu0 %vm6252_vm1, %v6240_v27  ;;  %v4317_v50 = vpop.xlane.xlu1 %4316 }
 0xe3f   :  { %5388 = vmatprep.subr.bf16.mxu0 %v6240_v27  ;;  %6166 = vrcp.f32 %v4317_v50  ;;  %4763 = vmatprep.subr.bf16.mxu1 %v6036_v55 }
 0xe40   :  { %6168 = vrcp.f32 %v4314_v6  ;;  %4764 = vmatpush1.bf16.msra.mxu1 %v6034_v61 }
 0xe41   :  { %v6159_v17 = vpop.eup %6158 }
 0xe42   :  { %v6161_v1 = vpop.eup %6160  ;;  %v4134_v54 = vmul.f32 %v6159_v17, %v7263_v26  ;;  %v4408_v45 = vpop.xlane.xlu1 %4407  ;;  %v6039_v17 = vld [vmem:[%s7423_s19 + $0x14] ss:$8 sps:$4 sm:$0xff]  }
 0xe43   :  { %v4135_v60 = vmul.f32 %v6161_v1, %v7249_v62  ;;  %v6163_v12 = vpop.eup %6162  ;;  %6170 = vrcp.f32 %v4408_v45  ;;  %v6037_v1 = vld [vmem:[%s7423_s19 + $0x10] ss:$8 sps:$4 sm:$0xff]   ;;  %4765 = vmatprep.subr.bf16.mxu1 %v6039_v17  ;;  %v5238_v45 = vld [vmem:[%s7421_s17] ss:$0 sm:$0xff] }
 0xe44   :  { %v6165_v21 = vpop.eup %6164  ;;  %v4226_v51 = vmul.f32 %v6163_v12, %v7253_v38  ;;  %6172 = vrcp.f32 %v4405_v42  ;;  %v5237_v42 = vld [vmem:[%s7420_s16] ss:$0 sm:$0xff]  ;;  %4766 = vmatpush1.bf16.msra.mxu1 %v6037_v1 }
 0xe45   :  { %v4136_v23 = vpack.c.bf16 %v4135_v60, %v4134_v54  ;;  %v4225_v59 = vmul.f32 %v6165_v21, %v7216_v19  ;;  %6174 = vrcp.f32 %v7289_v39  ;;  %v6042_v54 = vld [vmem:[%s7423_s19 + $0x24] ss:$8 sps:$4 sm:$0xff]   ;;  %v6040_v60 = vld [vmem:[%s7423_s19 + $0x20] ss:$8 sps:$4 sm:$0xff]  }
 0xe46   :  { %4767 = vmatprep.subr.bf16.mxu1 %v6042_v54 }
 0xe47   :  { %v4227_v62 = vpack.c.bf16 %v4226_v51, %v4225_v59 }
 0xe48   :  { %4768 = vmatpush1.bf16.msra.mxu1 %v6040_v60 }
 0xe49   :  { %5385 = vmatmul.mubr.msk.bf16.vlgmr.msra.gmra.mrb[24].mxu0 %vm2115_vm2, %v4136_v23  ;;  %v6167_v26 = vpop.eup %6166  ;;  %v6045_v23 = vld [vmem:[%s7423_s19 + $0x34] ss:$8 sps:$4 sm:$0xff]  }
 0xe4a   :  { %5389 = vmatpush3.bf16.msra.mxu0 %v4230_v58  ;;  %5390 = vmatprep.mubr.msk.bf16.mxu0 %vm6252_vm1, %v6240_v27  ;;  %v6169_v4 = vpop.eup %6168  ;;  %v4321_v13 = vmul.f32 %v6167_v26, %v7257_v7  ;;  %v6043_v58 = vld [vmem:[%s7423_s19 + $0x30] ss:$8 sps:$4 sm:$0xff]  }
 0xe4b   :  { %5394 = vmatprep.subr.bf16.mxu0 %v6240_v27  ;;  %v4320_v38 = vmul.f32 %v6169_v4, %v7222_v24  ;;  %4769 = vmatprep.subr.bf16.mxu1 %v6045_v23 }
 0xe4c   :  { %4770 = vmatpush1.bf16.msra.mxu1 %v6043_v58 }
 0xe4d   :  { %v4322_v19 = vpack.c.bf16 %v4321_v13, %v4320_v38  ;;  %5418 = vmatprep.subr.bf16.mxu1 %v6240_v27 }
 0xe55   :  { %5391 = vmatmul.mubr.msk.bf16.vlgmr.msra.gmra.mrb[24].mxu0 %vm2115_vm2, %v4227_v62 }
 0xe56   :  { %5395 = vmatpush3.bf16.msra.mxu0 %v7061_v43  ;;  %5396 = vmatprep.mubr.msk.bf16.mxu0 %vm6252_vm1, %v6240_v27  ;;  %v6171_v43 = vpop.eup %6170 }
 0xe57   :  { %5400 = vmatprep.subr.bf16.mxu0 %v6240_v27  ;;  %v6173_v32 = vpop.eup %6172  ;;  %v4412_v10 = vmul.f32 %v6171_v43, %v7261_v15 }
 0xe58   :  { %v4411_v31 = vmul.f32 %v6173_v32, %v7227_v9  ;;  %v6175_v15 = vpop.eup %6174 }
 0xe59   :  { %v4506_v53 = vmul.f32 %v6175_v15, %v7234_v52 }
 0xe5a   :  { %v4413_v24 = vpack.c.bf16 %v4412_v10, %v4411_v31 }
 0xe61   :  { %5397 = vmatmul.mubr.msk.bf16.vlgmr.msra.gmra.mrb[24].mxu0 %vm2115_vm2, %v4322_v19  ;;  %v5239_v19 = vld [vmem:[%s7422_s18] ss:$0 sm:$0xff] }
 0xe62   :  { %5402 = vmatprep.mubr.msk.bf16.mxu0 %vm6252_vm1, %v6240_v27 }
 0xe66   :  { %v4591_v48 = vpop.xlane.xlu1 %4590 }
 0xe6a   :  { %v4416_v7 = vpop.permute.xlu1 %4415 }
 0xe6b   :  { %v4503_v37 = vpop.xlane.xlu0 %4502  ;;  %5401 = vmatpush3.bf16.msra.mxu0 %v4416_v7 }
 0xe6c   :  { %6176 = vrcp.f32 %v4503_v37  ;;  %5406 = vmatprep.subr.bf16.mxu0 %v6240_v27 }
 0xe6d   :  { %6178 = vrcp.f32 %v4591_v48 }
 0xe6e   :  { %5403 = vmatmul.mubr.msk.bf16.vlgmr.msra.gmra.mrb[24].mxu0 %vm2115_vm2, %v4413_v24 }
 0xe6f   :  { %5407 = vmatpush3.bf16.msra.mxu0 %v7063_v30  ;;  %5408 = vmatprep.mubr.msk.bf16.mxu0 %vm6252_vm1, %v6240_v27 }
 0xe70   :  { %5412 = vmatprep.subr.bf16.mxu0 %v6240_v27 }
 0xe76   :  { %v6177_v9 = vpop.eup %6176 }
 0xe77   :  { %v4507_v33 = vmul.f32 %v6177_v9, %v7277_v44  ;;  %v6179_v22 = vpop.eup %6178 }
 0xe78   :  { %v4597_v20 = vmul.f32 %v6179_v22, %v7273_v46 }
 0xe79   :  { %v4508_v40 = vpack.c.bf16 %v4507_v33, %v4506_v53 }
 0xe7b   :  { %5409 = vmatmul.mubr.msk.bf16.vlgmr.msra.gmra.mrb[24].mxu0 %vm2115_vm2, %v4508_v40  ;;  %v6188_v40 = vld [vmem:[%s7441_s25] sm:$0xff]   ;;  %s6211_s25 = scalar_lea.vmem %s4865_s26, 256 }
 0xe7c   :  { %5414 = vmatprep.mubr.msk.bf16.mxu0 %vm6252_vm1, %v6240_v27  ;;  %p6212_p8 = scmp.ne.s32.totalorder %s4865_s26, %s6211_s25  ;;  %p6217_p10 = scmp.lt.s32.totalorder %s6211_s25, %s6211_s25 }
 0xe7e   :  { %p6218_p11 = por %p6217_p10, %p6216_p9 }
 0xe80   :  { %p6219_p12 = pnand %p6218_p11, %p6212_p8 }
 0xe9b   :  { %v4594_v29 = vpop.xlane.xlu1 %4593 }
 0xe9c   :  { %6180 = vrcp.f32 %v4594_v29 }
 0xe9f   :  { %v4602_v30 = vpop.permute.xlu1 %4601 }
 0xea0   :  { %5413 = vmatpush3.bf16.msra.mxu0 %v4602_v30  ;;  %v5250_v30 = vld [vmem:[%s7424_s20] ss:$0 sm:$0xff] }
 0xea6   :  { %v6181_v18 = vpop.eup %6180 }
 0xea7   :  { %v4598_v35 = vmul.f32 %v6181_v18, %v7285_v5 }
 0xea9   :  { %v4599_v52 = vpack.c.bf16 %v4598_v35, %v4597_v20 }
 0xeab   :  { %5415 = vmatmul.mubr.msk.bf16.vlgmr.msra.gmra.mrb[24].mxu0 %vm2115_vm2, %v4599_v52 }
 0xf7e   :  { %v4641_v44 = vpop.f32.mrb[24].mxu0 }
 0xf7f   :  { %v4650_v34 = vmul.f32 0.125, %v4641_v44  ;;  %v5416_v49 = vpop.f32.mrb[25].mxu0 }
 0xf80   :  { %v4644_v6 = vpop.f32.mrb[26].mxu0 }
 0xf81   :  { %v4652_v39 = vadd.f32 %v4650_v34, %v7047_v16  ;;  %v4651_v56 = vmul.f32 0.125, %v4644_v6  ;;  %v5417_v41 = vpop.f32.mrb[27].mxu0 }
 0xf83   :  { %v4653_v46 = vadd.f32 %v4651_v56, %v7049_v25  ;;  %v4661_v57 = vadd.f32 %v5237_v42, %v4652_v39 }
 0xf85   :  { %v4664_v5 = vsel %vm4663_vm9, %v4661_v57, 0.0  ;;  %v4662_v63 = vadd.f32 %v5237_v42, %v4653_v46 }
 0xf86   :  { %4665 = vadd.xlane.f32.xlu0 %v4664_v5 }
 0xf87   :  { %v4667_v36 = vsel %vm4663_vm9, %v4662_v63, 0.0 }
 0xf88   :  { %4668 = vadd.xlane.f32.xlu1 %v4667_v36 }
0x1013   :  { %v4666_v28 = vpop.xlane.xlu0 %4665 }
0x1014   :  { %v4671_v3 = vmul.f32 0.015625, %v4666_v28 }
0x1015   :  { %v4669_v11 = vpop.xlane.xlu1 %4668 }
0x1016   :  { %v4673_v14 = vsub.f32 %v4661_v57, %v4671_v3  ;;  %v4672_v2 = vmul.f32 0.015625, %v4669_v11 }
0x1018   :  { %v4674_v8 = vsub.f32 %v4662_v63, %v4672_v2  ;;  %v4675_v16 = vmul.f32 %v4673_v14, %v4673_v14 }
0x101a   :  { %v4677_v0 = vsel %vm4663_vm9, %v4675_v16, 0.0  ;;  %v4676_v47 = vmul.f32 %v4674_v8, %v4674_v8 }
0x101b   :  { %4678 = vadd.xlane.f32.xlu0 %v4677_v0 }
0x101c   :  { %v4680_v25 = vsel %vm4663_vm9, %v4676_v47, 0.0 }
0x101f   :  { %4681 = vadd.xlane.f32.xlu0 %v4680_v25 }
0x10a8   :  { %v4679_v50 = vpop.xlane.xlu0 %4678 }
0x10a9   :  { %v4683_v12 = vmul.f32 0.015625, %v4679_v50 }
0x10ab   :  { %v4685_v21 = vadd.f32 1e-05, %v4683_v12 }
0x10ac   :  { %v4682_v51 = vpop.xlane.xlu0 %4681 }
0x10ad   :  { %6182 = vrsqrt.f32 %v4685_v21  ;;  %v4684_v59 = vmul.f32 0.015625, %v4682_v51 }
0x10af   :  { %v4686_v62 = vadd.f32 1e-05, %v4684_v59 }
0x10b1   :  { %6184 = vrsqrt.f32 %v4686_v62 }
0x10b7   :  { %v6183_v26 = vpop.eup %6182 }
0x10b8   :  { %v4689_v4 = vmul.f32 %v6183_v26, %v4673_v14 }
0x10ba   :  { %v4698_v13 = vmul.f32 %v5238_v45, %v4689_v4 }
0x10bb   :  { %v6185_v38 = vpop.eup %6184 }
0x10bc   :  { %v4690_v43 = vmul.f32 %v6185_v38, %v4674_v8  ;;  %v4707_v32 = vadd.f32 %v5239_v19, %v4698_v13 }
0x10be   :  { %v4699_v48 = vmul.f32 %v5238_v45, %v4690_v43  ;;  %v4709_v31 = vmax.f32 %v4707_v32, 0.0 }
0x10c0   :  { %v4708_v10 = vadd.f32 %v5239_v19, %v4699_v48 }
0x10c2   :  { %v4710_v7 = vmax.f32 %v4708_v10, 0.0 }
0x10c4   :  { %v4711_v37 = vpack.c.bf16 %v4710_v7, %v4709_v31 }
0x10c6   :  { %5248 = vmatmul.mubr.msk.bf16.vlgmr.msra.gmra.mrb[52].mxu1 %vm4663_vm9, %v4711_v37 }
0x10c7   :  { %5420 = vmatprep.mubr.msk.bf16.mxu1 %vm6252_vm1, %v6240_v27 }
0x1199   :  { %v4797_v24 = vpop.f32.mrb[52].mxu1 }
0x119a   :  { %v4799_v15 = vpop.f32.mrb[53].mxu1 }
0x119b   :  { %v4801_v9 = vpop.f32.mrb[54].mxu1 }
0x119c   :  { %v4806_v53 = vpack.c.bf16 %v4801_v9, %v4797_v24  ;;  %v4803_v33 = vpop.f32.mrb[55].mxu1 }
0x119e   :  { %5419 = vmatpush3.bf16.msra.mxu1 %v4806_v53 }
0x11a1   :  { %5421 = vmatmul.mubr.msk.bf16.vlgmr.msra.gmra.mrb[56].mxu1 %vm2115_vm2, %v6188_v40 }
0x1274   :  { %v4841_v29 = vpop.f32.mrb[56].mxu1 }
0x1275   :  { %v4842_v22 = vadd.f32 %v4841_v29, %v4799_v15  ;;  %v5422_v18 = vpop.f32.mrb[57].mxu1 }
0x1276   :  { %v4844_v27 = vpop.f32.mrb[58].mxu1 }
0x1277   :  { %v4855_v20 = vadd.f32 %v5250_v30, %v4842_v22  ;;  %v4845_v35 = vadd.f32 %v4844_v27, %v4803_v33  ;;  %v5423_v52 = vpop.f32.mrb[59].mxu1 }
0x1279   :  { %4857 = vst [vmem:[#allocation6] sm:$0xff] %v4855_v20  ;;  %v4856_v44 = vadd.f32 %v5250_v30, %v4845_v35 }
0x127b   :  { %4858 = vst [vmem:[#allocation6 + $0x8] sm:$0xff] %v4856_v44 }
0x127c   :  { %6222 = shalt.err (!%p6219_p12)
}
0x127d   :  { %s6223_s27 = scalar_lea.hbm %s7425_s21, 256 }
0x127e   :  { %p6224_p13 = scmp.ne.s32.totalorder %s7425_s21, %s6223_s27  ;;  %p6227_p0 = scmp.lt.u32.totalorder %s6223_s27, %s7425_s21 }
0x1280   :  { %p6229_p1 = pnand %p6227_p0, %p6224_p13 }
0x1282   :  { %6232 = shalt.err (!%p6229_p1)
}
0x1283   :  { %s6254_s12 = smov 128   ;;  %s6255_s10 = smov 8  }
0x1284   :  { %4870 = dma.vmem_to_hbm [thread:$0]  %s4865_s26, 256, %s7425_s21, [#allocation5], %s6254_s12, %s6254_s12, %s6255_s10  }
0x1285   :  { %6235 = dma.done.wait [#allocation5], 256  }
0x1286   :  { %6236 = vsyncadd [#allocation5], 4294967040 }
0x1287   :  { %4874 = vsyncpa [#allocation4], 1 }
0x1288   :  { %4875 = vsyncpa [#allocation5], 1 }

</bundles_post_ra>
